<compile_context>
chip_gen: v5e
topology: v5e:2x2
jax: 0.10.0
libtpu: 0.0.40
codegen_flags: <defaults>
</compile_context>

<pallas_src>
import jax
import jax.numpy as jnp
from jax.experimental import pallas as pl
from jax.experimental.pallas import tpu as pltpu


# --------------------------------------------------------------------------
# Kernel 1: bidirectional LSTM (single layer, zero initial state)
# --------------------------------------------------------------------------
def _bilstm_kernel(x_ref, wif_ref, whf_ref, bf_ref, wib_ref, whb_ref, bb_ref,
                   of_ref, ob_ref, h_ref, c_ref):
    # x_ref   : (T, D, B)   time-major, feature-major
    # wi*_ref : (4H, D)     PyTorch weight_ih layout (gates stacked i,f,g,o)
    # wh*_ref : (4H, H)     PyTorch weight_hh layout
    # b*_ref  : (4H, 1)     b_ih + b_hh
    # o*_ref  : (T, H, B)   per-direction hidden-state sequence (outputs)
    # h_ref, c_ref : (H, B) VMEM scratch state
    T = x_ref.shape[0]
    H = whf_ref.shape[1]

    def step(t, wi_ref, wh_ref, b_ref, o_ref):
        xt = x_ref[t]                                                 # (D, B)
        # One fused 4H-wide gate matmul per step (input + hidden + bias).
        g = (jnp.dot(wi_ref[...], xt, preferred_element_type=jnp.float32)
             + jnp.dot(wh_ref[...], h_ref[...],
                       preferred_element_type=jnp.float32)
             + b_ref[...])                                            # (4H, B)
        # Tile-aligned sublane slices (H is a multiple of 8): gates i, f, g, o.
        i = jax.nn.sigmoid(g[0 * H:1 * H, :])
        f = jax.nn.sigmoid(g[1 * H:2 * H, :])
        gg = jnp.tanh(g[2 * H:3 * H, :])
        o = jax.nn.sigmoid(g[3 * H:4 * H, :])
        c = f * c_ref[...] + i * gg
        h = o * jnp.tanh(c)
        c_ref[...] = c
        h_ref[...] = h
        o_ref[t] = h

    # ---- forward direction ----
    h_ref[...] = jnp.zeros_like(h_ref)
    c_ref[...] = jnp.zeros_like(c_ref)

    @pl.loop(0, T)
    def _fwd(t):
        step(t, wif_ref, whf_ref, bf_ref, of_ref)

    # ---- backward direction ----
    h_ref[...] = jnp.zeros_like(h_ref)
    c_ref[...] = jnp.zeros_like(c_ref)

    @pl.loop(0, T)
    def _bwd(s):
        step(T - 1 - s, wib_ref, whb_ref, bb_ref, ob_ref)


def bilstm_seq(x, p):
    """x: (B, T, D) batch-first (PyTorch convention).
    Returns the BiLSTM output sequence, sequence-major: (T, B, 2H)."""
    B, T, D = x.shape
    H = p["w_hh_f"].shape[1]
    x_tdb = jnp.transpose(x, (1, 2, 0))                      # (T, D, B)
    bf = (p["b_ih_f"] + p["b_hh_f"]).reshape(4 * H, 1)
    bb = (p["b_ih_b"] + p["b_hh_b"]).reshape(4 * H, 1)
    of, ob = pl.pallas_call(
        _bilstm_kernel,
        out_shape=(jax.ShapeDtypeStruct((T, H, B), jnp.float32),
                   jax.ShapeDtypeStruct((T, H, B), jnp.float32)),
        scratch_shapes=[pltpu.VMEM((H, B), jnp.float32),
                        pltpu.VMEM((H, B), jnp.float32)],
    )(x_tdb, p["w_ih_f"], p["w_hh_f"], bf, p["w_ih_b"], p["w_hh_b"], bb)
    seq = jnp.concatenate([of, ob], axis=1)                  # (T, 2H, B)
    return jnp.transpose(seq, (0, 2, 1))                     # (T, B, 2H)


# --------------------------------------------------------------------------
# Kernel 2: SATAR Attention (softmax over dim 0, weighted sum over sequence)
# --------------------------------------------------------------------------
def _attention_kernel(x_ref, wT_ref, b_ref, v_ref, out_ref):
    # x_ref  : (S, A, Hd)  sequence-major view of the torch (A, S, Hd) input
    # wT_ref : (Hd, Hd) = fc.weight.T ; b_ref: (1, Hd) ; v_ref: (1, Hd) = weight_vector.T
    # out_ref: (A, Hd)
    S, A, Hd = x_ref.shape
    acc = jnp.zeros((A, Hd), jnp.float32)
    for s in range(S):                                        # static unroll (S small)
        xs = x_ref[s]                                         # (A, Hd)
        e = jnp.tanh(jnp.dot(xs, wT_ref[...],
                             preferred_element_type=jnp.float32) + b_ref[...])
        col = jnp.sum(e * v_ref[...], axis=1, keepdims=True)  # (A, 1)
        # softmax over dim 0 (the A axis), independently per position s —
        # exactly torch's func.softmax(weight, dim=0).
        m = jnp.max(col, axis=0, keepdims=True)
        ex = jnp.exp(col - m)
        w = ex / jnp.sum(ex, axis=0, keepdims=True)           # (A, 1)
        acc = acc + xs * w
    out_ref[...] = acc.astype(out_ref.dtype)


def attention_pool(x_sa, p):
    """x_sa: (S, A, Hd). Returns (A, Hd)."""
    S, A, Hd = x_sa.shape
    return pl.pallas_call(
        _attention_kernel,
        out_shape=jax.ShapeDtypeStruct((A, Hd), jnp.float32),
    )(x_sa, p["fc_w"].T, p["fc_b"].reshape(1, Hd), p["v"].reshape(1, Hd))


def attention_pool_grouped(x, p):
    """x: (G, S, A, Hd) — G independent groups (users); softmax over A within
    each group. Returns (G, A, Hd). Gridded over G (parallel)."""
    G, S, A, Hd = x.shape
    return pl.pallas_call(
        _attention_kernel,
        out_shape=jax.ShapeDtypeStruct((G, A, Hd), jnp.float32),
        grid=(G,),
        in_specs=[
            pl.BlockSpec((None, S, A, Hd), lambda g: (g, 0, 0, 0)),
            pl.BlockSpec((Hd, Hd), lambda g: (0, 0)),
            pl.BlockSpec((1, Hd), lambda g: (0, 0)),
            pl.BlockSpec((1, Hd), lambda g: (0, 0)),
        ],
        out_specs=pl.BlockSpec((None, A, Hd), lambda g: (g, 0, 0)),
        compiler_params=pltpu.CompilerParams(
            dimension_semantics=("parallel",)),
    )(x, p["fc_w"].T, p["fc_b"].reshape(1, Hd), p["v"].reshape(1, Hd))


# --------------------------------------------------------------------------
# Full SemanticVector forward (inference mode: dropout = identity)
# --------------------------------------------------------------------------
@jax.jit
def semantic_vector_forward(words, tweets, params):
    B, WT, E = words.shape
    _, NT, TS, _ = tweets.shape

    # ---- word level ----
    word_seq = bilstm_seq(words, params["word_lstm"])              # (WT, B, hid/2)
    words_rep = attention_pool(word_seq, params["word_attn"])      # (B, hid/2)
    # TODO(synk): nn.Dropout is inference-mode identity here.

    # ---- tweet low level (all users' tweets batched into one BiLSTM call) ----
    tweets_flat = tweets.reshape(B * NT, TS, E)
    low_seq = bilstm_seq(tweets_flat, params["tweet_low_lstm"])    # (TS, B*NT, hid)
    Ht = low_seq.shape[-1]
    low_grp = jnp.transpose(low_seq.reshape(TS, B, NT, Ht),
                            (1, 0, 2, 3))                          # (B, TS, NT, hid)
    tweets_low_rep = attention_pool_grouped(
        low_grp, params["tweet_low_attn"])                         # (B, NT, hid)

    # ---- tweet high level ----
    high_seq = bilstm_seq(tweets_low_rep, params["tweet_high_lstm"])  # (NT, B, hid/2)
    tweets_rep = attention_pool(high_seq, params["tweet_high_attn"])  # (B, hid/2)

    return jnp.concatenate([words_rep, tweets_rep], axis=1)        # (B, hidden_dim)


# --------------------------------------------------------------------------
# Pure-JAX reference mirroring the PyTorch module exactly
# --------------------------------------------------------------------------
def _lstm_dir_ref(x, w_ih, w_hh, b_ih, b_hh):
    B = x.shape[0]
    H = w_hh.shape[1]

    def step(carry, xt):
        h, c = carry
        g = xt @ w_ih.T + b_ih + h @ w_hh.T + b_hh
        i, f, gg, o = jnp.split(g, 4, axis=-1)
        c = jax.nn.sigmoid(f) * c + jax.nn.sigmoid(i) * jnp.tanh(gg)
        h = jax.nn.sigmoid(o) * jnp.tanh(c)
        return (h, c), h

    h0 = jnp.zeros((B, H), jnp.float32)
    c0 = jnp.zeros((B, H), jnp.float32)
    _, hs = jax.lax.scan(step, (h0, c0), jnp.transpose(x, (1, 0, 2)))
    return jnp.transpose(hs, (1, 0, 2))


def _bilstm_ref(x, p):
    fwd = _lstm_dir_ref(x, p["w_ih_f"], p["w_hh_f"], p["b_ih_f"], p["b_hh_f"])
    bwd = _lstm_dir_ref(x[:, ::-1, :], p["w_ih_b"], p["w_hh_b"],
                        p["b_ih_b"], p["b_hh_b"])[:, ::-1, :]
    return jnp.concatenate([fwd, bwd], axis=-1)


def _attention_ref(x, p):
    w = jnp.tanh(x @ p["fc_w"].T + p["fc_b"]) @ p["v"]             # (A, S, 1)
    w = jax.nn.softmax(w, axis=0)
    return jnp.sum(x * w, axis=-2)                                  # (A, Hd)


def _semantic_vector_ref(words, tweets, params):
    words_rep = _attention_ref(_bilstm_ref(words, params["word_lstm"]),
                               params["word_attn"])
    B = tweets.shape[0]
    highs = []
    for b in range(B):
        low = _bilstm_ref(tweets[b], params["tweet_low_lstm"])
        highs.append(_attention_ref(low, params["tweet_low_attn"]))
    high_in = jnp.stack(highs)
    high = _bilstm_ref(high_in, params["tweet_high_lstm"])
    tweets_rep = _attention_ref(high, params["tweet_high_attn"])
    return jnp.concatenate([words_rep, tweets_rep], axis=1)


# --------------------------------------------------------------------------
# Parameter init (PyTorch layouts)
# --------------------------------------------------------------------------
def init_params(key, hidden_dim, embedding_dim):
    scale = 0.3

    def lstm_params(k, in_dim, h):
        ks = jax.random.split(k, 8)
        return {
            "w_ih_f": scale * jax.random.normal(ks[0], (4 * h, in_dim), jnp.float32),
            "w_hh_f": scale * jax.random.normal(ks[1], (4 * h, h), jnp.float32),
            "b_ih_f": scale * jax.random.normal(ks[2], (4 * h,), jnp.float32),
            "b_hh_f": scale * jax.random.normal(ks[3], (4 * h,), jnp.float32),
            "w_ih_b": scale * jax.random.normal(ks[4], (4 * h, in_dim), jnp.float32),
            "w_hh_b": scale * jax.random.normal(ks[5], (4 * h, h), jnp.float32),
            "b_ih_b": scale * jax.random.normal(ks[6], (4 * h,), jnp.float32),
            "b_hh_b": scale * jax.random.normal(ks[7], (4 * h,), jnp.float32),
        }

    def attn_params(k, h):
        ks = jax.random.split(k, 3)
        return {"fc_w": scale * jax.random.normal(ks[0], (h, h), jnp.float32),
                "fc_b": scale * jax.random.normal(ks[1], (h,), jnp.float32),
                "v":    scale * jax.random.normal(ks[2], (h, 1), jnp.float32)}

    k = jax.random.split(key, 6)
    hd = hidden_dim
    return {
        # SemanticWord(in=E, hidden_dim=hd//2) -> lstm hidden = hd//4, output hd//2
        "word_lstm":       lstm_params(k[0], embedding_dim, (hd // 2) // 2),
        # SemanticWord(in=E, hidden_dim=hd)    -> lstm hidden = hd//2, output hd
        "tweet_low_lstm":  lstm_params(k[1], embedding_dim, hd // 2),
        # SemanticTweet(in=hd, hidden_dim=hd//2) -> lstm hidden = hd//4, output hd//2
        "tweet_high_lstm": lstm_params(k[2], hd, (hd // 2) // 2),
        "word_attn":       attn_params(k[3], hd // 2),
        "tweet_low_attn":  attn_params(k[4], hd),
        "tweet_high_attn": attn_params(k[5], hd // 2),
    }


if __name__ == "__main__":
    hidden_dim = 32
    embedding_dim = 16
    batch = 2
    num_tweets = 4
    tweet_len = 8
    word_len = 8

    key = jax.random.PRNGKey(0)
    k_params, k_words, k_tweets = jax.random.split(key, 3)
    params = init_params(k_params, hidden_dim, embedding_dim)
    words = jax.random.normal(k_words, (batch, word_len, embedding_dim), jnp.float32)
    tweets = jax.random.normal(
        k_tweets, (batch, num_tweets, tweet_len, embedding_dim), jnp.float32)

    out = semantic_vector_forward(words, tweets, params)
    out = jax.block_until_ready(out)

    ref = _semantic_vector_ref(words, tweets, params)
    assert out.shape == (batch, hidden_dim)
    assert jnp.allclose(out, ref, atol=1e-4, rtol=1e-4), (
        "mismatch vs reference, max abs err = "
        f"{jnp.max(jnp.abs(out - ref))}")

    print("KERNEL_OK")
</pallas_src>

<mosaic_0001>
module attributes {stable_mosaic.version = 11 : i64} {
  func.func @_bilstm_kernel(%arg0: memref<8x16x8xf32, #tpu.memory_space<vmem>>, %arg1: memref<64x16xf32, #tpu.memory_space<vmem>>, %arg2: memref<64x16xf32, #tpu.memory_space<vmem>>, %arg3: memref<64x1xf32, #tpu.memory_space<vmem>>, %arg4: memref<64x16xf32, #tpu.memory_space<vmem>>, %arg5: memref<64x16xf32, #tpu.memory_space<vmem>>, %arg6: memref<64x1xf32, #tpu.memory_space<vmem>>, %arg7: memref<8x16x8xf32, #tpu.memory_space<vmem>>, %arg8: memref<8x16x8xf32, #tpu.memory_space<vmem>>, %arg9: memref<16x8xf32, #tpu.memory_space<vmem>>, %arg10: memref<16x8xf32, #tpu.memory_space<vmem>>) attributes {dimension_semantics = [], scalar_prefetch = 0 : i64, scratch_operands = 2 : i64, tpu.core_type = #tpu.core_type<tc>} {
    %cst = arith.constant 0.000000e+00 : f32
    %0 = vector.broadcast %cst : f32 to vector<16x8xf32>
    %c0 = arith.constant 0 : index
    %c0_0 = arith.constant 0 : index
    %1 = vector.load %arg9[%c0, %c0_0] : memref<16x8xf32, #tpu.memory_space<vmem>>, vector<16x8xf32>
    tpu.vector_store %arg9[%c0, %c0_0], %0 {strides = array<i32>} : memref<16x8xf32, #tpu.memory_space<vmem>>, vector<16x8xf32>,
    %cst_1 = arith.constant 0.000000e+00 : f32
    %2 = vector.broadcast %cst_1 : f32 to vector<16x8xf32>
    %c0_2 = arith.constant 0 : index
    %c0_3 = arith.constant 0 : index
    %3 = vector.load %arg10[%c0_2, %c0_3] : memref<16x8xf32, #tpu.memory_space<vmem>>, vector<16x8xf32>
    tpu.vector_store %arg10[%c0_2, %c0_3], %2 {strides = array<i32>} : memref<16x8xf32, #tpu.memory_space<vmem>>, vector<16x8xf32>,
    %c0_i32 = arith.constant 0 : i32
    %c8_i32 = arith.constant 8 : i32
    %4 = arith.addi %c0_i32, %c8_i32 : i32
    %c1_i32 = arith.constant 1 : i32
    scf.for %arg11 = %c0_i32 to %4 step %c1_i32  : i32 {
      %c1_i32_15 = arith.constant 1 : i32
      %10 = arith.muli %arg11, %c1_i32_15 : i32
      %c0_i32_16 = arith.constant 0 : i32
      %11 = arith.addi %c0_i32_16, %10 : i32
      %12 = arith.index_cast %11 : i32 to index
      %c0_17 = arith.constant 0 : index
      %c0_18 = arith.constant 0 : index
      %13 = vector.load %arg0[%12, %c0_17, %c0_18] : memref<8x16x8xf32, #tpu.memory_space<vmem>>, vector<1x16x8xf32>
      %14 = vector.shape_cast %13 : vector<1x16x8xf32> to vector<16x8xf32>
      %c0_19 = arith.constant 0 : index
      %c0_20 = arith.constant 0 : index
      %15 = vector.load %arg1[%c0_19, %c0_20] : memref<64x16xf32, #tpu.memory_space<vmem>>, vector<64x16xf32>
      %cst_21 = arith.constant dense<0.000000e+00> : vector<64x8xf32>
      %16 = tpu.matmul %15, %14, %cst_21 {dimension_numbers = #tpu.dot_dimension_numbers<[1], [0], [0], [1], [0, 0, 1, 1], [], []>} : vector<64x16xf32>, vector<16x8xf32>, vector<64x8xf32> -> vector<64x8xf32>
      %c0_22 = arith.constant 0 : index
      %c0_23 = arith.constant 0 : index
      %17 = vector.load %arg2[%c0_22, %c0_23] : memref<64x16xf32, #tpu.memory_space<vmem>>, vector<64x16xf32>
      %c0_24 = arith.constant 0 : index
      %c0_25 = arith.constant 0 : index
      %18 = vector.load %arg9[%c0_24, %c0_25] : memref<16x8xf32, #tpu.memory_space<vmem>>, vector<16x8xf32>
      %cst_26 = arith.constant dense<0.000000e+00> : vector<64x8xf32>
      %19 = tpu.matmul %17, %18, %cst_26 {dimension_numbers = #tpu.dot_dimension_numbers<[1], [0], [0], [1], [0, 0, 1, 1], [], []>} : vector<64x16xf32>, vector<16x8xf32>, vector<64x8xf32> -> vector<64x8xf32>
      %20 = arith.addf %16, %19 : vector<64x8xf32>
      %c0_27 = arith.constant 0 : index
      %c0_28 = arith.constant 0 : index
      %21 = vector.load %arg3[%c0_27, %c0_28] : memref<64x1xf32, #tpu.memory_space<vmem>>, vector<64x1xf32>
      %22 = vector.broadcast %21 : vector<64x1xf32> to vector<64x8xf32>
      %23 = arith.addf %20, %22 : vector<64x8xf32>
      %24 = vector.extract_strided_slice %23 {offsets = [0, 0], sizes = [16, 8], strides = [1, 1]} : vector<64x8xf32> to vector<16x8xf32>
      %25 = arith.negf %24 : vector<16x8xf32>
      %26 = math.exp %25 : vector<16x8xf32>
      %cst_29 = arith.constant 1.000000e+00 : f32
      %27 = vector.broadcast %cst_29 : f32 to vector<16x8xf32>
      %28 = arith.addf %27, %26 : vector<16x8xf32>
      %29 = arith.divf %27, %28 : vector<16x8xf32>
      %30 = vector.extract_strided_slice %23 {offsets = [16, 0], sizes = [16, 8], strides = [1, 1]} : vector<64x8xf32> to vector<16x8xf32>
      %31 = arith.negf %30 : vector<16x8xf32>
      %32 = math.exp %31 : vector<16x8xf32>
      %cst_30 = arith.constant 1.000000e+00 : f32
      %33 = vector.broadcast %cst_30 : f32 to vector<16x8xf32>
      %34 = arith.addf %33, %32 : vector<16x8xf32>
      %35 = arith.divf %33, %34 : vector<16x8xf32>
      %36 = vector.extract_strided_slice %23 {offsets = [32, 0], sizes = [16, 8], strides = [1, 1]} : vector<64x8xf32> to vector<16x8xf32>
      %37 = math.tanh %36 : vector<16x8xf32>
      %38 = vector.extract_strided_slice %23 {offsets = [48, 0], sizes = [16, 8], strides = [1, 1]} : vector<64x8xf32> to vector<16x8xf32>
      %39 = arith.negf %38 : vector<16x8xf32>
      %40 = math.exp %39 : vector<16x8xf32>
      %cst_31 = arith.constant 1.000000e+00 : f32
      %41 = vector.broadcast %cst_31 : f32 to vector<16x8xf32>
      %42 = arith.addf %41, %40 : vector<16x8xf32>
      %43 = arith.divf %41, %42 : vector<16x8xf32>
      %c0_32 = arith.constant 0 : index
      %c0_33 = arith.constant 0 : index
      %44 = vector.load %arg10[%c0_32, %c0_33] : memref<16x8xf32, #tpu.memory_space<vmem>>, vector<16x8xf32>
      %45 = arith.mulf %35, %44 : vector<16x8xf32>
      %46 = arith.mulf %29, %37 : vector<16x8xf32>
      %47 = arith.addf %45, %46 : vector<16x8xf32>
      %48 = math.tanh %47 : vector<16x8xf32>
      %49 = arith.mulf %43, %48 : vector<16x8xf32>
      %c0_34 = arith.constant 0 : index
      %c0_35 = arith.constant 0 : index
      %50 = vector.load %arg10[%c0_34, %c0_35] : memref<16x8xf32, #tpu.memory_space<vmem>>, vector<16x8xf32>
      tpu.vector_store %arg10[%c0_34, %c0_35], %47 {strides = array<i32>} : memref<16x8xf32, #tpu.memory_space<vmem>>, vector<16x8xf32>,
      %c0_36 = arith.constant 0 : index
      %c0_37 = arith.constant 0 : index
      %51 = vector.load %arg9[%c0_36, %c0_37] : memref<16x8xf32, #tpu.memory_space<vmem>>, vector<16x8xf32>
      tpu.vector_store %arg9[%c0_36, %c0_37], %49 {strides = array<i32>} : memref<16x8xf32, #tpu.memory_space<vmem>>, vector<16x8xf32>,
      %52 = arith.index_cast %11 : i32 to index
      %c0_38 = arith.constant 0 : index
      %c0_39 = arith.constant 0 : index
      %53 = vector.load %arg7[%52, %c0_38, %c0_39] : memref<8x16x8xf32, #tpu.memory_space<vmem>>, vector<1x16x8xf32>
      %54 = vector.shape_cast %53 : vector<1x16x8xf32> to vector<16x8xf32>
      %55 = vector.shape_cast %49 : vector<16x8xf32> to vector<1x16x8xf32>
      tpu.vector_store %arg7[%52, %c0_38, %c0_39], %55 {strides = array<i32>} : memref<8x16x8xf32, #tpu.memory_space<vmem>>, vector<1x16x8xf32>,
    }
    %c8_i32_4 = arith.constant 8 : i32
    %cst_5 = arith.constant 0.000000e+00 : f32
    %5 = vector.broadcast %cst_5 : f32 to vector<16x8xf32>
    %c0_6 = arith.constant 0 : index
    %c0_7 = arith.constant 0 : index
    %6 = vector.load %arg9[%c0_6, %c0_7] : memref<16x8xf32, #tpu.memory_space<vmem>>, vector<16x8xf32>
    tpu.vector_store %arg9[%c0_6, %c0_7], %5 {strides = array<i32>} : memref<16x8xf32, #tpu.memory_space<vmem>>, vector<16x8xf32>,
    %cst_8 = arith.constant 0.000000e+00 : f32
    %7 = vector.broadcast %cst_8 : f32 to vector<16x8xf32>
    %c0_9 = arith.constant 0 : index
    %c0_10 = arith.constant 0 : index
    %8 = vector.load %arg10[%c0_9, %c0_10] : memref<16x8xf32, #tpu.memory_space<vmem>>, vector<16x8xf32>
    tpu.vector_store %arg10[%c0_9, %c0_10], %7 {strides = array<i32>} : memref<16x8xf32, #tpu.memory_space<vmem>>, vector<16x8xf32>,
    %c0_i32_11 = arith.constant 0 : i32
    %c8_i32_12 = arith.constant 8 : i32
    %9 = arith.addi %c0_i32_11, %c8_i32_12 : i32
    %c1_i32_13 = arith.constant 1 : i32
    scf.for %arg11 = %c0_i32_11 to %9 step %c1_i32_13  : i32 {
      %c1_i32_15 = arith.constant 1 : i32
      %10 = arith.muli %arg11, %c1_i32_15 : i32
      %c0_i32_16 = arith.constant 0 : i32
      %11 = arith.addi %c0_i32_16, %10 : i32
      %c7_i32 = arith.constant 7 : i32
      %12 = arith.subi %c7_i32, %11 : i32
      %13 = arith.index_cast %12 : i32 to index
      %c0_17 = arith.constant 0 : index
      %c0_18 = arith.constant 0 : index
      %14 = vector.load %arg0[%13, %c0_17, %c0_18] : memref<8x16x8xf32, #tpu.memory_space<vmem>>, vector<1x16x8xf32>
      %15 = vector.shape_cast %14 : vector<1x16x8xf32> to vector<16x8xf32>
      %c0_19 = arith.constant 0 : index
      %c0_20 = arith.constant 0 : index
      %16 = vector.load %arg4[%c0_19, %c0_20] : memref<64x16xf32, #tpu.memory_space<vmem>>, vector<64x16xf32>
      %cst_21 = arith.constant dense<0.000000e+00> : vector<64x8xf32>
      %17 = tpu.matmul %16, %15, %cst_21 {dimension_numbers = #tpu.dot_dimension_numbers<[1], [0], [0], [1], [0, 0, 1, 1], [], []>} : vector<64x16xf32>, vector<16x8xf32>, vector<64x8xf32> -> vector<64x8xf32>
      %c0_22 = arith.constant 0 : index
      %c0_23 = arith.constant 0 : index
      %18 = vector.load %arg5[%c0_22, %c0_23] : memref<64x16xf32, #tpu.memory_space<vmem>>, vector<64x16xf32>
      %c0_24 = arith.constant 0 : index
      %c0_25 = arith.constant 0 : index
      %19 = vector.load %arg9[%c0_24, %c0_25] : memref<16x8xf32, #tpu.memory_space<vmem>>, vector<16x8xf32>
      %cst_26 = arith.constant dense<0.000000e+00> : vector<64x8xf32>
      %20 = tpu.matmul %18, %19, %cst_26 {dimension_numbers = #tpu.dot_dimension_numbers<[1], [0], [0], [1], [0, 0, 1, 1], [], []>} : vector<64x16xf32>, vector<16x8xf32>, vector<64x8xf32> -> vector<64x8xf32>
      %21 = arith.addf %17, %20 : vector<64x8xf32>
      %c0_27 = arith.constant 0 : index
      %c0_28 = arith.constant 0 : index
      %22 = vector.load %arg6[%c0_27, %c0_28] : memref<64x1xf32, #tpu.memory_space<vmem>>, vector<64x1xf32>
      %23 = vector.broadcast %22 : vector<64x1xf32> to vector<64x8xf32>
      %24 = arith.addf %21, %23 : vector<64x8xf32>
      %25 = vector.extract_strided_slice %24 {offsets = [0, 0], sizes = [16, 8], strides = [1, 1]} : vector<64x8xf32> to vector<16x8xf32>
      %26 = arith.negf %25 : vector<16x8xf32>
      %27 = math.exp %26 : vector<16x8xf32>
      %cst_29 = arith.constant 1.000000e+00 : f32
      %28 = vector.broadcast %cst_29 : f32 to vector<16x8xf32>
      %29 = arith.addf %28, %27 : vector<16x8xf32>
      %30 = arith.divf %28, %29 : vector<16x8xf32>
      %31 = vector.extract_strided_slice %24 {offsets = [16, 0], sizes = [16, 8], strides = [1, 1]} : vector<64x8xf32> to vector<16x8xf32>
      %32 = arith.negf %31 : vector<16x8xf32>
      %33 = math.exp %32 : vector<16x8xf32>
      %cst_30 = arith.constant 1.000000e+00 : f32
      %34 = vector.broadcast %cst_30 : f32 to vector<16x8xf32>
      %35 = arith.addf %34, %33 : vector<16x8xf32>
      %36 = arith.divf %34, %35 : vector<16x8xf32>
      %37 = vector.extract_strided_slice %24 {offsets = [32, 0], sizes = [16, 8], strides = [1, 1]} : vector<64x8xf32> to vector<16x8xf32>
      %38 = math.tanh %37 : vector<16x8xf32>
      %39 = vector.extract_strided_slice %24 {offsets = [48, 0], sizes = [16, 8], strides = [1, 1]} : vector<64x8xf32> to vector<16x8xf32>
      %40 = arith.negf %39 : vector<16x8xf32>
      %41 = math.exp %40 : vector<16x8xf32>
      %cst_31 = arith.constant 1.000000e+00 : f32
      %42 = vector.broadcast %cst_31 : f32 to vector<16x8xf32>
      %43 = arith.addf %42, %41 : vector<16x8xf32>
      %44 = arith.divf %42, %43 : vector<16x8xf32>
      %c0_32 = arith.constant 0 : index
      %c0_33 = arith.constant 0 : index
      %45 = vector.load %arg10[%c0_32, %c0_33] : memref<16x8xf32, #tpu.memory_space<vmem>>, vector<16x8xf32>
      %46 = arith.mulf %36, %45 : vector<16x8xf32>
      %47 = arith.mulf %30, %38 : vector<16x8xf32>
      %48 = arith.addf %46, %47 : vector<16x8xf32>
      %49 = math.tanh %48 : vector<16x8xf32>
      %50 = arith.mulf %44, %49 : vector<16x8xf32>
      %c0_34 = arith.constant 0 : index
      %c0_35 = arith.constant 0 : index
      %51 = vector.load %arg10[%c0_34, %c0_35] : memref<16x8xf32, #tpu.memory_space<vmem>>, vector<16x8xf32>
      tpu.vector_store %arg10[%c0_34, %c0_35], %48 {strides = array<i32>} : memref<16x8xf32, #tpu.memory_space<vmem>>, vector<16x8xf32>,
      %c0_36 = arith.constant 0 : index
      %c0_37 = arith.constant 0 : index
      %52 = vector.load %arg9[%c0_36, %c0_37] : memref<16x8xf32, #tpu.memory_space<vmem>>, vector<16x8xf32>
      tpu.vector_store %arg9[%c0_36, %c0_37], %50 {strides = array<i32>} : memref<16x8xf32, #tpu.memory_space<vmem>>, vector<16x8xf32>,
      %53 = arith.index_cast %12 : i32 to index
      %c0_38 = arith.constant 0 : index
      %c0_39 = arith.constant 0 : index
      %54 = vector.load %arg8[%53, %c0_38, %c0_39] : memref<8x16x8xf32, #tpu.memory_space<vmem>>, vector<1x16x8xf32>
      %55 = vector.shape_cast %54 : vector<1x16x8xf32> to vector<16x8xf32>
      %56 = vector.shape_cast %50 : vector<16x8xf32> to vector<1x16x8xf32>
      tpu.vector_store %arg8[%53, %c0_38, %c0_39], %56 {strides = array<i32>} : memref<8x16x8xf32, #tpu.memory_space<vmem>>, vector<1x16x8xf32>,
    }
    %c8_i32_14 = arith.constant 8 : i32
    return
  }
}

module attributes {stable_mosaic.version = 11 : i64} {
  func.func @_attention_kernel(%arg0: i32, %arg1: memref<1x8x4x32xf32, #tpu.memory_space<vmem>>, %arg2: memref<32x32xf32, #tpu.memory_space<vmem>>, %arg3: memref<1x32xf32, #tpu.memory_space<vmem>>, %arg4: memref<1x32xf32, #tpu.memory_space<vmem>>, %arg5: memref<1x4x32xf32, #tpu.memory_space<vmem>>) attributes {dimension_semantics = [#tpu.dimension_semantics<parallel>], iteration_bounds = array<i64: 2>, scalar_prefetch = 0 : i64, scratch_operands = 0 : i64, tpu.core_type = #tpu.core_type<tc>, window_params = [{transform_indices = @transform_0, window_bounds = array<i64: 1, 8, 4, 32>}, {pipeline_mode = #tpu.pipeline_mode<synchronous>, transform_indices = @transform_1, window_bounds = array<i64: 32, 32>}, {pipeline_mode = #tpu.pipeline_mode<synchronous>, transform_indices = @transform_2, window_bounds = array<i64: 1, 32>}, {pipeline_mode = #tpu.pipeline_mode<synchronous>, transform_indices = @transform_3, window_bounds = array<i64: 1, 32>}, {transform_indices = @transform_4, window_bounds = array<i64: 1, 4, 32>}]} {
    %cst = arith.constant 0.000000e+00 : f32
    %0 = vector.broadcast %cst : f32 to vector<4x32xf32>
    %c0 = arith.constant 0 : index
    %c0_0 = arith.constant 0 : index
    %c0_1 = arith.constant 0 : index
    %c0_2 = arith.constant 0 : index
    %1 = vector.load %arg1[%c0, %c0_0, %c0_1, %c0_2] : memref<1x8x4x32xf32, #tpu.memory_space<vmem>>, vector<1x1x4x32xf32>
    %2 = vector.shape_cast %1 : vector<1x1x4x32xf32> to vector<4x32xf32>
    %c0_3 = arith.constant 0 : index
    %c0_4 = arith.constant 0 : index
    %3 = vector.load %arg2[%c0_3, %c0_4] : memref<32x32xf32, #tpu.memory_space<vmem>>, vector<32x32xf32>
    %cst_5 = arith.constant dense<0.000000e+00> : vector<4x32xf32>
    %4 = tpu.matmul %2, %3, %cst_5 {dimension_numbers = #tpu.dot_dimension_numbers<[1], [0], [0], [1], [0, 0, 1, 1], [], []>} : vector<4x32xf32>, vector<32x32xf32>, vector<4x32xf32> -> vector<4x32xf32>
    %c0_6 = arith.constant 0 : index
    %c0_7 = arith.constant 0 : index
    %5 = vector.load %arg3[%c0_6, %c0_7] : memref<1x32xf32, #tpu.memory_space<vmem>>, vector<1x32xf32>
    %6 = vector.broadcast %5 : vector<1x32xf32> to vector<4x32xf32>
    %7 = arith.addf %4, %6 : vector<4x32xf32>
    %8 = math.tanh %7 : vector<4x32xf32>
    %c0_8 = arith.constant 0 : index
    %c0_9 = arith.constant 0 : index
    %9 = vector.load %arg4[%c0_8, %c0_9] : memref<1x32xf32, #tpu.memory_space<vmem>>, vector<1x32xf32>
    %10 = vector.broadcast %9 : vector<1x32xf32> to vector<4x32xf32>
    %11 = arith.mulf %8, %10 : vector<4x32xf32>
    %cst_10 = arith.constant dense<0.000000e+00> : vector<4xf32>
    %12 = vector.multi_reduction <add>, %11, %cst_10 [1] : vector<4x32xf32> to vector<4xf32>
    %13 = vector.shape_cast %12 : vector<4xf32> to vector<4x1xf32>
    %cst_11 = arith.constant dense<0xFF800000> : vector<1xf32>
    %14 = vector.multi_reduction <maximumf>, %13, %cst_11 [0] : vector<4x1xf32> to vector<1xf32>
    %15 = vector.shape_cast %14 : vector<1xf32> to vector<1x1xf32>
    %16 = vector.broadcast %15 : vector<1x1xf32> to vector<4x1xf32>
    %17 = arith.subf %13, %16 : vector<4x1xf32>
    %18 = math.exp %17 : vector<4x1xf32>
    %cst_12 = arith.constant dense<0.000000e+00> : vector<1xf32>
    %19 = vector.multi_reduction <add>, %18, %cst_12 [0] : vector<4x1xf32> to vector<1xf32>
    %20 = vector.shape_cast %19 : vector<1xf32> to vector<1x1xf32>
    %21 = vector.broadcast %20 : vector<1x1xf32> to vector<4x1xf32>
    %22 = arith.divf %18, %21 : vector<4x1xf32>
    %23 = vector.broadcast %22 : vector<4x1xf32> to vector<4x32xf32>
    %24 = arith.mulf %2, %23 : vector<4x32xf32>
    %25 = arith.addf %0, %24 : vector<4x32xf32>
    %c0_13 = arith.constant 0 : index
    %c1 = arith.constant 1 : index
    %c0_14 = arith.constant 0 : index
    %c0_15 = arith.constant 0 : index
    %26 = vector.load %arg1[%c0_13, %c1, %c0_14, %c0_15] : memref<1x8x4x32xf32, #tpu.memory_space<vmem>>, vector<1x1x4x32xf32>
    %27 = vector.shape_cast %26 : vector<1x1x4x32xf32> to vector<4x32xf32>
    %c0_16 = arith.constant 0 : index
    %c0_17 = arith.constant 0 : index
    %28 = vector.load %arg2[%c0_16, %c0_17] : memref<32x32xf32, #tpu.memory_space<vmem>>, vector<32x32xf32>
    %cst_18 = arith.constant dense<0.000000e+00> : vector<4x32xf32>
    %29 = tpu.matmul %27, %28, %cst_18 {dimension_numbers = #tpu.dot_dimension_numbers<[1], [0], [0], [1], [0, 0, 1, 1], [], []>} : vector<4x32xf32>, vector<32x32xf32>, vector<4x32xf32> -> vector<4x32xf32>
    %c0_19 = arith.constant 0 : index
    %c0_20 = arith.constant 0 : index
    %30 = vector.load %arg3[%c0_19, %c0_20] : memref<1x32xf32, #tpu.memory_space<vmem>>, vector<1x32xf32>
    %31 = vector.broadcast %30 : vector<1x32xf32> to vector<4x32xf32>
    %32 = arith.addf %29, %31 : vector<4x32xf32>
    %33 = math.tanh %32 : vector<4x32xf32>
    %c0_21 = arith.constant 0 : index
    %c0_22 = arith.constant 0 : index
    %34 = vector.load %arg4[%c0_21, %c0_22] : memref<1x32xf32, #tpu.memory_space<vmem>>, vector<1x32xf32>
    %35 = vector.broadcast %34 : vector<1x32xf32> to vector<4x32xf32>
    %36 = arith.mulf %33, %35 : vector<4x32xf32>
    %cst_23 = arith.constant dense<0.000000e+00> : vector<4xf32>
    %37 = vector.multi_reduction <add>, %36, %cst_23 [1] : vector<4x32xf32> to vector<4xf32>
    %38 = vector.shape_cast %37 : vector<4xf32> to vector<4x1xf32>
    %cst_24 = arith.constant dense<0xFF800000> : vector<1xf32>
    %39 = vector.multi_reduction <maximumf>, %38, %cst_24 [0] : vector<4x1xf32> to vector<1xf32>
    %40 = vector.shape_cast %39 : vector<1xf32> to vector<1x1xf32>
    %41 = vector.broadcast %40 : vector<1x1xf32> to vector<4x1xf32>
    %42 = arith.subf %38, %41 : vector<4x1xf32>
    %43 = math.exp %42 : vector<4x1xf32>
    %cst_25 = arith.constant dense<0.000000e+00> : vector<1xf32>
    %44 = vector.multi_reduction <add>, %43, %cst_25 [0] : vector<4x1xf32> to vector<1xf32>
    %45 = vector.shape_cast %44 : vector<1xf32> to vector<1x1xf32>
    %46 = vector.broadcast %45 : vector<1x1xf32> to vector<4x1xf32>
    %47 = arith.divf %43, %46 : vector<4x1xf32>
    %48 = vector.broadcast %47 : vector<4x1xf32> to vector<4x32xf32>
    %49 = arith.mulf %27, %48 : vector<4x32xf32>
    %50 = arith.addf %25, %49 : vector<4x32xf32>
    %c0_26 = arith.constant 0 : index
    %c2 = arith.constant 2 : index
    %c0_27 = arith.constant 0 : index
    %c0_28 = arith.constant 0 : index
    %51 = vector.load %arg1[%c0_26, %c2, %c0_27, %c0_28] : memref<1x8x4x32xf32, #tpu.memory_space<vmem>>, vector<1x1x4x32xf32>
    %52 = vector.shape_cast %51 : vector<1x1x4x32xf32> to vector<4x32xf32>
    %c0_29 = arith.constant 0 : index
    %c0_30 = arith.constant 0 : index
    %53 = vector.load %arg2[%c0_29, %c0_30] : memref<32x32xf32, #tpu.memory_space<vmem>>, vector<32x32xf32>
    %cst_31 = arith.constant dense<0.000000e+00> : vector<4x32xf32>
    %54 = tpu.matmul %52, %53, %cst_31 {dimension_numbers = #tpu.dot_dimension_numbers<[1], [0], [0], [1], [0, 0, 1, 1], [], []>} : vector<4x32xf32>, vector<32x32xf32>, vector<4x32xf32> -> vector<4x32xf32>
    %c0_32 = arith.constant 0 : index
    %c0_33 = arith.constant 0 : index
    %55 = vector.load %arg3[%c0_32, %c0_33] : memref<1x32xf32, #tpu.memory_space<vmem>>, vector<1x32xf32>
    %56 = vector.broadcast %55 : vector<1x32xf32> to vector<4x32xf32>
    %57 = arith.addf %54, %56 : vector<4x32xf32>
    %58 = math.tanh %57 : vector<4x32xf32>
    %c0_34 = arith.constant 0 : index
    %c0_35 = arith.constant 0 : index
    %59 = vector.load %arg4[%c0_34, %c0_35] : memref<1x32xf32, #tpu.memory_space<vmem>>, vector<1x32xf32>
    %60 = vector.broadcast %59 : vector<1x32xf32> to vector<4x32xf32>
    %61 = arith.mulf %58, %60 : vector<4x32xf32>
    %cst_36 = arith.constant dense<0.000000e+00> : vector<4xf32>
    %62 = vector.multi_reduction <add>, %61, %cst_36 [1] : vector<4x32xf32> to vector<4xf32>
    %63 = vector.shape_cast %62 : vector<4xf32> to vector<4x1xf32>
    %cst_37 = arith.constant dense<0xFF800000> : vector<1xf32>
    %64 = vector.multi_reduction <maximumf>, %63, %cst_37 [0] : vector<4x1xf32> to vector<1xf32>
    %65 = vector.shape_cast %64 : vector<1xf32> to vector<1x1xf32>
    %66 = vector.broadcast %65 : vector<1x1xf32> to vector<4x1xf32>
    %67 = arith.subf %63, %66 : vector<4x1xf32>
    %68 = math.exp %67 : vector<4x1xf32>
    %cst_38 = arith.constant dense<0.000000e+00> : vector<1xf32>
    %69 = vector.multi_reduction <add>, %68, %cst_38 [0] : vector<4x1xf32> to vector<1xf32>
    %70 = vector.shape_cast %69 : vector<1xf32> to vector<1x1xf32>
    %71 = vector.broadcast %70 : vector<1x1xf32> to vector<4x1xf32>
    %72 = arith.divf %68, %71 : vector<4x1xf32>
    %73 = vector.broadcast %72 : vector<4x1xf32> to vector<4x32xf32>
    %74 = arith.mulf %52, %73 : vector<4x32xf32>
    %75 = arith.addf %50, %74 : vector<4x32xf32>
    %c0_39 = arith.constant 0 : index
    %c3 = arith.constant 3 : index
    %c0_40 = arith.constant 0 : index
    %c0_41 = arith.constant 0 : index
    %76 = vector.load %arg1[%c0_39, %c3, %c0_40, %c0_41] : memref<1x8x4x32xf32, #tpu.memory_space<vmem>>, vector<1x1x4x32xf32>
    %77 = vector.shape_cast %76 : vector<1x1x4x32xf32> to vector<4x32xf32>
    %c0_42 = arith.constant 0 : index
    %c0_43 = arith.constant 0 : index
    %78 = vector.load %arg2[%c0_42, %c0_43] : memref<32x32xf32, #tpu.memory_space<vmem>>, vector<32x32xf32>
    %cst_44 = arith.constant dense<0.000000e+00> : vector<4x32xf32>
    %79 = tpu.matmul %77, %78, %cst_44 {dimension_numbers = #tpu.dot_dimension_numbers<[1], [0], [0], [1], [0, 0, 1, 1], [], []>} : vector<4x32xf32>, vector<32x32xf32>, vector<4x32xf32> -> vector<4x32xf32>
    %c0_45 = arith.constant 0 : index
    %c0_46 = arith.constant 0 : index
    %80 = vector.load %arg3[%c0_45, %c0_46] : memref<1x32xf32, #tpu.memory_space<vmem>>, vector<1x32xf32>
    %81 = vector.broadcast %80 : vector<1x32xf32> to vector<4x32xf32>
    %82 = arith.addf %79, %81 : vector<4x32xf32>
    %83 = math.tanh %82 : vector<4x32xf32>
    %c0_47 = arith.constant 0 : index
    %c0_48 = arith.constant 0 : index
    %84 = vector.load %arg4[%c0_47, %c0_48] : memref<1x32xf32, #tpu.memory_space<vmem>>, vector<1x32xf32>
    %85 = vector.broadcast %84 : vector<1x32xf32> to vector<4x32xf32>
    %86 = arith.mulf %83, %85 : vector<4x32xf32>
    %cst_49 = arith.constant dense<0.000000e+00> : vector<4xf32>
    %87 = vector.multi_reduction <add>, %86, %cst_49 [1] : vector<4x32xf32> to vector<4xf32>
    %88 = vector.shape_cast %87 : vector<4xf32> to vector<4x1xf32>
    %cst_50 = arith.constant dense<0xFF800000> : vector<1xf32>
    %89 = vector.multi_reduction <maximumf>, %88, %cst_50 [0] : vector<4x1xf32> to vector<1xf32>
    %90 = vector.shape_cast %89 : vector<1xf32> to vector<1x1xf32>
    %91 = vector.broadcast %90 : vector<1x1xf32> to vector<4x1xf32>
    %92 = arith.subf %88, %91 : vector<4x1xf32>
    %93 = math.exp %92 : vector<4x1xf32>
    %cst_51 = arith.constant dense<0.000000e+00> : vector<1xf32>
    %94 = vector.multi_reduction <add>, %93, %cst_51 [0] : vector<4x1xf32> to vector<1xf32>
    %95 = vector.shape_cast %94 : vector<1xf32> to vector<1x1xf32>
    %96 = vector.broadcast %95 : vector<1x1xf32> to vector<4x1xf32>
    %97 = arith.divf %93, %96 : vector<4x1xf32>
    %98 = vector.broadcast %97 : vector<4x1xf32> to vector<4x32xf32>
    %99 = arith.mulf %77, %98 : vector<4x32xf32>
    %100 = arith.addf %75, %99 : vector<4x32xf32>
    %c0_52 = arith.constant 0 : index
    %c4 = arith.constant 4 : index
    %c0_53 = arith.constant 0 : index
    %c0_54 = arith.constant 0 : index
    %101 = vector.load %arg1[%c0_52, %c4, %c0_53, %c0_54] : memref<1x8x4x32xf32, #tpu.memory_space<vmem>>, vector<1x1x4x32xf32>
    %102 = vector.shape_cast %101 : vector<1x1x4x32xf32> to vector<4x32xf32>
    %c0_55 = arith.constant 0 : index
    %c0_56 = arith.constant 0 : index
    %103 = vector.load %arg2[%c0_55, %c0_56] : memref<32x32xf32, #tpu.memory_space<vmem>>, vector<32x32xf32>
    %cst_57 = arith.constant dense<0.000000e+00> : vector<4x32xf32>
    %104 = tpu.matmul %102, %103, %cst_57 {dimension_numbers = #tpu.dot_dimension_numbers<[1], [0], [0], [1], [0, 0, 1, 1], [], []>} : vector<4x32xf32>, vector<32x32xf32>, vector<4x32xf32> -> vector<4x32xf32>
    %c0_58 = arith.constant 0 : index
    %c0_59 = arith.constant 0 : index
    %105 = vector.load %arg3[%c0_58, %c0_59] : memref<1x32xf32, #tpu.memory_space<vmem>>, vector<1x32xf32>
    %106 = vector.broadcast %105 : vector<1x32xf32> to vector<4x32xf32>
    %107 = arith.addf %104, %106 : vector<4x32xf32>
    %108 = math.tanh %107 : vector<4x32xf32>
    %c0_60 = arith.constant 0 : index
    %c0_61 = arith.constant 0 : index
    %109 = vector.load %arg4[%c0_60, %c0_61] : memref<1x32xf32, #tpu.memory_space<vmem>>, vector<1x32xf32>
    %110 = vector.broadcast %109 : vector<1x32xf32> to vector<4x32xf32>
    %111 = arith.mulf %108, %110 : vector<4x32xf32>
    %cst_62 = arith.constant dense<0.000000e+00> : vector<4xf32>
    %112 = vector.multi_reduction <add>, %111, %cst_62 [1] : vector<4x32xf32> to vector<4xf32>
    %113 = vector.shape_cast %112 : vector<4xf32> to vector<4x1xf32>
    %cst_63 = arith.constant dense<0xFF800000> : vector<1xf32>
    %114 = vector.multi_reduction <maximumf>, %113, %cst_63 [0] : vector<4x1xf32> to vector<1xf32>
    %115 = vector.shape_cast %114 : vector<1xf32> to vector<1x1xf32>
    %116 = vector.broadcast %115 : vector<1x1xf32> to vector<4x1xf32>
    %117 = arith.subf %113, %116 : vector<4x1xf32>
    %118 = math.exp %117 : vector<4x1xf32>
    %cst_64 = arith.constant dense<0.000000e+00> : vector<1xf32>
    %119 = vector.multi_reduction <add>, %118, %cst_64 [0] : vector<4x1xf32> to vector<1xf32>
    %120 = vector.shape_cast %119 : vector<1xf32> to vector<1x1xf32>
    %121 = vector.broadcast %120 : vector<1x1xf32> to vector<4x1xf32>
    %122 = arith.divf %118, %121 : vector<4x1xf32>
    %123 = vector.broadcast %122 : vector<4x1xf32> to vector<4x32xf32>
    %124 = arith.mulf %102, %123 : vector<4x32xf32>
    %125 = arith.addf %100, %124 : vector<4x32xf32>
    %c0_65 = arith.constant 0 : index
    %c5 = arith.constant 5 : index
    %c0_66 = arith.constant 0 : index
    %c0_67 = arith.constant 0 : index
    %126 = vector.load %arg1[%c0_65, %c5, %c0_66, %c0_67] : memref<1x8x4x32xf32, #tpu.memory_space<vmem>>, vector<1x1x4x32xf32>
    %127 = vector.shape_cast %126 : vector<1x1x4x32xf32> to vector<4x32xf32>
    %c0_68 = arith.constant 0 : index
    %c0_69 = arith.constant 0 : index
    %128 = vector.load %arg2[%c0_68, %c0_69] : memref<32x32xf32, #tpu.memory_space<vmem>>, vector<32x32xf32>
    %cst_70 = arith.constant dense<0.000000e+00> : vector<4x32xf32>
    %129 = tpu.matmul %127, %128, %cst_70 {dimension_numbers = #tpu.dot_dimension_numbers<[1], [0], [0], [1], [0, 0, 1, 1], [], []>} : vector<4x32xf32>, vector<32x32xf32>, vector<4x32xf32> -> vector<4x32xf32>
    %c0_71 = arith.constant 0 : index
    %c0_72 = arith.constant 0 : index
    %130 = vector.load %arg3[%c0_71, %c0_72] : memref<1x32xf32, #tpu.memory_space<vmem>>, vector<1x32xf32>
    %131 = vector.broadcast %130 : vector<1x32xf32> to vector<4x32xf32>
    %132 = arith.addf %129, %131 : vector<4x32xf32>
    %133 = math.tanh %132 : vector<4x32xf32>
    %c0_73 = arith.constant 0 : index
    %c0_74 = arith.constant 0 : index
    %134 = vector.load %arg4[%c0_73, %c0_74] : memref<1x32xf32, #tpu.memory_space<vmem>>, vector<1x32xf32>
    %135 = vector.broadcast %134 : vector<1x32xf32> to vector<4x32xf32>
    %136 = arith.mulf %133, %135 : vector<4x32xf32>
    %cst_75 = arith.constant dense<0.000000e+00> : vector<4xf32>
    %137 = vector.multi_reduction <add>, %136, %cst_75 [1] : vector<4x32xf32> to vector<4xf32>
    %138 = vector.shape_cast %137 : vector<4xf32> to vector<4x1xf32>
    %cst_76 = arith.constant dense<0xFF800000> : vector<1xf32>
    %139 = vector.multi_reduction <maximumf>, %138, %cst_76 [0] : vector<4x1xf32> to vector<1xf32>
    %140 = vector.shape_cast %139 : vector<1xf32> to vector<1x1xf32>
    %141 = vector.broadcast %140 : vector<1x1xf32> to vector<4x1xf32>
    %142 = arith.subf %138, %141 : vector<4x1xf32>
    %143 = math.exp %142 : vector<4x1xf32>
    %cst_77 = arith.constant dense<0.000000e+00> : vector<1xf32>
    %144 = vector.multi_reduction <add>, %143, %cst_77 [0] : vector<4x1xf32> to vector<1xf32>
    %145 = vector.shape_cast %144 : vector<1xf32> to vector<1x1xf32>
    %146 = vector.broadcast %145 : vector<1x1xf32> to vector<4x1xf32>
    %147 = arith.divf %143, %146 : vector<4x1xf32>
    %148 = vector.broadcast %147 : vector<4x1xf32> to vector<4x32xf32>
    %149 = arith.mulf %127, %148 : vector<4x32xf32>
    %150 = arith.addf %125, %149 : vector<4x32xf32>
    %c0_78 = arith.constant 0 : index
    %c6 = arith.constant 6 : index
    %c0_79 = arith.constant 0 : index
    %c0_80 = arith.constant 0 : index
    %151 = vector.load %arg1[%c0_78, %c6, %c0_79, %c0_80] : memref<1x8x4x32xf32, #tpu.memory_space<vmem>>, vector<1x1x4x32xf32>
    %152 = vector.shape_cast %151 : vector<1x1x4x32xf32> to vector<4x32xf32>
    %c0_81 = arith.constant 0 : index
    %c0_82 = arith.constant 0 : index
    %153 = vector.load %arg2[%c0_81, %c0_82] : memref<32x32xf32, #tpu.memory_space<vmem>>, vector<32x32xf32>
    %cst_83 = arith.constant dense<0.000000e+00> : vector<4x32xf32>
    %154 = tpu.matmul %152, %153, %cst_83 {dimension_numbers = #tpu.dot_dimension_numbers<[1], [0], [0], [1], [0, 0, 1, 1], [], []>} : vector<4x32xf32>, vector<32x32xf32>, vector<4x32xf32> -> vector<4x32xf32>
    %c0_84 = arith.constant 0 : index
    %c0_85 = arith.constant 0 : index
    %155 = vector.load %arg3[%c0_84, %c0_85] : memref<1x32xf32, #tpu.memory_space<vmem>>, vector<1x32xf32>
    %156 = vector.broadcast %155 : vector<1x32xf32> to vector<4x32xf32>
    %157 = arith.addf %154, %156 : vector<4x32xf32>
    %158 = math.tanh %157 : vector<4x32xf32>
    %c0_86 = arith.constant 0 : index
    %c0_87 = arith.constant 0 : index
    %159 = vector.load %arg4[%c0_86, %c0_87] : memref<1x32xf32, #tpu.memory_space<vmem>>, vector<1x32xf32>
    %160 = vector.broadcast %159 : vector<1x32xf32> to vector<4x32xf32>
    %161 = arith.mulf %158, %160 : vector<4x32xf32>
    %cst_88 = arith.constant dense<0.000000e+00> : vector<4xf32>
    %162 = vector.multi_reduction <add>, %161, %cst_88 [1] : vector<4x32xf32> to vector<4xf32>
    %163 = vector.shape_cast %162 : vector<4xf32> to vector<4x1xf32>
    %cst_89 = arith.constant dense<0xFF800000> : vector<1xf32>
    %164 = vector.multi_reduction <maximumf>, %163, %cst_89 [0] : vector<4x1xf32> to vector<1xf32>
    %165 = vector.shape_cast %164 : vector<1xf32> to vector<1x1xf32>
    %166 = vector.broadcast %165 : vector<1x1xf32> to vector<4x1xf32>
    %167 = arith.subf %163, %166 : vector<4x1xf32>
    %168 = math.exp %167 : vector<4x1xf32>
    %cst_90 = arith.constant dense<0.000000e+00> : vector<1xf32>
    %169 = vector.multi_reduction <add>, %168, %cst_90 [0] : vector<4x1xf32> to vector<1xf32>
    %170 = vector.shape_cast %169 : vector<1xf32> to vector<1x1xf32>
    %171 = vector.broadcast %170 : vector<1x1xf32> to vector<4x1xf32>
    %172 = arith.divf %168, %171 : vector<4x1xf32>
    %173 = vector.broadcast %172 : vector<4x1xf32> to vector<4x32xf32>
    %174 = arith.mulf %152, %173 : vector<4x32xf32>
    %175 = arith.addf %150, %174 : vector<4x32xf32>
    %c0_91 = arith.constant 0 : index
    %c7 = arith.constant 7 : index
    %c0_92 = arith.constant 0 : index
    %c0_93 = arith.constant 0 : index
    %176 = vector.load %arg1[%c0_91, %c7, %c0_92, %c0_93] : memref<1x8x4x32xf32, #tpu.memory_space<vmem>>, vector<1x1x4x32xf32>
    %177 = vector.shape_cast %176 : vector<1x1x4x32xf32> to vector<4x32xf32>
    %c0_94 = arith.constant 0 : index
    %c0_95 = arith.constant 0 : index
    %178 = vector.load %arg2[%c0_94, %c0_95] : memref<32x32xf32, #tpu.memory_space<vmem>>, vector<32x32xf32>
    %cst_96 = arith.constant dense<0.000000e+00> : vector<4x32xf32>
    %179 = tpu.matmul %177, %178, %cst_96 {dimension_numbers = #tpu.dot_dimension_numbers<[1], [0], [0], [1], [0, 0, 1, 1], [], []>} : vector<4x32xf32>, vector<32x32xf32>, vector<4x32xf32> -> vector<4x32xf32>
    %c0_97 = arith.constant 0 : index
    %c0_98 = arith.constant 0 : index
    %180 = vector.load %arg3[%c0_97, %c0_98] : memref<1x32xf32, #tpu.memory_space<vmem>>, vector<1x32xf32>
    %181 = vector.broadcast %180 : vector<1x32xf32> to vector<4x32xf32>
    %182 = arith.addf %179, %181 : vector<4x32xf32>
    %183 = math.tanh %182 : vector<4x32xf32>
    %c0_99 = arith.constant 0 : index
    %c0_100 = arith.constant 0 : index
    %184 = vector.load %arg4[%c0_99, %c0_100] : memref<1x32xf32, #tpu.memory_space<vmem>>, vector<1x32xf32>
    %185 = vector.broadcast %184 : vector<1x32xf32> to vector<4x32xf32>
    %186 = arith.mulf %183, %185 : vector<4x32xf32>
    %cst_101 = arith.constant dense<0.000000e+00> : vector<4xf32>
    %187 = vector.multi_reduction <add>, %186, %cst_101 [1] : vector<4x32xf32> to vector<4xf32>
    %188 = vector.shape_cast %187 : vector<4xf32> to vector<4x1xf32>
    %cst_102 = arith.constant dense<0xFF800000> : vector<1xf32>
    %189 = vector.multi_reduction <maximumf>, %188, %cst_102 [0] : vector<4x1xf32> to vector<1xf32>
    %190 = vector.shape_cast %189 : vector<1xf32> to vector<1x1xf32>
    %191 = vector.broadcast %190 : vector<1x1xf32> to vector<4x1xf32>
    %192 = arith.subf %188, %191 : vector<4x1xf32>
    %193 = math.exp %192 : vector<4x1xf32>
    %cst_103 = arith.constant dense<0.000000e+00> : vector<1xf32>
    %194 = vector.multi_reduction <add>, %193, %cst_103 [0] : vector<4x1xf32> to vector<1xf32>
    %195 = vector.shape_cast %194 : vector<1xf32> to vector<1x1xf32>
    %196 = vector.broadcast %195 : vector<1x1xf32> to vector<4x1xf32>
    %197 = arith.divf %193, %196 : vector<4x1xf32>
    %198 = vector.broadcast %197 : vector<4x1xf32> to vector<4x32xf32>
    %199 = arith.mulf %177, %198 : vector<4x32xf32>
    %200 = arith.addf %175, %199 : vector<4x32xf32>
    %c0_104 = arith.constant 0 : index
    %c0_105 = arith.constant 0 : index
    %c0_106 = arith.constant 0 : index
    %201 = vector.load %arg5[%c0_104, %c0_105, %c0_106] : memref<1x4x32xf32, #tpu.memory_space<vmem>>, vector<1x4x32xf32>
    %202 = vector.shape_cast %201 : vector<1x4x32xf32> to vector<4x32xf32>
    %203 = vector.shape_cast %200 : vector<4x32xf32> to vector<1x4x32xf32>
    tpu.vector_store %arg5[%c0_104, %c0_105, %c0_106], %203 {strides = array<i32>} : memref<1x4x32xf32, #tpu.memory_space<vmem>>, vector<1x4x32xf32>,
    return
  }
  func.func @transform_0(%arg0: i32) -> (i32, i32, i32, i32) {
    %c0_i32 = arith.constant 0 : i32
    %c0_i32_0 = arith.constant 0 : i32
    %c0_i32_1 = arith.constant 0 : i32
    %c0_i32_2 = arith.constant 0 : i32
    return %arg0, %c0_i32, %c0_i32_0, %c0_i32_1 : i32, i32, i32, i32
  }
  func.func @transform_1(%arg0: i32) -> (i32, i32) {
    %c0_i32 = arith.constant 0 : i32
    %c0_i32_0 = arith.constant 0 : i32
    %c0_i32_1 = arith.constant 0 : i32
    return %c0_i32, %c0_i32_0 : i32, i32
  }
  func.func @transform_2(%arg0: i32) -> (i32, i32) {
    %c0_i32 = arith.constant 0 : i32
    %c0_i32_0 = arith.constant 0 : i32
    %c0_i32_1 = arith.constant 0 : i32
    return %c0_i32, %c0_i32_0 : i32, i32
  }
  func.func @transform_3(%arg0: i32) -> (i32, i32) {
    %c0_i32 = arith.constant 0 : i32
    %c0_i32_0 = arith.constant 0 : i32
    %c0_i32_1 = arith.constant 0 : i32
    return %c0_i32, %c0_i32_0 : i32, i32
  }
  func.func @transform_4(%arg0: i32) -> (i32, i32, i32) {
    %c0_i32 = arith.constant 0 : i32
    %c0_i32_0 = arith.constant 0 : i32
    %c0_i32_1 = arith.constant 0 : i32
    return %arg0, %c0_i32, %c0_i32_0 : i32, i32, i32
  }
}

module attributes {stable_mosaic.version = 11 : i64} {
  func.func @_bilstm_kernel(%arg0: memref<4x32x2xf32, #tpu.memory_space<vmem>>, %arg1: memref<32x32xf32, #tpu.memory_space<vmem>>, %arg2: memref<32x8xf32, #tpu.memory_space<vmem>>, %arg3: memref<32x1xf32, #tpu.memory_space<vmem>>, %arg4: memref<32x32xf32, #tpu.memory_space<vmem>>, %arg5: memref<32x8xf32, #tpu.memory_space<vmem>>, %arg6: memref<32x1xf32, #tpu.memory_space<vmem>>, %arg7: memref<4x8x2xf32, #tpu.memory_space<vmem>>, %arg8: memref<4x8x2xf32, #tpu.memory_space<vmem>>, %arg9: memref<8x2xf32, #tpu.memory_space<vmem>>, %arg10: memref<8x2xf32, #tpu.memory_space<vmem>>) attributes {dimension_semantics = [], scalar_prefetch = 0 : i64, scratch_operands = 2 : i64, tpu.core_type = #tpu.core_type<tc>} {
    %cst = arith.constant 0.000000e+00 : f32
    %0 = vector.broadcast %cst : f32 to vector<8x2xf32>
    %c0 = arith.constant 0 : index
    %c0_0 = arith.constant 0 : index
    %1 = vector.load %arg9[%c0, %c0_0] : memref<8x2xf32, #tpu.memory_space<vmem>>, vector<8x2xf32>
    tpu.vector_store %arg9[%c0, %c0_0], %0 {strides = array<i32>} : memref<8x2xf32, #tpu.memory_space<vmem>>, vector<8x2xf32>,
    %cst_1 = arith.constant 0.000000e+00 : f32
    %2 = vector.broadcast %cst_1 : f32 to vector<8x2xf32>
    %c0_2 = arith.constant 0 : index
    %c0_3 = arith.constant 0 : index
    %3 = vector.load %arg10[%c0_2, %c0_3] : memref<8x2xf32, #tpu.memory_space<vmem>>, vector<8x2xf32>
    tpu.vector_store %arg10[%c0_2, %c0_3], %2 {strides = array<i32>} : memref<8x2xf32, #tpu.memory_space<vmem>>, vector<8x2xf32>,
    %c0_i32 = arith.constant 0 : i32
    %c4_i32 = arith.constant 4 : i32
    %4 = arith.addi %c0_i32, %c4_i32 : i32
    %c1_i32 = arith.constant 1 : i32
    scf.for %arg11 = %c0_i32 to %4 step %c1_i32  : i32 {
      %c1_i32_15 = arith.constant 1 : i32
      %10 = arith.muli %arg11, %c1_i32_15 : i32
      %c0_i32_16 = arith.constant 0 : i32
      %11 = arith.addi %c0_i32_16, %10 : i32
      %12 = arith.index_cast %11 : i32 to index
      %c0_17 = arith.constant 0 : index
      %c0_18 = arith.constant 0 : index
      %13 = vector.load %arg0[%12, %c0_17, %c0_18] : memref<4x32x2xf32, #tpu.memory_space<vmem>>, vector<1x32x2xf32>
      %14 = vector.shape_cast %13 : vector<1x32x2xf32> to vector<32x2xf32>
      %c0_19 = arith.constant 0 : index
      %c0_20 = arith.constant 0 : index
      %15 = vector.load %arg1[%c0_19, %c0_20] : memref<32x32xf32, #tpu.memory_space<vmem>>, vector<32x32xf32>
      %cst_21 = arith.constant dense<0.000000e+00> : vector<32x2xf32>
      %16 = tpu.matmul %15, %14, %cst_21 {dimension_numbers = #tpu.dot_dimension_numbers<[1], [0], [0], [1], [0, 0, 1, 1], [], []>} : vector<32x32xf32>, vector<32x2xf32>, vector<32x2xf32> -> vector<32x2xf32>
      %c0_22 = arith.constant 0 : index
      %c0_23 = arith.constant 0 : index
      %17 = vector.load %arg2[%c0_22, %c0_23] : memref<32x8xf32, #tpu.memory_space<vmem>>, vector<32x8xf32>
      %c0_24 = arith.constant 0 : index
      %c0_25 = arith.constant 0 : index
      %18 = vector.load %arg9[%c0_24, %c0_25] : memref<8x2xf32, #tpu.memory_space<vmem>>, vector<8x2xf32>
      %cst_26 = arith.constant dense<0.000000e+00> : vector<32x2xf32>
      %19 = tpu.matmul %17, %18, %cst_26 {dimension_numbers = #tpu.dot_dimension_numbers<[1], [0], [0], [1], [0, 0, 1, 1], [], []>} : vector<32x8xf32>, vector<8x2xf32>, vector<32x2xf32> -> vector<32x2xf32>
      %20 = arith.addf %16, %19 : vector<32x2xf32>
      %c0_27 = arith.constant 0 : index
      %c0_28 = arith.constant 0 : index
      %21 = vector.load %arg3[%c0_27, %c0_28] : memref<32x1xf32, #tpu.memory_space<vmem>>, vector<32x1xf32>
      %22 = vector.broadcast %21 : vector<32x1xf32> to vector<32x2xf32>
      %23 = arith.addf %20, %22 : vector<32x2xf32>
      %24 = vector.extract_strided_slice %23 {offsets = [0, 0], sizes = [8, 2], strides = [1, 1]} : vector<32x2xf32> to vector<8x2xf32>
      %25 = arith.negf %24 : vector<8x2xf32>
      %26 = math.exp %25 : vector<8x2xf32>
      %cst_29 = arith.constant 1.000000e+00 : f32
      %27 = vector.broadcast %cst_29 : f32 to vector<8x2xf32>
      %28 = arith.addf %27, %26 : vector<8x2xf32>
      %29 = arith.divf %27, %28 : vector<8x2xf32>
      %30 = vector.extract_strided_slice %23 {offsets = [8, 0], sizes = [8, 2], strides = [1, 1]} : vector<32x2xf32> to vector<8x2xf32>
      %31 = arith.negf %30 : vector<8x2xf32>
      %32 = math.exp %31 : vector<8x2xf32>
      %cst_30 = arith.constant 1.000000e+00 : f32
      %33 = vector.broadcast %cst_30 : f32 to vector<8x2xf32>
      %34 = arith.addf %33, %32 : vector<8x2xf32>
      %35 = arith.divf %33, %34 : vector<8x2xf32>
      %36 = vector.extract_strided_slice %23 {offsets = [16, 0], sizes = [8, 2], strides = [1, 1]} : vector<32x2xf32> to vector<8x2xf32>
      %37 = math.tanh %36 : vector<8x2xf32>
      %38 = vector.extract_strided_slice %23 {offsets = [24, 0], sizes = [8, 2], strides = [1, 1]} : vector<32x2xf32> to vector<8x2xf32>
      %39 = arith.negf %38 : vector<8x2xf32>
      %40 = math.exp %39 : vector<8x2xf32>
      %cst_31 = arith.constant 1.000000e+00 : f32
      %41 = vector.broadcast %cst_31 : f32 to vector<8x2xf32>
      %42 = arith.addf %41, %40 : vector<8x2xf32>
      %43 = arith.divf %41, %42 : vector<8x2xf32>
      %c0_32 = arith.constant 0 : index
      %c0_33 = arith.constant 0 : index
      %44 = vector.load %arg10[%c0_32, %c0_33] : memref<8x2xf32, #tpu.memory_space<vmem>>, vector<8x2xf32>
      %45 = arith.mulf %35, %44 : vector<8x2xf32>
      %46 = arith.mulf %29, %37 : vector<8x2xf32>
      %47 = arith.addf %45, %46 : vector<8x2xf32>
      %48 = math.tanh %47 : vector<8x2xf32>
      %49 = arith.mulf %43, %48 : vector<8x2xf32>
      %c0_34 = arith.constant 0 : index
      %c0_35 = arith.constant 0 : index
      %50 = vector.load %arg10[%c0_34, %c0_35] : memref<8x2xf32, #tpu.memory_space<vmem>>, vector<8x2xf32>
      tpu.vector_store %arg10[%c0_34, %c0_35], %47 {strides = array<i32>} : memref<8x2xf32, #tpu.memory_space<vmem>>, vector<8x2xf32>,
      %c0_36 = arith.constant 0 : index
      %c0_37 = arith.constant 0 : index
      %51 = vector.load %arg9[%c0_36, %c0_37] : memref<8x2xf32, #tpu.memory_space<vmem>>, vector<8x2xf32>
      tpu.vector_store %arg9[%c0_36, %c0_37], %49 {strides = array<i32>} : memref<8x2xf32, #tpu.memory_space<vmem>>, vector<8x2xf32>,
      %52 = arith.index_cast %11 : i32 to index
      %c0_38 = arith.constant 0 : index
      %c0_39 = arith.constant 0 : index
      %53 = vector.load %arg7[%52, %c0_38, %c0_39] : memref<4x8x2xf32, #tpu.memory_space<vmem>>, vector<1x8x2xf32>
      %54 = vector.shape_cast %53 : vector<1x8x2xf32> to vector<8x2xf32>
      %55 = vector.shape_cast %49 : vector<8x2xf32> to vector<1x8x2xf32>
      tpu.vector_store %arg7[%52, %c0_38, %c0_39], %55 {strides = array<i32>} : memref<4x8x2xf32, #tpu.memory_space<vmem>>, vector<1x8x2xf32>,
    }
    %c4_i32_4 = arith.constant 4 : i32
    %cst_5 = arith.constant 0.000000e+00 : f32
    %5 = vector.broadcast %cst_5 : f32 to vector<8x2xf32>
    %c0_6 = arith.constant 0 : index
    %c0_7 = arith.constant 0 : index
    %6 = vector.load %arg9[%c0_6, %c0_7] : memref<8x2xf32, #tpu.memory_space<vmem>>, vector<8x2xf32>
    tpu.vector_store %arg9[%c0_6, %c0_7], %5 {strides = array<i32>} : memref<8x2xf32, #tpu.memory_space<vmem>>, vector<8x2xf32>,
    %cst_8 = arith.constant 0.000000e+00 : f32
    %7 = vector.broadcast %cst_8 : f32 to vector<8x2xf32>
    %c0_9 = arith.constant 0 : index
    %c0_10 = arith.constant 0 : index
    %8 = vector.load %arg10[%c0_9, %c0_10] : memref<8x2xf32, #tpu.memory_space<vmem>>, vector<8x2xf32>
    tpu.vector_store %arg10[%c0_9, %c0_10], %7 {strides = array<i32>} : memref<8x2xf32, #tpu.memory_space<vmem>>, vector<8x2xf32>,
    %c0_i32_11 = arith.constant 0 : i32
    %c4_i32_12 = arith.constant 4 : i32
    %9 = arith.addi %c0_i32_11, %c4_i32_12 : i32
    %c1_i32_13 = arith.constant 1 : i32
    scf.for %arg11 = %c0_i32_11 to %9 step %c1_i32_13  : i32 {
      %c1_i32_15 = arith.constant 1 : i32
      %10 = arith.muli %arg11, %c1_i32_15 : i32
      %c0_i32_16 = arith.constant 0 : i32
      %11 = arith.addi %c0_i32_16, %10 : i32
      %c3_i32 = arith.constant 3 : i32
      %12 = arith.subi %c3_i32, %11 : i32
      %13 = arith.index_cast %12 : i32 to index
      %c0_17 = arith.constant 0 : index
      %c0_18 = arith.constant 0 : index
      %14 = vector.load %arg0[%13, %c0_17, %c0_18] : memref<4x32x2xf32, #tpu.memory_space<vmem>>, vector<1x32x2xf32>
      %15 = vector.shape_cast %14 : vector<1x32x2xf32> to vector<32x2xf32>
      %c0_19 = arith.constant 0 : index
      %c0_20 = arith.constant 0 : index
      %16 = vector.load %arg4[%c0_19, %c0_20] : memref<32x32xf32, #tpu.memory_space<vmem>>, vector<32x32xf32>
      %cst_21 = arith.constant dense<0.000000e+00> : vector<32x2xf32>
      %17 = tpu.matmul %16, %15, %cst_21 {dimension_numbers = #tpu.dot_dimension_numbers<[1], [0], [0], [1], [0, 0, 1, 1], [], []>} : vector<32x32xf32>, vector<32x2xf32>, vector<32x2xf32> -> vector<32x2xf32>
      %c0_22 = arith.constant 0 : index
      %c0_23 = arith.constant 0 : index
      %18 = vector.load %arg5[%c0_22, %c0_23] : memref<32x8xf32, #tpu.memory_space<vmem>>, vector<32x8xf32>
      %c0_24 = arith.constant 0 : index
      %c0_25 = arith.constant 0 : index
      %19 = vector.load %arg9[%c0_24, %c0_25] : memref<8x2xf32, #tpu.memory_space<vmem>>, vector<8x2xf32>
      %cst_26 = arith.constant dense<0.000000e+00> : vector<32x2xf32>
      %20 = tpu.matmul %18, %19, %cst_26 {dimension_numbers = #tpu.dot_dimension_numbers<[1], [0], [0], [1], [0, 0, 1, 1], [], []>} : vector<32x8xf32>, vector<8x2xf32>, vector<32x2xf32> -> vector<32x2xf32>
      %21 = arith.addf %17, %20 : vector<32x2xf32>
      %c0_27 = arith.constant 0 : index
      %c0_28 = arith.constant 0 : index
      %22 = vector.load %arg6[%c0_27, %c0_28] : memref<32x1xf32, #tpu.memory_space<vmem>>, vector<32x1xf32>
      %23 = vector.broadcast %22 : vector<32x1xf32> to vector<32x2xf32>
      %24 = arith.addf %21, %23 : vector<32x2xf32>
      %25 = vector.extract_strided_slice %24 {offsets = [0, 0], sizes = [8, 2], strides = [1, 1]} : vector<32x2xf32> to vector<8x2xf32>
      %26 = arith.negf %25 : vector<8x2xf32>
      %27 = math.exp %26 : vector<8x2xf32>
      %cst_29 = arith.constant 1.000000e+00 : f32
      %28 = vector.broadcast %cst_29 : f32 to vector<8x2xf32>
      %29 = arith.addf %28, %27 : vector<8x2xf32>
      %30 = arith.divf %28, %29 : vector<8x2xf32>
      %31 = vector.extract_strided_slice %24 {offsets = [8, 0], sizes = [8, 2], strides = [1, 1]} : vector<32x2xf32> to vector<8x2xf32>
      %32 = arith.negf %31 : vector<8x2xf32>
      %33 = math.exp %32 : vector<8x2xf32>
      %cst_30 = arith.constant 1.000000e+00 : f32
      %34 = vector.broadcast %cst_30 : f32 to vector<8x2xf32>
      %35 = arith.addf %34, %33 : vector<8x2xf32>
      %36 = arith.divf %34, %35 : vector<8x2xf32>
      %37 = vector.extract_strided_slice %24 {offsets = [16, 0], sizes = [8, 2], strides = [1, 1]} : vector<32x2xf32> to vector<8x2xf32>
      %38 = math.tanh %37 : vector<8x2xf32>
      %39 = vector.extract_strided_slice %24 {offsets = [24, 0], sizes = [8, 2], strides = [1, 1]} : vector<32x2xf32> to vector<8x2xf32>
      %40 = arith.negf %39 : vector<8x2xf32>
      %41 = math.exp %40 : vector<8x2xf32>
      %cst_31 = arith.constant 1.000000e+00 : f32
      %42 = vector.broadcast %cst_31 : f32 to vector<8x2xf32>
      %43 = arith.addf %42, %41 : vector<8x2xf32>
      %44 = arith.divf %42, %43 : vector<8x2xf32>
      %c0_32 = arith.constant 0 : index
      %c0_33 = arith.constant 0 : index
      %45 = vector.load %arg10[%c0_32, %c0_33] : memref<8x2xf32, #tpu.memory_space<vmem>>, vector<8x2xf32>
      %46 = arith.mulf %36, %45 : vector<8x2xf32>
      %47 = arith.mulf %30, %38 : vector<8x2xf32>
      %48 = arith.addf %46, %47 : vector<8x2xf32>
      %49 = math.tanh %48 : vector<8x2xf32>
      %50 = arith.mulf %44, %49 : vector<8x2xf32>
      %c0_34 = arith.constant 0 : index
      %c0_35 = arith.constant 0 : index
      %51 = vector.load %arg10[%c0_34, %c0_35] : memref<8x2xf32, #tpu.memory_space<vmem>>, vector<8x2xf32>
      tpu.vector_store %arg10[%c0_34, %c0_35], %48 {strides = array<i32>} : memref<8x2xf32, #tpu.memory_space<vmem>>, vector<8x2xf32>,
      %c0_36 = arith.constant 0 : index
      %c0_37 = arith.constant 0 : index
      %52 = vector.load %arg9[%c0_36, %c0_37] : memref<8x2xf32, #tpu.memory_space<vmem>>, vector<8x2xf32>
      tpu.vector_store %arg9[%c0_36, %c0_37], %50 {strides = array<i32>} : memref<8x2xf32, #tpu.memory_space<vmem>>, vector<8x2xf32>,
      %53 = arith.index_cast %12 : i32 to index
      %c0_38 = arith.constant 0 : index
      %c0_39 = arith.constant 0 : index
      %54 = vector.load %arg8[%53, %c0_38, %c0_39] : memref<4x8x2xf32, #tpu.memory_space<vmem>>, vector<1x8x2xf32>
      %55 = vector.shape_cast %54 : vector<1x8x2xf32> to vector<8x2xf32>
      %56 = vector.shape_cast %50 : vector<8x2xf32> to vector<1x8x2xf32>
      tpu.vector_store %arg8[%53, %c0_38, %c0_39], %56 {strides = array<i32>} : memref<4x8x2xf32, #tpu.memory_space<vmem>>, vector<1x8x2xf32>,
    }
    %c4_i32_14 = arith.constant 4 : i32
    return
  }
}

module attributes {stable_mosaic.version = 11 : i64} {
  func.func @_attention_kernel(%arg0: memref<4x2x16xf32, #tpu.memory_space<vmem>>, %arg1: memref<16x16xf32, #tpu.memory_space<vmem>>, %arg2: memref<1x16xf32, #tpu.memory_space<vmem>>, %arg3: memref<1x16xf32, #tpu.memory_space<vmem>>, %arg4: memref<2x16xf32, #tpu.memory_space<vmem>>) attributes {dimension_semantics = [], scalar_prefetch = 0 : i64, scratch_operands = 0 : i64, tpu.core_type = #tpu.core_type<tc>} {
    %cst = arith.constant 0.000000e+00 : f32
    %0 = vector.broadcast %cst : f32 to vector<2x16xf32>
    %c0 = arith.constant 0 : index
    %c0_0 = arith.constant 0 : index
    %c0_1 = arith.constant 0 : index
    %1 = vector.load %arg0[%c0, %c0_0, %c0_1] : memref<4x2x16xf32, #tpu.memory_space<vmem>>, vector<1x2x16xf32>
    %2 = vector.shape_cast %1 : vector<1x2x16xf32> to vector<2x16xf32>
    %c0_2 = arith.constant 0 : index
    %c0_3 = arith.constant 0 : index
    %3 = vector.load %arg1[%c0_2, %c0_3] : memref<16x16xf32, #tpu.memory_space<vmem>>, vector<16x16xf32>
    %cst_4 = arith.constant dense<0.000000e+00> : vector<2x16xf32>
    %4 = tpu.matmul %2, %3, %cst_4 {dimension_numbers = #tpu.dot_dimension_numbers<[1], [0], [0], [1], [0, 0, 1, 1], [], []>} : vector<2x16xf32>, vector<16x16xf32>, vector<2x16xf32> -> vector<2x16xf32>
    %c0_5 = arith.constant 0 : index
    %c0_6 = arith.constant 0 : index
    %5 = vector.load %arg2[%c0_5, %c0_6] : memref<1x16xf32, #tpu.memory_space<vmem>>, vector<1x16xf32>
    %6 = vector.broadcast %5 : vector<1x16xf32> to vector<2x16xf32>
    %7 = arith.addf %4, %6 : vector<2x16xf32>
    %8 = math.tanh %7 : vector<2x16xf32>
    %c0_7 = arith.constant 0 : index
    %c0_8 = arith.constant 0 : index
    %9 = vector.load %arg3[%c0_7, %c0_8] : memref<1x16xf32, #tpu.memory_space<vmem>>, vector<1x16xf32>
    %10 = vector.broadcast %9 : vector<1x16xf32> to vector<2x16xf32>
    %11 = arith.mulf %8, %10 : vector<2x16xf32>
    %cst_9 = arith.constant dense<0.000000e+00> : vector<2xf32>
    %12 = vector.multi_reduction <add>, %11, %cst_9 [1] : vector<2x16xf32> to vector<2xf32>
    %13 = vector.shape_cast %12 : vector<2xf32> to vector<2x1xf32>
    %cst_10 = arith.constant dense<0xFF800000> : vector<1xf32>
    %14 = vector.multi_reduction <maximumf>, %13, %cst_10 [0] : vector<2x1xf32> to vector<1xf32>
    %15 = vector.shape_cast %14 : vector<1xf32> to vector<1x1xf32>
    %16 = vector.broadcast %15 : vector<1x1xf32> to vector<2x1xf32>
    %17 = arith.subf %13, %16 : vector<2x1xf32>
    %18 = math.exp %17 : vector<2x1xf32>
    %cst_11 = arith.constant dense<0.000000e+00> : vector<1xf32>
    %19 = vector.multi_reduction <add>, %18, %cst_11 [0] : vector<2x1xf32> to vector<1xf32>
    %20 = vector.shape_cast %19 : vector<1xf32> to vector<1x1xf32>
    %21 = vector.broadcast %20 : vector<1x1xf32> to vector<2x1xf32>
    %22 = arith.divf %18, %21 : vector<2x1xf32>
    %23 = vector.broadcast %22 : vector<2x1xf32> to vector<2x16xf32>
    %24 = arith.mulf %2, %23 : vector<2x16xf32>
    %25 = arith.addf %0, %24 : vector<2x16xf32>
    %c1 = arith.constant 1 : index
    %c0_12 = arith.constant 0 : index
    %c0_13 = arith.constant 0 : index
    %26 = vector.load %arg0[%c1, %c0_12, %c0_13] : memref<4x2x16xf32, #tpu.memory_space<vmem>>, vector<1x2x16xf32>
    %27 = vector.shape_cast %26 : vector<1x2x16xf32> to vector<2x16xf32>
    %c0_14 = arith.constant 0 : index
    %c0_15 = arith.constant 0 : index
    %28 = vector.load %arg1[%c0_14, %c0_15] : memref<16x16xf32, #tpu.memory_space<vmem>>, vector<16x16xf32>
    %cst_16 = arith.constant dense<0.000000e+00> : vector<2x16xf32>
    %29 = tpu.matmul %27, %28, %cst_16 {dimension_numbers = #tpu.dot_dimension_numbers<[1], [0], [0], [1], [0, 0, 1, 1], [], []>} : vector<2x16xf32>, vector<16x16xf32>, vector<2x16xf32> -> vector<2x16xf32>
    %c0_17 = arith.constant 0 : index
    %c0_18 = arith.constant 0 : index
    %30 = vector.load %arg2[%c0_17, %c0_18] : memref<1x16xf32, #tpu.memory_space<vmem>>, vector<1x16xf32>
    %31 = vector.broadcast %30 : vector<1x16xf32> to vector<2x16xf32>
    %32 = arith.addf %29, %31 : vector<2x16xf32>
    %33 = math.tanh %32 : vector<2x16xf32>
    %c0_19 = arith.constant 0 : index
    %c0_20 = arith.constant 0 : index
    %34 = vector.load %arg3[%c0_19, %c0_20] : memref<1x16xf32, #tpu.memory_space<vmem>>, vector<1x16xf32>
    %35 = vector.broadcast %34 : vector<1x16xf32> to vector<2x16xf32>
    %36 = arith.mulf %33, %35 : vector<2x16xf32>
    %cst_21 = arith.constant dense<0.000000e+00> : vector<2xf32>
    %37 = vector.multi_reduction <add>, %36, %cst_21 [1] : vector<2x16xf32> to vector<2xf32>
    %38 = vector.shape_cast %37 : vector<2xf32> to vector<2x1xf32>
    %cst_22 = arith.constant dense<0xFF800000> : vector<1xf32>
    %39 = vector.multi_reduction <maximumf>, %38, %cst_22 [0] : vector<2x1xf32> to vector<1xf32>
    %40 = vector.shape_cast %39 : vector<1xf32> to vector<1x1xf32>
    %41 = vector.broadcast %40 : vector<1x1xf32> to vector<2x1xf32>
    %42 = arith.subf %38, %41 : vector<2x1xf32>
    %43 = math.exp %42 : vector<2x1xf32>
    %cst_23 = arith.constant dense<0.000000e+00> : vector<1xf32>
    %44 = vector.multi_reduction <add>, %43, %cst_23 [0] : vector<2x1xf32> to vector<1xf32>
    %45 = vector.shape_cast %44 : vector<1xf32> to vector<1x1xf32>
    %46 = vector.broadcast %45 : vector<1x1xf32> to vector<2x1xf32>
    %47 = arith.divf %43, %46 : vector<2x1xf32>
    %48 = vector.broadcast %47 : vector<2x1xf32> to vector<2x16xf32>
    %49 = arith.mulf %27, %48 : vector<2x16xf32>
    %50 = arith.addf %25, %49 : vector<2x16xf32>
    %c2 = arith.constant 2 : index
    %c0_24 = arith.constant 0 : index
    %c0_25 = arith.constant 0 : index
    %51 = vector.load %arg0[%c2, %c0_24, %c0_25] : memref<4x2x16xf32, #tpu.memory_space<vmem>>, vector<1x2x16xf32>
    %52 = vector.shape_cast %51 : vector<1x2x16xf32> to vector<2x16xf32>
    %c0_26 = arith.constant 0 : index
    %c0_27 = arith.constant 0 : index
    %53 = vector.load %arg1[%c0_26, %c0_27] : memref<16x16xf32, #tpu.memory_space<vmem>>, vector<16x16xf32>
    %cst_28 = arith.constant dense<0.000000e+00> : vector<2x16xf32>
    %54 = tpu.matmul %52, %53, %cst_28 {dimension_numbers = #tpu.dot_dimension_numbers<[1], [0], [0], [1], [0, 0, 1, 1], [], []>} : vector<2x16xf32>, vector<16x16xf32>, vector<2x16xf32> -> vector<2x16xf32>
    %c0_29 = arith.constant 0 : index
    %c0_30 = arith.constant 0 : index
    %55 = vector.load %arg2[%c0_29, %c0_30] : memref<1x16xf32, #tpu.memory_space<vmem>>, vector<1x16xf32>
    %56 = vector.broadcast %55 : vector<1x16xf32> to vector<2x16xf32>
    %57 = arith.addf %54, %56 : vector<2x16xf32>
    %58 = math.tanh %57 : vector<2x16xf32>
    %c0_31 = arith.constant 0 : index
    %c0_32 = arith.constant 0 : index
    %59 = vector.load %arg3[%c0_31, %c0_32] : memref<1x16xf32, #tpu.memory_space<vmem>>, vector<1x16xf32>
    %60 = vector.broadcast %59 : vector<1x16xf32> to vector<2x16xf32>
    %61 = arith.mulf %58, %60 : vector<2x16xf32>
    %cst_33 = arith.constant dense<0.000000e+00> : vector<2xf32>
    %62 = vector.multi_reduction <add>, %61, %cst_33 [1] : vector<2x16xf32> to vector<2xf32>
    %63 = vector.shape_cast %62 : vector<2xf32> to vector<2x1xf32>
    %cst_34 = arith.constant dense<0xFF800000> : vector<1xf32>
    %64 = vector.multi_reduction <maximumf>, %63, %cst_34 [0] : vector<2x1xf32> to vector<1xf32>
    %65 = vector.shape_cast %64 : vector<1xf32> to vector<1x1xf32>
    %66 = vector.broadcast %65 : vector<1x1xf32> to vector<2x1xf32>
    %67 = arith.subf %63, %66 : vector<2x1xf32>
    %68 = math.exp %67 : vector<2x1xf32>
    %cst_35 = arith.constant dense<0.000000e+00> : vector<1xf32>
    %69 = vector.multi_reduction <add>, %68, %cst_35 [0] : vector<2x1xf32> to vector<1xf32>
    %70 = vector.shape_cast %69 : vector<1xf32> to vector<1x1xf32>
    %71 = vector.broadcast %70 : vector<1x1xf32> to vector<2x1xf32>
    %72 = arith.divf %68, %71 : vector<2x1xf32>
    %73 = vector.broadcast %72 : vector<2x1xf32> to vector<2x16xf32>
    %74 = arith.mulf %52, %73 : vector<2x16xf32>
    %75 = arith.addf %50, %74 : vector<2x16xf32>
    %c3 = arith.constant 3 : index
    %c0_36 = arith.constant 0 : index
    %c0_37 = arith.constant 0 : index
    %76 = vector.load %arg0[%c3, %c0_36, %c0_37] : memref<4x2x16xf32, #tpu.memory_space<vmem>>, vector<1x2x16xf32>
    %77 = vector.shape_cast %76 : vector<1x2x16xf32> to vector<2x16xf32>
    %c0_38 = arith.constant 0 : index
    %c0_39 = arith.constant 0 : index
    %78 = vector.load %arg1[%c0_38, %c0_39] : memref<16x16xf32, #tpu.memory_space<vmem>>, vector<16x16xf32>
    %cst_40 = arith.constant dense<0.000000e+00> : vector<2x16xf32>
    %79 = tpu.matmul %77, %78, %cst_40 {dimension_numbers = #tpu.dot_dimension_numbers<[1], [0], [0], [1], [0, 0, 1, 1], [], []>} : vector<2x16xf32>, vector<16x16xf32>, vector<2x16xf32> -> vector<2x16xf32>
    %c0_41 = arith.constant 0 : index
    %c0_42 = arith.constant 0 : index
    %80 = vector.load %arg2[%c0_41, %c0_42] : memref<1x16xf32, #tpu.memory_space<vmem>>, vector<1x16xf32>
    %81 = vector.broadcast %80 : vector<1x16xf32> to vector<2x16xf32>
    %82 = arith.addf %79, %81 : vector<2x16xf32>
    %83 = math.tanh %82 : vector<2x16xf32>
    %c0_43 = arith.constant 0 : index
    %c0_44 = arith.constant 0 : index
    %84 = vector.load %arg3[%c0_43, %c0_44] : memref<1x16xf32, #tpu.memory_space<vmem>>, vector<1x16xf32>
    %85 = vector.broadcast %84 : vector<1x16xf32> to vector<2x16xf32>
    %86 = arith.mulf %83, %85 : vector<2x16xf32>
    %cst_45 = arith.constant dense<0.000000e+00> : vector<2xf32>
    %87 = vector.multi_reduction <add>, %86, %cst_45 [1] : vector<2x16xf32> to vector<2xf32>
    %88 = vector.shape_cast %87 : vector<2xf32> to vector<2x1xf32>
    %cst_46 = arith.constant dense<0xFF800000> : vector<1xf32>
    %89 = vector.multi_reduction <maximumf>, %88, %cst_46 [0] : vector<2x1xf32> to vector<1xf32>
    %90 = vector.shape_cast %89 : vector<1xf32> to vector<1x1xf32>
    %91 = vector.broadcast %90 : vector<1x1xf32> to vector<2x1xf32>
    %92 = arith.subf %88, %91 : vector<2x1xf32>
    %93 = math.exp %92 : vector<2x1xf32>
    %cst_47 = arith.constant dense<0.000000e+00> : vector<1xf32>
    %94 = vector.multi_reduction <add>, %93, %cst_47 [0] : vector<2x1xf32> to vector<1xf32>
    %95 = vector.shape_cast %94 : vector<1xf32> to vector<1x1xf32>
    %96 = vector.broadcast %95 : vector<1x1xf32> to vector<2x1xf32>
    %97 = arith.divf %93, %96 : vector<2x1xf32>
    %98 = vector.broadcast %97 : vector<2x1xf32> to vector<2x16xf32>
    %99 = arith.mulf %77, %98 : vector<2x16xf32>
    %100 = arith.addf %75, %99 : vector<2x16xf32>
    %c0_48 = arith.constant 0 : index
    %c0_49 = arith.constant 0 : index
    %101 = vector.load %arg4[%c0_48, %c0_49] : memref<2x16xf32, #tpu.memory_space<vmem>>, vector<2x16xf32>
    tpu.vector_store %arg4[%c0_48, %c0_49], %100 {strides = array<i32>} : memref<2x16xf32, #tpu.memory_space<vmem>>, vector<2x16xf32>,
    return
  }
}

module attributes {stable_mosaic.version = 11 : i64} {
  func.func @_bilstm_kernel(%arg0: memref<8x16x2xf32, #tpu.memory_space<vmem>>, %arg1: memref<32x16xf32, #tpu.memory_space<vmem>>, %arg2: memref<32x8xf32, #tpu.memory_space<vmem>>, %arg3: memref<32x1xf32, #tpu.memory_space<vmem>>, %arg4: memref<32x16xf32, #tpu.memory_space<vmem>>, %arg5: memref<32x8xf32, #tpu.memory_space<vmem>>, %arg6: memref<32x1xf32, #tpu.memory_space<vmem>>, %arg7: memref<8x8x2xf32, #tpu.memory_space<vmem>>, %arg8: memref<8x8x2xf32, #tpu.memory_space<vmem>>, %arg9: memref<8x2xf32, #tpu.memory_space<vmem>>, %arg10: memref<8x2xf32, #tpu.memory_space<vmem>>) attributes {dimension_semantics = [], scalar_prefetch = 0 : i64, scratch_operands = 2 : i64, tpu.core_type = #tpu.core_type<tc>} {
    %cst = arith.constant 0.000000e+00 : f32
    %0 = vector.broadcast %cst : f32 to vector<8x2xf32>
    %c0 = arith.constant 0 : index
    %c0_0 = arith.constant 0 : index
    %1 = vector.load %arg9[%c0, %c0_0] : memref<8x2xf32, #tpu.memory_space<vmem>>, vector<8x2xf32>
    tpu.vector_store %arg9[%c0, %c0_0], %0 {strides = array<i32>} : memref<8x2xf32, #tpu.memory_space<vmem>>, vector<8x2xf32>,
    %cst_1 = arith.constant 0.000000e+00 : f32
    %2 = vector.broadcast %cst_1 : f32 to vector<8x2xf32>
    %c0_2 = arith.constant 0 : index
    %c0_3 = arith.constant 0 : index
    %3 = vector.load %arg10[%c0_2, %c0_3] : memref<8x2xf32, #tpu.memory_space<vmem>>, vector<8x2xf32>
    tpu.vector_store %arg10[%c0_2, %c0_3], %2 {strides = array<i32>} : memref<8x2xf32, #tpu.memory_space<vmem>>, vector<8x2xf32>,
    %c0_i32 = arith.constant 0 : i32
    %c8_i32 = arith.constant 8 : i32
    %4 = arith.addi %c0_i32, %c8_i32 : i32
    %c1_i32 = arith.constant 1 : i32
    scf.for %arg11 = %c0_i32 to %4 step %c1_i32  : i32 {
      %c1_i32_15 = arith.constant 1 : i32
      %10 = arith.muli %arg11, %c1_i32_15 : i32
      %c0_i32_16 = arith.constant 0 : i32
      %11 = arith.addi %c0_i32_16, %10 : i32
      %12 = arith.index_cast %11 : i32 to index
      %c0_17 = arith.constant 0 : index
      %c0_18 = arith.constant 0 : index
      %13 = vector.load %arg0[%12, %c0_17, %c0_18] : memref<8x16x2xf32, #tpu.memory_space<vmem>>, vector<1x16x2xf32>
      %14 = vector.shape_cast %13 : vector<1x16x2xf32> to vector<16x2xf32>
      %c0_19 = arith.constant 0 : index
      %c0_20 = arith.constant 0 : index
      %15 = vector.load %arg1[%c0_19, %c0_20] : memref<32x16xf32, #tpu.memory_space<vmem>>, vector<32x16xf32>
      %cst_21 = arith.constant dense<0.000000e+00> : vector<32x2xf32>
      %16 = tpu.matmul %15, %14, %cst_21 {dimension_numbers = #tpu.dot_dimension_numbers<[1], [0], [0], [1], [0, 0, 1, 1], [], []>} : vector<32x16xf32>, vector<16x2xf32>, vector<32x2xf32> -> vector<32x2xf32>
      %c0_22 = arith.constant 0 : index
      %c0_23 = arith.constant 0 : index
      %17 = vector.load %arg2[%c0_22, %c0_23] : memref<32x8xf32, #tpu.memory_space<vmem>>, vector<32x8xf32>
      %c0_24 = arith.constant 0 : index
      %c0_25 = arith.constant 0 : index
      %18 = vector.load %arg9[%c0_24, %c0_25] : memref<8x2xf32, #tpu.memory_space<vmem>>, vector<8x2xf32>
      %cst_26 = arith.constant dense<0.000000e+00> : vector<32x2xf32>
      %19 = tpu.matmul %17, %18, %cst_26 {dimension_numbers = #tpu.dot_dimension_numbers<[1], [0], [0], [1], [0, 0, 1, 1], [], []>} : vector<32x8xf32>, vector<8x2xf32>, vector<32x2xf32> -> vector<32x2xf32>
      %20 = arith.addf %16, %19 : vector<32x2xf32>
      %c0_27 = arith.constant 0 : index
      %c0_28 = arith.constant 0 : index
      %21 = vector.load %arg3[%c0_27, %c0_28] : memref<32x1xf32, #tpu.memory_space<vmem>>, vector<32x1xf32>
      %22 = vector.broadcast %21 : vector<32x1xf32> to vector<32x2xf32>
      %23 = arith.addf %20, %22 : vector<32x2xf32>
      %24 = vector.extract_strided_slice %23 {offsets = [0, 0], sizes = [8, 2], strides = [1, 1]} : vector<32x2xf32> to vector<8x2xf32>
      %25 = arith.negf %24 : vector<8x2xf32>
      %26 = math.exp %25 : vector<8x2xf32>
      %cst_29 = arith.constant 1.000000e+00 : f32
      %27 = vector.broadcast %cst_29 : f32 to vector<8x2xf32>
      %28 = arith.addf %27, %26 : vector<8x2xf32>
      %29 = arith.divf %27, %28 : vector<8x2xf32>
      %30 = vector.extract_strided_slice %23 {offsets = [8, 0], sizes = [8, 2], strides = [1, 1]} : vector<32x2xf32> to vector<8x2xf32>
      %31 = arith.negf %30 : vector<8x2xf32>
      %32 = math.exp %31 : vector<8x2xf32>
      %cst_30 = arith.constant 1.000000e+00 : f32
      %33 = vector.broadcast %cst_30 : f32 to vector<8x2xf32>
      %34 = arith.addf %33, %32 : vector<8x2xf32>
      %35 = arith.divf %33, %34 : vector<8x2xf32>
      %36 = vector.extract_strided_slice %23 {offsets = [16, 0], sizes = [8, 2], strides = [1, 1]} : vector<32x2xf32> to vector<8x2xf32>
      %37 = math.tanh %36 : vector<8x2xf32>
      %38 = vector.extract_strided_slice %23 {offsets = [24, 0], sizes = [8, 2], strides = [1, 1]} : vector<32x2xf32> to vector<8x2xf32>
      %39 = arith.negf %38 : vector<8x2xf32>
      %40 = math.exp %39 : vector<8x2xf32>
      %cst_31 = arith.constant 1.000000e+00 : f32
      %41 = vector.broadcast %cst_31 : f32 to vector<8x2xf32>
      %42 = arith.addf %41, %40 : vector<8x2xf32>
      %43 = arith.divf %41, %42 : vector<8x2xf32>
      %c0_32 = arith.constant 0 : index
      %c0_33 = arith.constant 0 : index
      %44 = vector.load %arg10[%c0_32, %c0_33] : memref<8x2xf32, #tpu.memory_space<vmem>>, vector<8x2xf32>
      %45 = arith.mulf %35, %44 : vector<8x2xf32>
      %46 = arith.mulf %29, %37 : vector<8x2xf32>
      %47 = arith.addf %45, %46 : vector<8x2xf32>
      %48 = math.tanh %47 : vector<8x2xf32>
      %49 = arith.mulf %43, %48 : vector<8x2xf32>
      %c0_34 = arith.constant 0 : index
      %c0_35 = arith.constant 0 : index
      %50 = vector.load %arg10[%c0_34, %c0_35] : memref<8x2xf32, #tpu.memory_space<vmem>>, vector<8x2xf32>
      tpu.vector_store %arg10[%c0_34, %c0_35], %47 {strides = array<i32>} : memref<8x2xf32, #tpu.memory_space<vmem>>, vector<8x2xf32>,
      %c0_36 = arith.constant 0 : index
      %c0_37 = arith.constant 0 : index
      %51 = vector.load %arg9[%c0_36, %c0_37] : memref<8x2xf32, #tpu.memory_space<vmem>>, vector<8x2xf32>
      tpu.vector_store %arg9[%c0_36, %c0_37], %49 {strides = array<i32>} : memref<8x2xf32, #tpu.memory_space<vmem>>, vector<8x2xf32>,
      %52 = arith.index_cast %11 : i32 to index
      %c0_38 = arith.constant 0 : index
      %c0_39 = arith.constant 0 : index
      %53 = vector.load %arg7[%52, %c0_38, %c0_39] : memref<8x8x2xf32, #tpu.memory_space<vmem>>, vector<1x8x2xf32>
      %54 = vector.shape_cast %53 : vector<1x8x2xf32> to vector<8x2xf32>
      %55 = vector.shape_cast %49 : vector<8x2xf32> to vector<1x8x2xf32>
      tpu.vector_store %arg7[%52, %c0_38, %c0_39], %55 {strides = array<i32>} : memref<8x8x2xf32, #tpu.memory_space<vmem>>, vector<1x8x2xf32>,
    }
    %c8_i32_4 = arith.constant 8 : i32
    %cst_5 = arith.constant 0.000000e+00 : f32
    %5 = vector.broadcast %cst_5 : f32 to vector<8x2xf32>
    %c0_6 = arith.constant 0 : index
    %c0_7 = arith.constant 0 : index
    %6 = vector.load %arg9[%c0_6, %c0_7] : memref<8x2xf32, #tpu.memory_space<vmem>>, vector<8x2xf32>
    tpu.vector_store %arg9[%c0_6, %c0_7], %5 {strides = array<i32>} : memref<8x2xf32, #tpu.memory_space<vmem>>, vector<8x2xf32>,
    %cst_8 = arith.constant 0.000000e+00 : f32
    %7 = vector.broadcast %cst_8 : f32 to vector<8x2xf32>
    %c0_9 = arith.constant 0 : index
    %c0_10 = arith.constant 0 : index
    %8 = vector.load %arg10[%c0_9, %c0_10] : memref<8x2xf32, #tpu.memory_space<vmem>>, vector<8x2xf32>
    tpu.vector_store %arg10[%c0_9, %c0_10], %7 {strides = array<i32>} : memref<8x2xf32, #tpu.memory_space<vmem>>, vector<8x2xf32>,
    %c0_i32_11 = arith.constant 0 : i32
    %c8_i32_12 = arith.constant 8 : i32
    %9 = arith.addi %c0_i32_11, %c8_i32_12 : i32
    %c1_i32_13 = arith.constant 1 : i32
    scf.for %arg11 = %c0_i32_11 to %9 step %c1_i32_13  : i32 {
      %c1_i32_15 = arith.constant 1 : i32
      %10 = arith.muli %arg11, %c1_i32_15 : i32
      %c0_i32_16 = arith.constant 0 : i32
      %11 = arith.addi %c0_i32_16, %10 : i32
      %c7_i32 = arith.constant 7 : i32
      %12 = arith.subi %c7_i32, %11 : i32
      %13 = arith.index_cast %12 : i32 to index
      %c0_17 = arith.constant 0 : index
      %c0_18 = arith.constant 0 : index
      %14 = vector.load %arg0[%13, %c0_17, %c0_18] : memref<8x16x2xf32, #tpu.memory_space<vmem>>, vector<1x16x2xf32>
      %15 = vector.shape_cast %14 : vector<1x16x2xf32> to vector<16x2xf32>
      %c0_19 = arith.constant 0 : index
      %c0_20 = arith.constant 0 : index
      %16 = vector.load %arg4[%c0_19, %c0_20] : memref<32x16xf32, #tpu.memory_space<vmem>>, vector<32x16xf32>
      %cst_21 = arith.constant dense<0.000000e+00> : vector<32x2xf32>
      %17 = tpu.matmul %16, %15, %cst_21 {dimension_numbers = #tpu.dot_dimension_numbers<[1], [0], [0], [1], [0, 0, 1, 1], [], []>} : vector<32x16xf32>, vector<16x2xf32>, vector<32x2xf32> -> vector<32x2xf32>
      %c0_22 = arith.constant 0 : index
      %c0_23 = arith.constant 0 : index
      %18 = vector.load %arg5[%c0_22, %c0_23] : memref<32x8xf32, #tpu.memory_space<vmem>>, vector<32x8xf32>
      %c0_24 = arith.constant 0 : index
      %c0_25 = arith.constant 0 : index
      %19 = vector.load %arg9[%c0_24, %c0_25] : memref<8x2xf32, #tpu.memory_space<vmem>>, vector<8x2xf32>
      %cst_26 = arith.constant dense<0.000000e+00> : vector<32x2xf32>
      %20 = tpu.matmul %18, %19, %cst_26 {dimension_numbers = #tpu.dot_dimension_numbers<[1], [0], [0], [1], [0, 0, 1, 1], [], []>} : vector<32x8xf32>, vector<8x2xf32>, vector<32x2xf32> -> vector<32x2xf32>
      %21 = arith.addf %17, %20 : vector<32x2xf32>
      %c0_27 = arith.constant 0 : index
      %c0_28 = arith.constant 0 : index
      %22 = vector.load %arg6[%c0_27, %c0_28] : memref<32x1xf32, #tpu.memory_space<vmem>>, vector<32x1xf32>
      %23 = vector.broadcast %22 : vector<32x1xf32> to vector<32x2xf32>
      %24 = arith.addf %21, %23 : vector<32x2xf32>
      %25 = vector.extract_strided_slice %24 {offsets = [0, 0], sizes = [8, 2], strides = [1, 1]} : vector<32x2xf32> to vector<8x2xf32>
      %26 = arith.negf %25 : vector<8x2xf32>
      %27 = math.exp %26 : vector<8x2xf32>
      %cst_29 = arith.constant 1.000000e+00 : f32
      %28 = vector.broadcast %cst_29 : f32 to vector<8x2xf32>
      %29 = arith.addf %28, %27 : vector<8x2xf32>
      %30 = arith.divf %28, %29 : vector<8x2xf32>
      %31 = vector.extract_strided_slice %24 {offsets = [8, 0], sizes = [8, 2], strides = [1, 1]} : vector<32x2xf32> to vector<8x2xf32>
      %32 = arith.negf %31 : vector<8x2xf32>
      %33 = math.exp %32 : vector<8x2xf32>
      %cst_30 = arith.constant 1.000000e+00 : f32
      %34 = vector.broadcast %cst_30 : f32 to vector<8x2xf32>
      %35 = arith.addf %34, %33 : vector<8x2xf32>
      %36 = arith.divf %34, %35 : vector<8x2xf32>
      %37 = vector.extract_strided_slice %24 {offsets = [16, 0], sizes = [8, 2], strides = [1, 1]} : vector<32x2xf32> to vector<8x2xf32>
      %38 = math.tanh %37 : vector<8x2xf32>
      %39 = vector.extract_strided_slice %24 {offsets = [24, 0], sizes = [8, 2], strides = [1, 1]} : vector<32x2xf32> to vector<8x2xf32>
      %40 = arith.negf %39 : vector<8x2xf32>
      %41 = math.exp %40 : vector<8x2xf32>
      %cst_31 = arith.constant 1.000000e+00 : f32
      %42 = vector.broadcast %cst_31 : f32 to vector<8x2xf32>
      %43 = arith.addf %42, %41 : vector<8x2xf32>
      %44 = arith.divf %42, %43 : vector<8x2xf32>
      %c0_32 = arith.constant 0 : index
      %c0_33 = arith.constant 0 : index
      %45 = vector.load %arg10[%c0_32, %c0_33] : memref<8x2xf32, #tpu.memory_space<vmem>>, vector<8x2xf32>
      %46 = arith.mulf %36, %45 : vector<8x2xf32>
      %47 = arith.mulf %30, %38 : vector<8x2xf32>
      %48 = arith.addf %46, %47 : vector<8x2xf32>
      %49 = math.tanh %48 : vector<8x2xf32>
      %50 = arith.mulf %44, %49 : vector<8x2xf32>
      %c0_34 = arith.constant 0 : index
      %c0_35 = arith.constant 0 : index
      %51 = vector.load %arg10[%c0_34, %c0_35] : memref<8x2xf32, #tpu.memory_space<vmem>>, vector<8x2xf32>
      tpu.vector_store %arg10[%c0_34, %c0_35], %48 {strides = array<i32>} : memref<8x2xf32, #tpu.memory_space<vmem>>, vector<8x2xf32>,
      %c0_36 = arith.constant 0 : index
      %c0_37 = arith.constant 0 : index
      %52 = vector.load %arg9[%c0_36, %c0_37] : memref<8x2xf32, #tpu.memory_space<vmem>>, vector<8x2xf32>
      tpu.vector_store %arg9[%c0_36, %c0_37], %50 {strides = array<i32>} : memref<8x2xf32, #tpu.memory_space<vmem>>, vector<8x2xf32>,
      %53 = arith.index_cast %12 : i32 to index
      %c0_38 = arith.constant 0 : index
      %c0_39 = arith.constant 0 : index
      %54 = vector.load %arg8[%53, %c0_38, %c0_39] : memref<8x8x2xf32, #tpu.memory_space<vmem>>, vector<1x8x2xf32>
      %55 = vector.shape_cast %54 : vector<1x8x2xf32> to vector<8x2xf32>
      %56 = vector.shape_cast %50 : vector<8x2xf32> to vector<1x8x2xf32>
      tpu.vector_store %arg8[%53, %c0_38, %c0_39], %56 {strides = array<i32>} : memref<8x8x2xf32, #tpu.memory_space<vmem>>, vector<1x8x2xf32>,
    }
    %c8_i32_14 = arith.constant 8 : i32
    return
  }
}

module attributes {stable_mosaic.version = 11 : i64} {
  func.func @_attention_kernel(%arg0: memref<8x2x16xf32, #tpu.memory_space<vmem>>, %arg1: memref<16x16xf32, #tpu.memory_space<vmem>>, %arg2: memref<1x16xf32, #tpu.memory_space<vmem>>, %arg3: memref<1x16xf32, #tpu.memory_space<vmem>>, %arg4: memref<2x16xf32, #tpu.memory_space<vmem>>) attributes {dimension_semantics = [], scalar_prefetch = 0 : i64, scratch_operands = 0 : i64, tpu.core_type = #tpu.core_type<tc>} {
    %cst = arith.constant 0.000000e+00 : f32
    %0 = vector.broadcast %cst : f32 to vector<2x16xf32>
    %c0 = arith.constant 0 : index
    %c0_0 = arith.constant 0 : index
    %c0_1 = arith.constant 0 : index
    %1 = vector.load %arg0[%c0, %c0_0, %c0_1] : memref<8x2x16xf32, #tpu.memory_space<vmem>>, vector<1x2x16xf32>
    %2 = vector.shape_cast %1 : vector<1x2x16xf32> to vector<2x16xf32>
    %c0_2 = arith.constant 0 : index
    %c0_3 = arith.constant 0 : index
    %3 = vector.load %arg1[%c0_2, %c0_3] : memref<16x16xf32, #tpu.memory_space<vmem>>, vector<16x16xf32>
    %cst_4 = arith.constant dense<0.000000e+00> : vector<2x16xf32>
    %4 = tpu.matmul %2, %3, %cst_4 {dimension_numbers = #tpu.dot_dimension_numbers<[1], [0], [0], [1], [0, 0, 1, 1], [], []>} : vector<2x16xf32>, vector<16x16xf32>, vector<2x16xf32> -> vector<2x16xf32>
    %c0_5 = arith.constant 0 : index
    %c0_6 = arith.constant 0 : index
    %5 = vector.load %arg2[%c0_5, %c0_6] : memref<1x16xf32, #tpu.memory_space<vmem>>, vector<1x16xf32>
    %6 = vector.broadcast %5 : vector<1x16xf32> to vector<2x16xf32>
    %7 = arith.addf %4, %6 : vector<2x16xf32>
    %8 = math.tanh %7 : vector<2x16xf32>
    %c0_7 = arith.constant 0 : index
    %c0_8 = arith.constant 0 : index
    %9 = vector.load %arg3[%c0_7, %c0_8] : memref<1x16xf32, #tpu.memory_space<vmem>>, vector<1x16xf32>
    %10 = vector.broadcast %9 : vector<1x16xf32> to vector<2x16xf32>
    %11 = arith.mulf %8, %10 : vector<2x16xf32>
    %cst_9 = arith.constant dense<0.000000e+00> : vector<2xf32>
    %12 = vector.multi_reduction <add>, %11, %cst_9 [1] : vector<2x16xf32> to vector<2xf32>
    %13 = vector.shape_cast %12 : vector<2xf32> to vector<2x1xf32>
    %cst_10 = arith.constant dense<0xFF800000> : vector<1xf32>
    %14 = vector.multi_reduction <maximumf>, %13, %cst_10 [0] : vector<2x1xf32> to vector<1xf32>
    %15 = vector.shape_cast %14 : vector<1xf32> to vector<1x1xf32>
    %16 = vector.broadcast %15 : vector<1x1xf32> to vector<2x1xf32>
    %17 = arith.subf %13, %16 : vector<2x1xf32>
    %18 = math.exp %17 : vector<2x1xf32>
    %cst_11 = arith.constant dense<0.000000e+00> : vector<1xf32>
    %19 = vector.multi_reduction <add>, %18, %cst_11 [0] : vector<2x1xf32> to vector<1xf32>
    %20 = vector.shape_cast %19 : vector<1xf32> to vector<1x1xf32>
    %21 = vector.broadcast %20 : vector<1x1xf32> to vector<2x1xf32>
    %22 = arith.divf %18, %21 : vector<2x1xf32>
    %23 = vector.broadcast %22 : vector<2x1xf32> to vector<2x16xf32>
    %24 = arith.mulf %2, %23 : vector<2x16xf32>
    %25 = arith.addf %0, %24 : vector<2x16xf32>
    %c1 = arith.constant 1 : index
    %c0_12 = arith.constant 0 : index
    %c0_13 = arith.constant 0 : index
    %26 = vector.load %arg0[%c1, %c0_12, %c0_13] : memref<8x2x16xf32, #tpu.memory_space<vmem>>, vector<1x2x16xf32>
    %27 = vector.shape_cast %26 : vector<1x2x16xf32> to vector<2x16xf32>
    %c0_14 = arith.constant 0 : index
    %c0_15 = arith.constant 0 : index
    %28 = vector.load %arg1[%c0_14, %c0_15] : memref<16x16xf32, #tpu.memory_space<vmem>>, vector<16x16xf32>
    %cst_16 = arith.constant dense<0.000000e+00> : vector<2x16xf32>
    %29 = tpu.matmul %27, %28, %cst_16 {dimension_numbers = #tpu.dot_dimension_numbers<[1], [0], [0], [1], [0, 0, 1, 1], [], []>} : vector<2x16xf32>, vector<16x16xf32>, vector<2x16xf32> -> vector<2x16xf32>
    %c0_17 = arith.constant 0 : index
    %c0_18 = arith.constant 0 : index
    %30 = vector.load %arg2[%c0_17, %c0_18] : memref<1x16xf32, #tpu.memory_space<vmem>>, vector<1x16xf32>
    %31 = vector.broadcast %30 : vector<1x16xf32> to vector<2x16xf32>
    %32 = arith.addf %29, %31 : vector<2x16xf32>
    %33 = math.tanh %32 : vector<2x16xf32>
    %c0_19 = arith.constant 0 : index
    %c0_20 = arith.constant 0 : index
    %34 = vector.load %arg3[%c0_19, %c0_20] : memref<1x16xf32, #tpu.memory_space<vmem>>, vector<1x16xf32>
    %35 = vector.broadcast %34 : vector<1x16xf32> to vector<2x16xf32>
    %36 = arith.mulf %33, %35 : vector<2x16xf32>
    %cst_21 = arith.constant dense<0.000000e+00> : vector<2xf32>
    %37 = vector.multi_reduction <add>, %36, %cst_21 [1] : vector<2x16xf32> to vector<2xf32>
    %38 = vector.shape_cast %37 : vector<2xf32> to vector<2x1xf32>
    %cst_22 = arith.constant dense<0xFF800000> : vector<1xf32>
    %39 = vector.multi_reduction <maximumf>, %38, %cst_22 [0] : vector<2x1xf32> to vector<1xf32>
    %40 = vector.shape_cast %39 : vector<1xf32> to vector<1x1xf32>
    %41 = vector.broadcast %40 : vector<1x1xf32> to vector<2x1xf32>
    %42 = arith.subf %38, %41 : vector<2x1xf32>
    %43 = math.exp %42 : vector<2x1xf32>
    %cst_23 = arith.constant dense<0.000000e+00> : vector<1xf32>
    %44 = vector.multi_reduction <add>, %43, %cst_23 [0] : vector<2x1xf32> to vector<1xf32>
    %45 = vector.shape_cast %44 : vector<1xf32> to vector<1x1xf32>
    %46 = vector.broadcast %45 : vector<1x1xf32> to vector<2x1xf32>
    %47 = arith.divf %43, %46 : vector<2x1xf32>
    %48 = vector.broadcast %47 : vector<2x1xf32> to vector<2x16xf32>
    %49 = arith.mulf %27, %48 : vector<2x16xf32>
    %50 = arith.addf %25, %49 : vector<2x16xf32>
    %c2 = arith.constant 2 : index
    %c0_24 = arith.constant 0 : index
    %c0_25 = arith.constant 0 : index
    %51 = vector.load %arg0[%c2, %c0_24, %c0_25] : memref<8x2x16xf32, #tpu.memory_space<vmem>>, vector<1x2x16xf32>
    %52 = vector.shape_cast %51 : vector<1x2x16xf32> to vector<2x16xf32>
    %c0_26 = arith.constant 0 : index
    %c0_27 = arith.constant 0 : index
    %53 = vector.load %arg1[%c0_26, %c0_27] : memref<16x16xf32, #tpu.memory_space<vmem>>, vector<16x16xf32>
    %cst_28 = arith.constant dense<0.000000e+00> : vector<2x16xf32>
    %54 = tpu.matmul %52, %53, %cst_28 {dimension_numbers = #tpu.dot_dimension_numbers<[1], [0], [0], [1], [0, 0, 1, 1], [], []>} : vector<2x16xf32>, vector<16x16xf32>, vector<2x16xf32> -> vector<2x16xf32>
    %c0_29 = arith.constant 0 : index
    %c0_30 = arith.constant 0 : index
    %55 = vector.load %arg2[%c0_29, %c0_30] : memref<1x16xf32, #tpu.memory_space<vmem>>, vector<1x16xf32>
    %56 = vector.broadcast %55 : vector<1x16xf32> to vector<2x16xf32>
    %57 = arith.addf %54, %56 : vector<2x16xf32>
    %58 = math.tanh %57 : vector<2x16xf32>
    %c0_31 = arith.constant 0 : index
    %c0_32 = arith.constant 0 : index
    %59 = vector.load %arg3[%c0_31, %c0_32] : memref<1x16xf32, #tpu.memory_space<vmem>>, vector<1x16xf32>
    %60 = vector.broadcast %59 : vector<1x16xf32> to vector<2x16xf32>
    %61 = arith.mulf %58, %60 : vector<2x16xf32>
    %cst_33 = arith.constant dense<0.000000e+00> : vector<2xf32>
    %62 = vector.multi_reduction <add>, %61, %cst_33 [1] : vector<2x16xf32> to vector<2xf32>
    %63 = vector.shape_cast %62 : vector<2xf32> to vector<2x1xf32>
    %cst_34 = arith.constant dense<0xFF800000> : vector<1xf32>
    %64 = vector.multi_reduction <maximumf>, %63, %cst_34 [0] : vector<2x1xf32> to vector<1xf32>
    %65 = vector.shape_cast %64 : vector<1xf32> to vector<1x1xf32>
    %66 = vector.broadcast %65 : vector<1x1xf32> to vector<2x1xf32>
    %67 = arith.subf %63, %66 : vector<2x1xf32>
    %68 = math.exp %67 : vector<2x1xf32>
    %cst_35 = arith.constant dense<0.000000e+00> : vector<1xf32>
    %69 = vector.multi_reduction <add>, %68, %cst_35 [0] : vector<2x1xf32> to vector<1xf32>
    %70 = vector.shape_cast %69 : vector<1xf32> to vector<1x1xf32>
    %71 = vector.broadcast %70 : vector<1x1xf32> to vector<2x1xf32>
    %72 = arith.divf %68, %71 : vector<2x1xf32>
    %73 = vector.broadcast %72 : vector<2x1xf32> to vector<2x16xf32>
    %74 = arith.mulf %52, %73 : vector<2x16xf32>
    %75 = arith.addf %50, %74 : vector<2x16xf32>
    %c3 = arith.constant 3 : index
    %c0_36 = arith.constant 0 : index
    %c0_37 = arith.constant 0 : index
    %76 = vector.load %arg0[%c3, %c0_36, %c0_37] : memref<8x2x16xf32, #tpu.memory_space<vmem>>, vector<1x2x16xf32>
    %77 = vector.shape_cast %76 : vector<1x2x16xf32> to vector<2x16xf32>
    %c0_38 = arith.constant 0 : index
    %c0_39 = arith.constant 0 : index
    %78 = vector.load %arg1[%c0_38, %c0_39] : memref<16x16xf32, #tpu.memory_space<vmem>>, vector<16x16xf32>
    %cst_40 = arith.constant dense<0.000000e+00> : vector<2x16xf32>
    %79 = tpu.matmul %77, %78, %cst_40 {dimension_numbers = #tpu.dot_dimension_numbers<[1], [0], [0], [1], [0, 0, 1, 1], [], []>} : vector<2x16xf32>, vector<16x16xf32>, vector<2x16xf32> -> vector<2x16xf32>
    %c0_41 = arith.constant 0 : index
    %c0_42 = arith.constant 0 : index
    %80 = vector.load %arg2[%c0_41, %c0_42] : memref<1x16xf32, #tpu.memory_space<vmem>>, vector<1x16xf32>
    %81 = vector.broadcast %80 : vector<1x16xf32> to vector<2x16xf32>
    %82 = arith.addf %79, %81 : vector<2x16xf32>
    %83 = math.tanh %82 : vector<2x16xf32>
    %c0_43 = arith.constant 0 : index
    %c0_44 = arith.constant 0 : index
    %84 = vector.load %arg3[%c0_43, %c0_44] : memref<1x16xf32, #tpu.memory_space<vmem>>, vector<1x16xf32>
    %85 = vector.broadcast %84 : vector<1x16xf32> to vector<2x16xf32>
    %86 = arith.mulf %83, %85 : vector<2x16xf32>
    %cst_45 = arith.constant dense<0.000000e+00> : vector<2xf32>
    %87 = vector.multi_reduction <add>, %86, %cst_45 [1] : vector<2x16xf32> to vector<2xf32>
    %88 = vector.shape_cast %87 : vector<2xf32> to vector<2x1xf32>
    %cst_46 = arith.constant dense<0xFF800000> : vector<1xf32>
    %89 = vector.multi_reduction <maximumf>, %88, %cst_46 [0] : vector<2x1xf32> to vector<1xf32>
    %90 = vector.shape_cast %89 : vector<1xf32> to vector<1x1xf32>
    %91 = vector.broadcast %90 : vector<1x1xf32> to vector<2x1xf32>
    %92 = arith.subf %88, %91 : vector<2x1xf32>
    %93 = math.exp %92 : vector<2x1xf32>
    %cst_47 = arith.constant dense<0.000000e+00> : vector<1xf32>
    %94 = vector.multi_reduction <add>, %93, %cst_47 [0] : vector<2x1xf32> to vector<1xf32>
    %95 = vector.shape_cast %94 : vector<1xf32> to vector<1x1xf32>
    %96 = vector.broadcast %95 : vector<1x1xf32> to vector<2x1xf32>
    %97 = arith.divf %93, %96 : vector<2x1xf32>
    %98 = vector.broadcast %97 : vector<2x1xf32> to vector<2x16xf32>
    %99 = arith.mulf %77, %98 : vector<2x16xf32>
    %100 = arith.addf %75, %99 : vector<2x16xf32>
    %c4 = arith.constant 4 : index
    %c0_48 = arith.constant 0 : index
    %c0_49 = arith.constant 0 : index
    %101 = vector.load %arg0[%c4, %c0_48, %c0_49] : memref<8x2x16xf32, #tpu.memory_space<vmem>>, vector<1x2x16xf32>
    %102 = vector.shape_cast %101 : vector<1x2x16xf32> to vector<2x16xf32>
    %c0_50 = arith.constant 0 : index
    %c0_51 = arith.constant 0 : index
    %103 = vector.load %arg1[%c0_50, %c0_51] : memref<16x16xf32, #tpu.memory_space<vmem>>, vector<16x16xf32>
    %cst_52 = arith.constant dense<0.000000e+00> : vector<2x16xf32>
    %104 = tpu.matmul %102, %103, %cst_52 {dimension_numbers = #tpu.dot_dimension_numbers<[1], [0], [0], [1], [0, 0, 1, 1], [], []>} : vector<2x16xf32>, vector<16x16xf32>, vector<2x16xf32> -> vector<2x16xf32>
    %c0_53 = arith.constant 0 : index
    %c0_54 = arith.constant 0 : index
    %105 = vector.load %arg2[%c0_53, %c0_54] : memref<1x16xf32, #tpu.memory_space<vmem>>, vector<1x16xf32>
    %106 = vector.broadcast %105 : vector<1x16xf32> to vector<2x16xf32>
    %107 = arith.addf %104, %106 : vector<2x16xf32>
    %108 = math.tanh %107 : vector<2x16xf32>
    %c0_55 = arith.constant 0 : index
    %c0_56 = arith.constant 0 : index
    %109 = vector.load %arg3[%c0_55, %c0_56] : memref<1x16xf32, #tpu.memory_space<vmem>>, vector<1x16xf32>
    %110 = vector.broadcast %109 : vector<1x16xf32> to vector<2x16xf32>
    %111 = arith.mulf %108, %110 : vector<2x16xf32>
    %cst_57 = arith.constant dense<0.000000e+00> : vector<2xf32>
    %112 = vector.multi_reduction <add>, %111, %cst_57 [1] : vector<2x16xf32> to vector<2xf32>
    %113 = vector.shape_cast %112 : vector<2xf32> to vector<2x1xf32>
    %cst_58 = arith.constant dense<0xFF800000> : vector<1xf32>
    %114 = vector.multi_reduction <maximumf>, %113, %cst_58 [0] : vector<2x1xf32> to vector<1xf32>
    %115 = vector.shape_cast %114 : vector<1xf32> to vector<1x1xf32>
    %116 = vector.broadcast %115 : vector<1x1xf32> to vector<2x1xf32>
    %117 = arith.subf %113, %116 : vector<2x1xf32>
    %118 = math.exp %117 : vector<2x1xf32>
    %cst_59 = arith.constant dense<0.000000e+00> : vector<1xf32>
    %119 = vector.multi_reduction <add>, %118, %cst_59 [0] : vector<2x1xf32> to vector<1xf32>
    %120 = vector.shape_cast %119 : vector<1xf32> to vector<1x1xf32>
    %121 = vector.broadcast %120 : vector<1x1xf32> to vector<2x1xf32>
    %122 = arith.divf %118, %121 : vector<2x1xf32>
    %123 = vector.broadcast %122 : vector<2x1xf32> to vector<2x16xf32>
    %124 = arith.mulf %102, %123 : vector<2x16xf32>
    %125 = arith.addf %100, %124 : vector<2x16xf32>
    %c5 = arith.constant 5 : index
    %c0_60 = arith.constant 0 : index
    %c0_61 = arith.constant 0 : index
    %126 = vector.load %arg0[%c5, %c0_60, %c0_61] : memref<8x2x16xf32, #tpu.memory_space<vmem>>, vector<1x2x16xf32>
    %127 = vector.shape_cast %126 : vector<1x2x16xf32> to vector<2x16xf32>
    %c0_62 = arith.constant 0 : index
    %c0_63 = arith.constant 0 : index
    %128 = vector.load %arg1[%c0_62, %c0_63] : memref<16x16xf32, #tpu.memory_space<vmem>>, vector<16x16xf32>
    %cst_64 = arith.constant dense<0.000000e+00> : vector<2x16xf32>
    %129 = tpu.matmul %127, %128, %cst_64 {dimension_numbers = #tpu.dot_dimension_numbers<[1], [0], [0], [1], [0, 0, 1, 1], [], []>} : vector<2x16xf32>, vector<16x16xf32>, vector<2x16xf32> -> vector<2x16xf32>
    %c0_65 = arith.constant 0 : index
    %c0_66 = arith.constant 0 : index
    %130 = vector.load %arg2[%c0_65, %c0_66] : memref<1x16xf32, #tpu.memory_space<vmem>>, vector<1x16xf32>
    %131 = vector.broadcast %130 : vector<1x16xf32> to vector<2x16xf32>
    %132 = arith.addf %129, %131 : vector<2x16xf32>
    %133 = math.tanh %132 : vector<2x16xf32>
    %c0_67 = arith.constant 0 : index
    %c0_68 = arith.constant 0 : index
    %134 = vector.load %arg3[%c0_67, %c0_68] : memref<1x16xf32, #tpu.memory_space<vmem>>, vector<1x16xf32>
    %135 = vector.broadcast %134 : vector<1x16xf32> to vector<2x16xf32>
    %136 = arith.mulf %133, %135 : vector<2x16xf32>
    %cst_69 = arith.constant dense<0.000000e+00> : vector<2xf32>
    %137 = vector.multi_reduction <add>, %136, %cst_69 [1] : vector<2x16xf32> to vector<2xf32>
    %138 = vector.shape_cast %137 : vector<2xf32> to vector<2x1xf32>
    %cst_70 = arith.constant dense<0xFF800000> : vector<1xf32>
    %139 = vector.multi_reduction <maximumf>, %138, %cst_70 [0] : vector<2x1xf32> to vector<1xf32>
    %140 = vector.shape_cast %139 : vector<1xf32> to vector<1x1xf32>
    %141 = vector.broadcast %140 : vector<1x1xf32> to vector<2x1xf32>
    %142 = arith.subf %138, %141 : vector<2x1xf32>
    %143 = math.exp %142 : vector<2x1xf32>
    %cst_71 = arith.constant dense<0.000000e+00> : vector<1xf32>
    %144 = vector.multi_reduction <add>, %143, %cst_71 [0] : vector<2x1xf32> to vector<1xf32>
    %145 = vector.shape_cast %144 : vector<1xf32> to vector<1x1xf32>
    %146 = vector.broadcast %145 : vector<1x1xf32> to vector<2x1xf32>
    %147 = arith.divf %143, %146 : vector<2x1xf32>
    %148 = vector.broadcast %147 : vector<2x1xf32> to vector<2x16xf32>
    %149 = arith.mulf %127, %148 : vector<2x16xf32>
    %150 = arith.addf %125, %149 : vector<2x16xf32>
    %c6 = arith.constant 6 : index
    %c0_72 = arith.constant 0 : index
    %c0_73 = arith.constant 0 : index
    %151 = vector.load %arg0[%c6, %c0_72, %c0_73] : memref<8x2x16xf32, #tpu.memory_space<vmem>>, vector<1x2x16xf32>
    %152 = vector.shape_cast %151 : vector<1x2x16xf32> to vector<2x16xf32>
    %c0_74 = arith.constant 0 : index
    %c0_75 = arith.constant 0 : index
    %153 = vector.load %arg1[%c0_74, %c0_75] : memref<16x16xf32, #tpu.memory_space<vmem>>, vector<16x16xf32>
    %cst_76 = arith.constant dense<0.000000e+00> : vector<2x16xf32>
    %154 = tpu.matmul %152, %153, %cst_76 {dimension_numbers = #tpu.dot_dimension_numbers<[1], [0], [0], [1], [0, 0, 1, 1], [], []>} : vector<2x16xf32>, vector<16x16xf32>, vector<2x16xf32> -> vector<2x16xf32>
    %c0_77 = arith.constant 0 : index
    %c0_78 = arith.constant 0 : index
    %155 = vector.load %arg2[%c0_77, %c0_78] : memref<1x16xf32, #tpu.memory_space<vmem>>, vector<1x16xf32>
    %156 = vector.broadcast %155 : vector<1x16xf32> to vector<2x16xf32>
    %157 = arith.addf %154, %156 : vector<2x16xf32>
    %158 = math.tanh %157 : vector<2x16xf32>
    %c0_79 = arith.constant 0 : index
    %c0_80 = arith.constant 0 : index
    %159 = vector.load %arg3[%c0_79, %c0_80] : memref<1x16xf32, #tpu.memory_space<vmem>>, vector<1x16xf32>
    %160 = vector.broadcast %159 : vector<1x16xf32> to vector<2x16xf32>
    %161 = arith.mulf %158, %160 : vector<2x16xf32>
    %cst_81 = arith.constant dense<0.000000e+00> : vector<2xf32>
    %162 = vector.multi_reduction <add>, %161, %cst_81 [1] : vector<2x16xf32> to vector<2xf32>
    %163 = vector.shape_cast %162 : vector<2xf32> to vector<2x1xf32>
    %cst_82 = arith.constant dense<0xFF800000> : vector<1xf32>
    %164 = vector.multi_reduction <maximumf>, %163, %cst_82 [0] : vector<2x1xf32> to vector<1xf32>
    %165 = vector.shape_cast %164 : vector<1xf32> to vector<1x1xf32>
    %166 = vector.broadcast %165 : vector<1x1xf32> to vector<2x1xf32>
    %167 = arith.subf %163, %166 : vector<2x1xf32>
    %168 = math.exp %167 : vector<2x1xf32>
    %cst_83 = arith.constant dense<0.000000e+00> : vector<1xf32>
    %169 = vector.multi_reduction <add>, %168, %cst_83 [0] : vector<2x1xf32> to vector<1xf32>
    %170 = vector.shape_cast %169 : vector<1xf32> to vector<1x1xf32>
    %171 = vector.broadcast %170 : vector<1x1xf32> to vector<2x1xf32>
    %172 = arith.divf %168, %171 : vector<2x1xf32>
    %173 = vector.broadcast %172 : vector<2x1xf32> to vector<2x16xf32>
    %174 = arith.mulf %152, %173 : vector<2x16xf32>
    %175 = arith.addf %150, %174 : vector<2x16xf32>
    %c7 = arith.constant 7 : index
    %c0_84 = arith.constant 0 : index
    %c0_85 = arith.constant 0 : index
    %176 = vector.load %arg0[%c7, %c0_84, %c0_85] : memref<8x2x16xf32, #tpu.memory_space<vmem>>, vector<1x2x16xf32>
    %177 = vector.shape_cast %176 : vector<1x2x16xf32> to vector<2x16xf32>
    %c0_86 = arith.constant 0 : index
    %c0_87 = arith.constant 0 : index
    %178 = vector.load %arg1[%c0_86, %c0_87] : memref<16x16xf32, #tpu.memory_space<vmem>>, vector<16x16xf32>
    %cst_88 = arith.constant dense<0.000000e+00> : vector<2x16xf32>
    %179 = tpu.matmul %177, %178, %cst_88 {dimension_numbers = #tpu.dot_dimension_numbers<[1], [0], [0], [1], [0, 0, 1, 1], [], []>} : vector<2x16xf32>, vector<16x16xf32>, vector<2x16xf32> -> vector<2x16xf32>
    %c0_89 = arith.constant 0 : index
    %c0_90 = arith.constant 0 : index
    %180 = vector.load %arg2[%c0_89, %c0_90] : memref<1x16xf32, #tpu.memory_space<vmem>>, vector<1x16xf32>
    %181 = vector.broadcast %180 : vector<1x16xf32> to vector<2x16xf32>
    %182 = arith.addf %179, %181 : vector<2x16xf32>
    %183 = math.tanh %182 : vector<2x16xf32>
    %c0_91 = arith.constant 0 : index
    %c0_92 = arith.constant 0 : index
    %184 = vector.load %arg3[%c0_91, %c0_92] : memref<1x16xf32, #tpu.memory_space<vmem>>, vector<1x16xf32>
    %185 = vector.broadcast %184 : vector<1x16xf32> to vector<2x16xf32>
    %186 = arith.mulf %183, %185 : vector<2x16xf32>
    %cst_93 = arith.constant dense<0.000000e+00> : vector<2xf32>
    %187 = vector.multi_reduction <add>, %186, %cst_93 [1] : vector<2x16xf32> to vector<2xf32>
    %188 = vector.shape_cast %187 : vector<2xf32> to vector<2x1xf32>
    %cst_94 = arith.constant dense<0xFF800000> : vector<1xf32>
    %189 = vector.multi_reduction <maximumf>, %188, %cst_94 [0] : vector<2x1xf32> to vector<1xf32>
    %190 = vector.shape_cast %189 : vector<1xf32> to vector<1x1xf32>
    %191 = vector.broadcast %190 : vector<1x1xf32> to vector<2x1xf32>
    %192 = arith.subf %188, %191 : vector<2x1xf32>
    %193 = math.exp %192 : vector<2x1xf32>
    %cst_95 = arith.constant dense<0.000000e+00> : vector<1xf32>
    %194 = vector.multi_reduction <add>, %193, %cst_95 [0] : vector<2x1xf32> to vector<1xf32>
    %195 = vector.shape_cast %194 : vector<1xf32> to vector<1x1xf32>
    %196 = vector.broadcast %195 : vector<1x1xf32> to vector<2x1xf32>
    %197 = arith.divf %193, %196 : vector<2x1xf32>
    %198 = vector.broadcast %197 : vector<2x1xf32> to vector<2x16xf32>
    %199 = arith.mulf %177, %198 : vector<2x16xf32>
    %200 = arith.addf %175, %199 : vector<2x16xf32>
    %c0_96 = arith.constant 0 : index
    %c0_97 = arith.constant 0 : index
    %201 = vector.load %arg4[%c0_96, %c0_97] : memref<2x16xf32, #tpu.memory_space<vmem>>, vector<2x16xf32>
    tpu.vector_store %arg4[%c0_96, %c0_97], %200 {strides = array<i32>} : memref<2x16xf32, #tpu.memory_space<vmem>>, vector<2x16xf32>,
    return
  }
}

</mosaic_0001>

<bundles_post_ra>
// kernel: semantic_vector_forward.8
= control target key start
LH: loop header
LB: loop body
LE: loop exit
PB: predicated region body
PF: predicated region fallthrough
CT: control target
= control target key end

     0   :  { %vm28_vm0 = vcmask 64512   ;;  %v923_v0 = vmov 0.0   ;;  %s979_s27 = smov 0   ;;  %s1365_s0 = inlined_call_operand.vmem [shape: f32[8,16,8], index: 0, kind: input, shape index: {}]   ;;  %s1366_s1 = inlined_call_operand.vmem [shape: f32[64,16], index: 1, kind: input, shape index: {}]   ;;  %s1367_s2 = inlined_call_operand.vmem [shape: f32[64,16], index: 2, kind: input, shape index: {}]   ;;  %s1368_s3 = inlined_call_operand.vmem [shape: f32[64,1], index: 3, kind: input, shape index: {}]   ;;  %s1369_s4 = inlined_call_operand.vmem [shape: f32[64,16], index: 4, kind: input, shape index: {}]   ;;  %s1370_s5 = inlined_call_operand.vmem [shape: f32[64,16], index: 5, kind: input, shape index: {}]   ;;  %s1371_s6 = inlined_call_operand.vmem [shape: f32[64,1], index: 6, kind: input, shape index: {}]   ;;  %s1372_s7 = inlined_call_operand.vmem [shape: f32[8,16,8], index: 7, kind: output, shape index: {0}]   ;;  %s1373_s8 = inlined_call_operand.vmem [shape: f32[8,16,8], index: 8, kind: output, shape index: {1}]  }
   0x1   :  { %29 = vst.msk [vmem:[#allocation2] sm:$0xff] %vm28_vm0, %v923_v0 }
   0x2   :  { %30 = vst.msk [vmem:[#allocation2 + $0x8] sm:$0xff] %vm28_vm0, %v923_v0 }
   0x3   :  { %31 = vst.msk [vmem:[#allocation3] sm:$0xff] %vm28_vm0, %v923_v0 }
   0x4   :  { %32 = vst.msk [vmem:[#allocation3 + $0x8] sm:$0xff] %vm28_vm0, %v923_v0 }
   0x5 LB: > { %v51_v3 = vld [vmem:[%s1367_s2] sm:$0xff]  ;;  %vm61_vm1 = vcmask 130048   ;;  %s764_s10 = sshll.u32 %s917_s27, 4  ;;  %v924_v5 = vmov 0   ;;  %v194_v7 = vld [vmem:[%s1368_s3 + $0x10] sm:$0xff]  ;;  %v52_v13 = vld [vmem:[%s1367_s2 + $0x8] sm:$0xff]  ;;  %s917_s27 = sphi %s979_s27, %s38_s27  }
   0x6   : > { %v55_v4 = vld [vmem:[%s1367_s2 + $0x20] sm:$0xff]  ;;  %837 = vset.pattern.permute.xlu0 %v924_v5  ;;  %838 = vset.pattern.permute.xlu1 %v924_v5  ;;  %s40_s13 = scalar_lea.vmem %s1365_s0, %s764_s10  ;;  %v198_v12 = vld [vmem:[%s1368_s3 + $0x30] sm:$0xff]  ;;  %v56_v14 = vld [vmem:[%s1367_s2 + $0x28] sm:$0xff]  ;;  %s380_s20 = scalar_lea.vmem %s1372_s7, %s764_s10 }
   0x7   : > { %v192_v6 = vld [vmem:[%s1368_s3] sm:$0xff]  ;;  %v42_v8 = vld [vmem:[%s40_s13 + $0x8] sm:$0xff]  ;;  %212 = vperm.xlu1 %838, %v194_v7   ;;  %839 = vset.pattern.permute.xlu2 %v924_v5  ;;  %v195_v16 = vld [vmem:[%s1368_s3 + $0x18] sm:$0xff]  ;;  %s38_s27 = sadd.s32 1, %s917_s27  }
   0x8   : > { %v59_v2 = vld [vmem:[#allocation2] sm:$0xff]  ;;  %165 = vmatpush.msra.mxu1 %v42_v8  ;;  %812 = vmatpush.msra.mxu3 %v42_v8  ;;  %v193_v15 = vld [vmem:[%s1368_s3 + $0x8] sm:$0xff]  ;;  %v199_v19 = vld [vmem:[%s1368_s3 + $0x38] sm:$0xff]  ;;  %p35_p0 = scmp.ge.s32.totalorder %s38_s27, 8  }
   0x9   : > { %v60_v1 = vld [vmem:[#allocation2 + $0x8] sm:$0xff]  ;;  %v41_v9 = vld [vmem:[%s40_s13] sm:$0xff]  ;;  %202 = vperm.xlu0 %837, %v192_v6   ;;  %232 = vperm.xlu2 %839, %v198_v12   ;;  %v53_v20 = vld [vmem:[%s1367_s2 + $0x10] sm:$0xff]  ;;  %s1176_s10 = smov (%p35_p0), 0  }
   0xa   : > { %100 = vmatpush.msra.mxu0 %v60_v1  ;;  %810 = vmatpush.msra.mxu2 %v60_v1  ;;  %v43_v10 = vld [vmem:[%s1366_s1] sm:$0xff]  ;;  %v44_v17 = vld [vmem:[%s1366_s1 + $0x8] sm:$0xff]  ;;  %v57_v21 = vld [vmem:[%s1367_s2 + $0x30] sm:$0xff] }
   0xb   : > { %v47_v11 = vld [vmem:[%s1366_s1 + $0x20] sm:$0xff]  ;;  %166 = vmatpush.msra.mxu1 %v41_v9  ;;  %813 = vmatpush.msra.mxu3 %v41_v9  ;;  %v48_v18 = vld [vmem:[%s1366_s1 + $0x28] sm:$0xff]  ;;  %v45_v24 = vld [vmem:[%s1366_s1 + $0x10] sm:$0xff] }
   0xc   : > { %101 = vmatpush.msra.mxu0 %v59_v2  ;;  %811 = vmatpush.msra.mxu2 %v59_v2  ;;  %v196_v22 = vld [vmem:[%s1368_s3 + $0x20] sm:$0xff]  ;;  %v197_v23 = vld [vmem:[%s1368_s3 + $0x28] sm:$0xff]  ;;  %v49_v25 = vld [vmem:[%s1366_s1 + $0x30] sm:$0xff] }
   0xd   : > { %765 = vmatmul.msk.f32.vlgmr.msra.gmra.mxu0 %vm61_vm1, %v51_v3  ;;  %769 = vmatmul.msk.f32.vlgmr.msra.gmra.mxu2 %vm61_vm1, %v55_v4  ;;  %v54_v26 = vld [vmem:[%s1367_s2 + $0x18] sm:$0xff] }
   0xe   : > { %773 = vmatmul.msk.f32.vlgmr.msra.gmra.mxu1 %vm61_vm1, %v43_v10  ;;  %777 = vmatmul.msk.f32.vlgmr.msra.gmra.mxu3 %vm61_vm1, %v47_v11  ;;  %v58_v27 = vld [vmem:[%s1367_s2 + $0x38] sm:$0xff] }
   0xf   : > { %217 = vperm.xlu1 %838, %v195_v16   ;;  %v46_v28 = vld [vmem:[%s1366_s1 + $0x18] sm:$0xff] }
  0x10   : > { %v50_v29 = vld [vmem:[%s1366_s1 + $0x38] sm:$0xff] }
  0x11   : > { %207 = vperm.xlu0 %837, %v193_v15   ;;  %237 = vperm.xlu2 %839, %v199_v19  }
  0x15   : > { %766 = vmatmul.msk.f32.gmra.mxu0 %vm61_vm1, %v52_v13  ;;  %770 = vmatmul.msk.f32.gmra.mxu2 %vm61_vm1, %v56_v14 }
  0x16   : > { %774 = vmatmul.msk.f32.gmra.mxu1 %vm61_vm1, %v44_v17  ;;  %778 = vmatmul.msk.f32.gmra.mxu3 %vm61_vm1, %v48_v18 }
  0x17   : > { %227 = vperm.xlu1 %838, %v197_v23  }
  0x19   : > { %222 = vperm.xlu0 %837, %v196_v22  }
  0x1d   : > { %767 = vmatmul.msk.f32.gmra.mxu0 %vm61_vm1, %v53_v20  ;;  %771 = vmatmul.msk.f32.gmra.mxu2 %vm61_vm1, %v57_v21 }
  0x1e   : > { %775 = vmatmul.msk.f32.gmra.mxu1 %vm61_vm1, %v45_v24  ;;  %779 = vmatmul.msk.f32.gmra.mxu3 %vm61_vm1, %v49_v25 }
  0x25   : > { %768 = vmatmul.msk.f32.gmra.mxu0 %vm61_vm1, %v54_v26  ;;  %772 = vmatmul.msk.f32.gmra.mxu2 %vm61_vm1, %v58_v27 }
  0x26   : > { %776 = vmatmul.msk.f32.gmra.mxu1 %vm61_vm1, %v46_v28  ;;  %780 = vmatmul.msk.f32.gmra.mxu3 %vm61_vm1, %v50_v29 }
  0x63   : > { %v233_v61 = vpop.permute.xlu2 %232 }
  0x6b   : > { %v238_v15 = vpop.permute.xlu2 %237 }
  0x79   : > { %v213_v49 = vpop.permute.xlu1 %212 }
  0x7b   : > { %v203_v31 = vpop.permute.xlu0 %202 }
  0x81   : > { %v218_v2 = vpop.permute.xlu1 %217 }
  0x83   : > { %v208_v41 = vpop.permute.xlu0 %207 }
  0x8a   : > { %v103_v30 = vpop.f32.mrf.mxu0 }
  0x8b   : > { %v168_v32 = vpop.f32.mrf.mxu1  ;;  %v223_v18 = vpop.permute.xlu0 %222 }
  0x8c   : > { %v169_v33 = vadd.f32 %v168_v32, %v103_v30 }
  0x8e   : > { %v240_v35 = vadd.f32 %v203_v31, %v169_v33 }
  0x90   : > { %v115_v34 = vpop.f32.mrf.mxu2  ;;  %v781_v37 = vmul.f32 -1.442695, %v240_v35 }
  0x91   : > { %v180_v38 = vpop.f32.mrf.mxu3 }
  0x92   : > { %v106_v36 = vpop.f32.mrf.mxu0  ;;  %840 = vpow2.f32 %v781_v37  ;;  %v181_v14 = vadd.f32 %v180_v38, %v115_v34  ;;  %v228_v34 = vpop.permute.xlu1 %227 }
  0x93   : > { %v171_v39 = vpop.f32.mrf.mxu1 }
  0x94   : > { %v172_v40 = vadd.f32 %v171_v39, %v106_v36  ;;  %v244_v25 = vadd.f32 %v223_v18, %v181_v14 }
  0x96   : > { %v241_v43 = vadd.f32 %v208_v41, %v172_v40 }
  0x98   : > { %v118_v42 = vpop.f32.mrf.mxu2  ;;  %v841_v45 = vpop.eup %840  ;;  %v782_v46 = vmul.f32 -1.442695, %v241_v43 }
  0x99   : > { %v1078_v47 = vadd.f32 1.0, %v841_v45  ;;  %v183_v48 = vpop.f32.mrf.mxu3 }
  0x9a   : > { %v109_v44 = vpop.f32.mrf.mxu0  ;;  %842 = vpow2.f32 %v782_v46  ;;  %v184_v31 = vadd.f32 %v183_v48, %v118_v42 }
  0x9b   : > { %v174_v50 = vpop.f32.mrf.mxu1  ;;  %844 = vrcp.f32 %v1078_v47  ;;  %v267_v30 = vand.u32 2147483648, %v1078_v47  ;;  %vm261_vm3 = vweird.f32 %v1078_v47  ;;  %v265_v32 = vand.u32 2147483647, %v1078_v47 }
  0x9c   : > { %v175_v51 = vadd.f32 %v174_v50, %v109_v44  ;;  %v245_v43 = vadd.f32 %v228_v34, %v184_v31 }
  0x9d   : > { %v268_v42 = vor.u32 1.1754944e-38, %v267_v30  ;;  %vm266_vm6 = vcmp.eq.f32.partialorder %v265_v32, 8.507059e+37 }
  0x9e   : > { %v242_v52 = vadd.f32 %v213_v49, %v175_v51  ;;  %v364_v49 = vld [vmem:[#allocation3] sm:$0xff] }
  0xa0   : > { %v121_v53 = vpop.f32.mrf.mxu2  ;;  %v843_v54 = vpop.eup %842  ;;  %v783_v55 = vmul.f32 -1.442695, %v242_v52 }
  0xa1   : > { %v1081_v56 = vadd.f32 1.0, %v843_v54  ;;  %v186_v57 = vpop.f32.mrf.mxu3  ;;  %v1083_v60 = vpop.eup %844 }
  0xa2   : > { %v112_v58 = vpop.f32.mrf.mxu0  ;;  %846 = vpow2.f32 %v783_v55  ;;  %v187_v59 = vadd.f32 %v186_v57, %v121_v53  ;;  %v257_v3 = vmul.f32 %v1083_v60, %v1078_v47  ;;  %vm262_vm2 = vweird.f32 %v1083_v60 }
  0xa3   : > { %v177_v62 = vpop.f32.mrf.mxu1  ;;  %848 = vrcp.f32 %v1081_v56  ;;  %vm1104_vm4 = vmor %vm261_vm3, %vm262_vm2  ;;  %vm276_vm11 = vweird.f32 %v1081_v56 }
  0xa4   : > { %v246_v63 = vadd.f32 %v233_v61, %v187_v59  ;;  %v178_v1 = vadd.f32 %v177_v62, %v112_v58  ;;  %v258_v11 = vsub.f32 1.0, %v257_v3  ;;  %v282_v58 = vand.u32 2147483648, %v1081_v56 }
  0xa6   : > { %v785_v4 = vmul.f32 -1.442695, %v246_v63  ;;  %v243_v5 = vadd.f32 %v218_v2, %v178_v1  ;;  %v259_v19 = vmul.f32 %v1083_v60, %v258_v11  ;;  %v280_v1 = vand.u32 2147483647, %v1081_v56 }
  0xa8   : > { %v847_v6 = vpop.eup %846  ;;  %850 = vpow2.f32 %v785_v4  ;;  %v784_v7 = vmul.f32 -1.442695, %v243_v5  ;;  %v124_v9 = vpop.f32.mrf.mxu2  ;;  %v260_v27 = vadd.f32 %v1083_v60, %v259_v19  ;;  %vm281_vm2 = vcmp.eq.f32.partialorder %v280_v1, 8.507059e+37 }
  0xa9   : > { %v292_v8 = vadd.f32 1.0, %v847_v6  ;;  %v189_v10 = vpop.f32.mrf.mxu3  ;;  %v1088_v12 = vpop.eup %848 }
  0xaa   : > { %852 = vpow2.f32 %v784_v7  ;;  %v190_v13 = vadd.f32 %v189_v10, %v124_v9  ;;  %v272_v17 = vmul.f32 %v1088_v12, %v1081_v56  ;;  %v264_v38 = vsel %vm1104_vm4, %v1083_v60, %v260_v27 }
  0xab   : > { %854 = vrcp.f32 %v292_v8  ;;  %v303_v36 = vand.u32 2147483647, %v292_v8  ;;  %v305_v37 = vand.u32 2147483648, %v292_v8  ;;  %vm299_vm7 = vweird.f32 %v292_v8 }
  0xac   : > { %v247_v20 = vadd.f32 %v238_v15, %v190_v13  ;;  %v273_v26 = vsub.f32 1.0, %v272_v17  ;;  %v269_v47 = vsel %vm266_vm6, %v268_v42, %v264_v38  ;;  %vm277_vm10 = vweird.f32 %v1088_v12 }
  0xad   : > { %vm304_vm9 = vcmp.eq.f32.partialorder %v303_v36, 8.507059e+37  ;;  %v306_v48 = vor.u32 1.1754944e-38, %v305_v37  ;;  %vm1127_vm12 = vmor %vm276_vm11, %vm277_vm10  ;;  %v283_v56 = vor.u32 1.1754944e-38, %v282_v58 }
  0xae   : > { %v851_v16 = vpop.eup %850  ;;  %v786_v23 = vmul.f32 -1.442695, %v247_v20  ;;  %v274_v40 = vmul.f32 %v1088_v12, %v273_v26 }
  0xaf   : > { %v1093_v21 = vadd.f32 1.0, %v851_v16  ;;  %v365_v16 = vld [vmem:[#allocation3 + $0x8] sm:$0xff] }
  0xb0   : > { %v853_v22 = vpop.eup %852  ;;  %v275_v52 = vadd.f32 %v1088_v12, %v274_v40 }
  0xb1   : > { %v855_v24 = vpop.eup %854  ;;  %856 = vrcp.f32 %v1093_v21  ;;  %v1098_v29 = vadd.f32 1.0, %v853_v22  ;;  %vm339_vm15 = vweird.f32 %v1093_v21  ;;  %v345_v9 = vand.u32 2147483648, %v1093_v21 }
  0xb2   : > { %v295_v28 = vmul.f32 %v855_v24, %v292_v8  ;;  %858 = vpow2.f32 %v786_v23  ;;  %vm300_vm5 = vweird.f32 %v855_v24  ;;  %v279_v4 = vsel %vm1127_vm12, %v1088_v12, %v275_v52 }
  0xb3   : > { %860 = vrcp.f32 %v1098_v29  ;;  %vm301_vm8 = vmor %vm299_vm7, %vm300_vm5  ;;  %v320_v5 = vand.u32 2147483648, %v1098_v29  ;;  %v318_v8 = vand.u32 2147483647, %v1098_v29  ;;  %v343_v11 = vand.u32 2147483647, %v1093_v21 }
  0xb4   : > { %v296_v33 = vsub.f32 1.0, %v295_v28  ;;  %862 = vtanh.f32 %v244_v25  ;;  %vm314_vm4 = vweird.f32 %v1098_v29  ;;  %v284_v14 = vsel %vm281_vm2, %v283_v56, %v279_v4 }
  0xb5   : > { %v321_v15 = vor.u32 1.1754944e-38, %v320_v5  ;;  %vm319_vm6 = vcmp.eq.f32.partialorder %v318_v8, 8.507059e+37  ;;  %v346_v22 = vor.u32 1.1754944e-38, %v345_v9  ;;  %vm344_vm7 = vcmp.eq.f32.partialorder %v343_v11, 8.507059e+37 }
  0xb6   : > { %v297_v39 = vmul.f32 %v855_v24, %v296_v33 }
  0xb7   : > { %v1112_v41 = vpop.eup %856 }
  0xb8   : > { %v298_v44 = vadd.f32 %v855_v24, %v297_v39  ;;  %v335_v45 = vmul.f32 %v1112_v41, %v1093_v21  ;;  %v859_v46 = vpop.eup %858  ;;  %vm340_vm13 = vweird.f32 %v1112_v41 }
  0xb9   : > { %v861_v50 = vpop.eup %860  ;;  %v1118_v54 = vadd.f32 1.0, %v859_v46  ;;  %vm1142_vm3 = vmor %vm339_vm15, %vm340_vm13 }
  0xba   : > { %v302_v51 = vsel %vm301_vm8, %v855_v24, %v298_v44  ;;  %v336_v53 = vsub.f32 1.0, %v335_v45  ;;  %v863_v55 = vpop.eup %862  ;;  %v310_v59 = vmul.f32 %v861_v50, %v1098_v29  ;;  %vm315_vm14 = vweird.f32 %v861_v50 }
  0xbb   : > { %v307_v57 = vsel %vm304_vm9, %v306_v48, %v302_v51  ;;  %v368_v60 = vmul.f32 %v863_v55, %v269_v47  ;;  %864 = vrcp.f32 %v1118_v54  ;;  %vm316_vm5 = vmor %vm314_vm4, %vm315_vm14  ;;  %v360_v32 = vand.u32 2147483648, %v1118_v54 }
  0xbc   : > { %v366_v61 = vmul.f32 %v364_v49, %v307_v57  ;;  %v337_v62 = vmul.f32 %v1112_v41, %v336_v53  ;;  %866 = vtanh.f32 %v245_v43  ;;  %v311_v2 = vsub.f32 1.0, %v310_v59 }
  0xbd   : > { %vm354_vm9 = vweird.f32 %v1118_v54  ;;  %v358_v33 = vand.u32 2147483647, %v1118_v54  ;;  %v361_v35 = vor.u32 1.1754944e-38, %v360_v32 }
  0xbe   : > { %v370_v3 = vadd.f32 %v368_v60, %v366_v61  ;;  %v338_v6 = vadd.f32 %v1112_v41, %v337_v62  ;;  %v312_v7 = vmul.f32 %v861_v50, %v311_v2 }
  0xbf   : > { %vm359_vm11 = vcmp.eq.f32.partialorder %v358_v33, 8.507059e+37 }
  0xc0   : > { %868 = vtanh.f32 %v370_v3  ;;  %376 = vst.msk [vmem:[#allocation3] sm:$0xff] %vm28_vm0, %v370_v3  ;;  %v313_v12 = vadd.f32 %v861_v50, %v312_v7  ;;  %v342_v18 = vsel %vm1142_vm3, %v1112_v41, %v338_v6 }
  0xc1   : > { %v865_v13 = vpop.eup %864  ;;  %v347_v27 = vsel %vm344_vm7, %v346_v22, %v342_v18  ;;  %385 = vst.msk [vmem:[#allocation3] sm:$0xff] (%p35_p0), %vm28_vm0, %v923_v0 }
  0xc2   : > { %v867_v17 = vpop.eup %866  ;;  %v317_v19 = vsel %vm316_vm5, %v861_v50, %v313_v12  ;;  %v350_v20 = vmul.f32 %v865_v13, %v1118_v54  ;;  %vm355_vm8 = vweird.f32 %v865_v13 }
  0xc3   : > { %v322_v21 = vsel %vm319_vm6, %v321_v15, %v317_v19  ;;  %v369_v23 = vmul.f32 %v867_v17, %v284_v14  ;;  %vm356_vm10 = vmor %vm354_vm9, %vm355_vm8 }
  0xc4   : > { %v367_v24 = vmul.f32 %v365_v16, %v322_v21  ;;  %v351_v25 = vsub.f32 1.0, %v350_v20 }
  0xc6   : > { %v869_v26 = vpop.eup %868  ;;  %v371_v29 = vadd.f32 %v369_v23, %v367_v24  ;;  %v352_v30 = vmul.f32 %v865_v13, %v351_v25 }
  0xc7   : > { %v374_v28 = vmul.f32 %v869_v26, %v347_v27 }
  0xc8   : > { %870 = vtanh.f32 %v371_v29  ;;  %v353_v31 = vadd.f32 %v865_v13, %v352_v30  ;;  %377 = vst.msk [vmem:[#allocation3 + $0x8] sm:$0xff] %vm28_vm0, %v371_v29 }
  0xc9   : > { %378 = vst.msk [vmem:[#allocation2] sm:$0xff] %vm28_vm0, %v374_v28 }
  0xca   : > { %381 = vst.msk [vmem:[%s380_s20] sm:$0xff] %vm28_vm0, %v374_v28  ;;  %v357_v34 = vsel %vm356_vm10, %v865_v13, %v353_v31 }
  0xcb   : > { %v362_v37 = vsel %vm359_vm11, %v361_v35, %v357_v34  ;;  %383 = vst.msk [vmem:[#allocation2] sm:$0xff] (%p35_p0), %vm28_vm0, %v923_v0 }
  0xcc   :  { %386 = vst.msk [vmem:[#allocation3 + $0x8] sm:$0xff] (%p35_p0), %vm28_vm0, %v923_v0 }
  0xce   : > { %v871_v36 = vpop.eup %870  ;;  %37 = sbr.rel (!%p35_p0) target bundleno = 5 (0x5), region = 74 }
  0xcf   : > { %v375_v38 = vmul.f32 %v871_v36, %v362_v37 }
  0xd1   : > { %379 = vst.msk [vmem:[#allocation2 + $0x8] sm:$0xff] %vm28_vm0, %v375_v38 }
  0xd2   : > { %382 = vst.msk [vmem:[%s380_s20 + $0x8] sm:$0xff] %vm28_vm0, %v375_v38 }
  0xd3   :  { %384 = vst.msk [vmem:[#allocation2 + $0x8] sm:$0xff] %vm28_vm0, %v923_v0 }
  0xd4 LB: > { %v414_v40 = vld [vmem:[#allocation2] sm:$0xff]  ;;  %s393_s27 = ssub.s32 7, %s921_s10  ;;  %v925_v42 = vmov 0   ;;  %v549_v44 = vld [vmem:[%s1371_s6 + $0x10] sm:$0xff]  ;;  %v407_v50 = vld [vmem:[%s1370_s5 + $0x8] sm:$0xff]  ;;  %s392_s10 = sadd.s32 1, %s921_s10   ;;  %s921_s10 = sphi %s1176_s10, %s392_s10  }
  0xd5   : > { %v406_v41 = vld [vmem:[%s1370_s5] sm:$0xff]  ;;  %872 = vset.pattern.permute.xlu0 %v925_v42  ;;  %873 = vset.pattern.permute.xlu1 %v925_v42  ;;  %s1191_s23 = sshll.u32 %s393_s27, 4  ;;  %v553_v49 = vld [vmem:[%s1371_s6 + $0x30] sm:$0xff]  ;;  %v411_v51 = vld [vmem:[%s1370_s5 + $0x28] sm:$0xff]  ;;  %p389_p1 = scmp.ge.s32.totalorder %s392_s10, 8  }
  0xd6   : > { %v410_v0 = vld [vmem:[%s1370_s5 + $0x20] sm:$0xff]  ;;  %s395_s29 = scalar_lea.vmem %s1365_s0, %s1191_s23  ;;  %567 = vperm.xlu1 %873, %v549_v44   ;;  %874 = vset.pattern.permute.xlu2 %v925_v42  ;;  %v548_v52 = vld [vmem:[%s1371_s6 + $0x8] sm:$0xff]  ;;  %v550_v53 = vld [vmem:[%s1371_s6 + $0x18] sm:$0xff]  ;;  %s735_s22 = scalar_lea.vmem %s1373_s8, %s1191_s23 }
  0xd7   : > { %v547_v43 = vld [vmem:[%s1371_s6] sm:$0xff]  ;;  %v397_v45 = vld [vmem:[%s395_s29 + $0x8] sm:$0xff]  ;;  %587 = vperm.xlu2 %874, %v553_v49   ;;  %v554_v57 = vld [vmem:[%s1371_s6 + $0x38] sm:$0xff] }
  0xd8   : > { %v396_v46 = vld [vmem:[%s395_s29] sm:$0xff]  ;;  %557 = vperm.xlu0 %872, %v547_v43   ;;  %520 = vmatpush.msra.mxu1 %v397_v45  ;;  %v399_v54 = vld [vmem:[%s1369_s4 + $0x8] sm:$0xff]  ;;  %v408_v58 = vld [vmem:[%s1370_s5 + $0x10] sm:$0xff] }
  0xd9   : > { %816 = vmatpush.msra.mxu3 %v397_v45  ;;  %v398_v47 = vld [vmem:[%s1369_s4] sm:$0xff]  ;;  %v403_v55 = vld [vmem:[%s1369_s4 + $0x28] sm:$0xff]  ;;  %v412_v59 = vld [vmem:[%s1370_s5 + $0x30] sm:$0xff] }
  0xda   : > { %v415_v39 = vld [vmem:[#allocation2 + $0x8] sm:$0xff]  ;;  %v402_v48 = vld [vmem:[%s1369_s4 + $0x20] sm:$0xff]  ;;  %521 = vmatpush.msra.mxu1 %v396_v46  ;;  %v400_v62 = vld [vmem:[%s1369_s4 + $0x10] sm:$0xff] }
  0xdb   : > { %455 = vmatpush.msra.mxu0 %v415_v39  ;;  %814 = vmatpush.msra.mxu2 %v415_v39  ;;  %v551_v60 = vld [vmem:[%s1371_s6 + $0x20] sm:$0xff]  ;;  %v552_v61 = vld [vmem:[%s1371_s6 + $0x28] sm:$0xff]  ;;  %v404_v63 = vld [vmem:[%s1369_s4 + $0x30] sm:$0xff] }
  0xdc   : > { %817 = vmatpush.msra.mxu3 %v396_v46  ;;  %796 = vmatmul.msk.f32.vlgmr.msra.gmra.mxu1 %vm61_vm1, %v398_v47  ;;  %v409_v1 = vld [vmem:[%s1370_s5 + $0x18] sm:$0xff] }
  0xdd   : > { %456 = vmatpush.msra.mxu0 %v414_v40  ;;  %815 = vmatpush.msra.mxu2 %v414_v40  ;;  %v413_v2 = vld [vmem:[%s1370_s5 + $0x38] sm:$0xff] }
  0xde   : > { %788 = vmatmul.msk.f32.vlgmr.msra.gmra.mxu0 %vm61_vm1, %v406_v41  ;;  %792 = vmatmul.msk.f32.vlgmr.msra.gmra.mxu2 %vm61_vm1, %v410_v0  ;;  %v401_v3 = vld [vmem:[%s1369_s4 + $0x18] sm:$0xff] }
  0xdf   : > { %800 = vmatmul.msk.f32.vlgmr.msra.gmra.mxu3 %vm61_vm1, %v402_v48  ;;  %572 = vperm.xlu1 %873, %v550_v53   ;;  %v405_v4 = vld [vmem:[%s1369_s4 + $0x38] sm:$0xff] }
  0xe0   : > { %562 = vperm.xlu0 %872, %v548_v52   ;;  %592 = vperm.xlu2 %874, %v554_v57  }
  0xe4   : > { %797 = vmatmul.msk.f32.gmra.mxu1 %vm61_vm1, %v399_v54 }
  0xe6   : > { %789 = vmatmul.msk.f32.gmra.mxu0 %vm61_vm1, %v407_v50  ;;  %793 = vmatmul.msk.f32.gmra.mxu2 %vm61_vm1, %v411_v51 }
  0xe7   : > { %801 = vmatmul.msk.f32.gmra.mxu3 %vm61_vm1, %v403_v55  ;;  %582 = vperm.xlu1 %873, %v552_v61  }
  0xe8   : > { %577 = vperm.xlu0 %872, %v551_v60  }
  0xec   : > { %798 = vmatmul.msk.f32.gmra.mxu1 %vm61_vm1, %v400_v62 }
  0xee   : > { %790 = vmatmul.msk.f32.gmra.mxu0 %vm61_vm1, %v408_v58  ;;  %794 = vmatmul.msk.f32.gmra.mxu2 %vm61_vm1, %v412_v59 }
  0xef   : > { %802 = vmatmul.msk.f32.gmra.mxu3 %vm61_vm1, %v404_v63 }
  0xf4   : > { %799 = vmatmul.msk.f32.gmra.mxu1 %vm61_vm1, %v401_v3 }
  0xf6   : > { %791 = vmatmul.msk.f32.gmra.mxu0 %vm61_vm1, %v409_v1  ;;  %795 = vmatmul.msk.f32.gmra.mxu2 %vm61_vm1, %v413_v2 }
  0xf7   : > { %803 = vmatmul.msk.f32.gmra.mxu3 %vm61_vm1, %v405_v4 }
 0x131   : > { %v588_v35 = vpop.permute.xlu2 %587 }
 0x13a   : > { %v593_v51 = vpop.permute.xlu2 %592 }
 0x148   : > { %v568_v23 = vpop.permute.xlu1 %567 }
 0x14a   : > { %v558_v6 = vpop.permute.xlu0 %557 }
 0x151   : > { %v573_v39 = vpop.permute.xlu1 %572 }
 0x152   : > { %v563_v15 = vpop.permute.xlu0 %562 }
 0x159   : > { %v523_v7 = vpop.f32.mrf.mxu1 }
 0x15a   : > { %v578_v54 = vpop.permute.xlu0 %577 }
 0x15b   : > { %v458_v5 = vpop.f32.mrf.mxu0 }
 0x15c   : > { %v524_v8 = vadd.f32 %v523_v7, %v458_v5 }
 0x15e   : > { %v595_v9 = vadd.f32 %v558_v6, %v524_v8  ;;  %v583_v8 = vpop.permute.xlu1 %582 }
 0x160   : > { %v804_v11 = vmul.f32 -1.442695, %v595_v9 }
 0x161   : > { %v470_v56 = vpop.f32.mrf.mxu2  ;;  %v526_v13 = vpop.f32.mrf.mxu1 }
 0x162   : > { %v535_v12 = vpop.f32.mrf.mxu3  ;;  %875 = vpow2.f32 %v804_v11 }
 0x163   : > { %v461_v10 = vpop.f32.mrf.mxu0  ;;  %v536_v50 = vadd.f32 %v535_v12, %v470_v56 }
 0x164   : > { %v527_v14 = vadd.f32 %v526_v13, %v461_v10 }
 0x165   : > { %v599_v62 = vadd.f32 %v578_v54, %v536_v50 }
 0x166   : > { %v596_v17 = vadd.f32 %v563_v15, %v527_v14 }
 0x168   : > { %v876_v19 = vpop.eup %875  ;;  %v805_v20 = vmul.f32 -1.442695, %v596_v17 }
 0x169   : > { %v473_v16 = vpop.f32.mrf.mxu2  ;;  %v1276_v22 = vadd.f32 1.0, %v876_v19  ;;  %v529_v24 = vpop.f32.mrf.mxu1 }
 0x16a   : > { %v538_v21 = vpop.f32.mrf.mxu3  ;;  %877 = vpow2.f32 %v805_v20 }
 0x16b   : > { %v464_v18 = vpop.f32.mrf.mxu0  ;;  %879 = vrcp.f32 %v1276_v22  ;;  %v622_v4 = vand.u32 2147483648, %v1276_v22  ;;  %v539_v5 = vadd.f32 %v538_v21, %v473_v16  ;;  %vm616_vm13 = vweird.f32 %v1276_v22  ;;  %v719_v21 = vld [vmem:[#allocation3] sm:$0xff] }
 0x16c   : > { %v530_v25 = vadd.f32 %v529_v24, %v464_v18  ;;  %v620_v6 = vand.u32 2147483647, %v1276_v22 }
 0x16d   : > { %v623_v15 = vor.u32 1.1754944e-38, %v622_v4  ;;  %v600_v16 = vadd.f32 %v583_v8, %v539_v5 }
 0x16e   : > { %v597_v26 = vadd.f32 %v568_v23, %v530_v25  ;;  %vm621_vm2 = vcmp.eq.f32.partialorder %v620_v6, 8.507059e+37 }
 0x170   : > { %v878_v28 = vpop.eup %877  ;;  %v806_v29 = vmul.f32 -1.442695, %v597_v26 }
 0x171   : > { %v476_v27 = vpop.f32.mrf.mxu2  ;;  %v1279_v30 = vadd.f32 1.0, %v878_v28  ;;  %v1281_v34 = vpop.eup %879 }
 0x172   : > { %v541_v31 = vpop.f32.mrf.mxu3  ;;  %881 = vpow2.f32 %v806_v29  ;;  %v532_v36 = vpop.f32.mrf.mxu1  ;;  %v612_v40 = vmul.f32 %v1281_v34, %v1276_v22  ;;  %vm617_vm12 = vweird.f32 %v1281_v34 }
 0x173   : > { %v467_v32 = vpop.f32.mrf.mxu0  ;;  %v542_v33 = vadd.f32 %v541_v31, %v476_v27  ;;  %883 = vrcp.f32 %v1279_v30  ;;  %vm1302_vm14 = vmor %vm616_vm13, %vm617_vm12  ;;  %vm631_vm7 = vweird.f32 %v1279_v30  ;;  %v637_v31 = vand.u32 2147483648, %v1279_v30 }
 0x174   : > { %v533_v38 = vadd.f32 %v532_v36, %v467_v32  ;;  %v613_v47 = vsub.f32 1.0, %v612_v40 }
 0x175   : > { %v601_v37 = vadd.f32 %v588_v35, %v542_v33 }
 0x176   : > { %v598_v0 = vadd.f32 %v573_v39, %v533_v38  ;;  %v614_v55 = vmul.f32 %v1281_v34, %v613_v47 }
 0x177   : > { %v808_v41 = vmul.f32 -1.442695, %v601_v37  ;;  %v635_v37 = vand.u32 2147483647, %v1279_v30 }
 0x178   : > { %v882_v42 = vpop.eup %881  ;;  %v807_v43 = vmul.f32 -1.442695, %v598_v0  ;;  %v615_v1 = vadd.f32 %v1281_v34, %v614_v55 }
 0x179   : > { %885 = vpow2.f32 %v808_v41  ;;  %v647_v44 = vadd.f32 1.0, %v882_v42  ;;  %v479_v45 = vpop.f32.mrf.mxu2  ;;  %v1286_v48 = vpop.eup %883  ;;  %vm636_vm12 = vcmp.eq.f32.partialorder %v635_v37, 8.507059e+37 }
 0x17a   : > { %v544_v46 = vpop.f32.mrf.mxu3  ;;  %887 = vpow2.f32 %v807_v43  ;;  %v627_v53 = vmul.f32 %v1286_v48, %v1279_v30  ;;  %v619_v11 = vsel %vm1302_vm14, %v1281_v34, %v615_v1  ;;  %vm632_vm6 = vweird.f32 %v1286_v48 }
 0x17b   : > { %889 = vrcp.f32 %v647_v44  ;;  %v545_v49 = vadd.f32 %v544_v46, %v479_v45  ;;  %v658_v9 = vand.u32 2147483647, %v647_v44  ;;  %v660_v10 = vand.u32 2147483648, %v647_v44  ;;  %vm1325_vm8 = vmor %vm631_vm7, %vm632_vm6 }
 0x17c   : > { %v628_v63 = vsub.f32 1.0, %v627_v53  ;;  %vm654_vm3 = vweird.f32 %v647_v44  ;;  %v624_v20 = vsel %vm621_vm2, %v623_v15, %v619_v11  ;;  %v638_v30 = vor.u32 1.1754944e-38, %v637_v31 }
 0x17d   : > { %v602_v57 = vadd.f32 %v593_v51, %v545_v49  ;;  %vm659_vm5 = vcmp.eq.f32.partialorder %v658_v9, 8.507059e+37  ;;  %v661_v22 = vor.u32 1.1754944e-38, %v660_v10  ;;  %v720_v51 = vld [vmem:[#allocation3 + $0x8] sm:$0xff] }
 0x17e   : > { %v629_v13 = vmul.f32 %v1286_v48, %v628_v63 }
 0x17f   : > { %v886_v52 = vpop.eup %885  ;;  %v809_v60 = vmul.f32 -1.442695, %v602_v57 }
 0x180   : > { %v1291_v58 = vadd.f32 1.0, %v886_v52  ;;  %v888_v59 = vpop.eup %887  ;;  %v630_v25 = vadd.f32 %v1286_v48, %v629_v13 }
 0x181   : > { %v890_v61 = vpop.eup %889  ;;  %v1296_v3 = vadd.f32 1.0, %v888_v59 }
 0x182   : > { %891 = vrcp.f32 %v1291_v58  ;;  %v650_v2 = vmul.f32 %v890_v61, %v647_v44  ;;  %vm655_vm15 = vweird.f32 %v890_v61  ;;  %v634_v40 = vsel %vm1325_vm8, %v1286_v48, %v630_v25 }
 0x183   : > { %893 = vpow2.f32 %v809_v60  ;;  %vm656_vm4 = vmor %vm654_vm3, %vm655_vm15  ;;  %v675_v41 = vand.u32 2147483648, %v1296_v3  ;;  %v673_v43 = vand.u32 2147483647, %v1296_v3  ;;  %vm694_vm11 = vweird.f32 %v1291_v58 }
 0x184   : > { %v651_v7 = vsub.f32 1.0, %v650_v2  ;;  %895 = vrcp.f32 %v1296_v3  ;;  %v700_v44 = vand.u32 2147483648, %v1291_v58  ;;  %v698_v46 = vand.u32 2147483647, %v1291_v58 }
 0x185   : > { %897 = vtanh.f32 %v599_v62  ;;  %vm669_vm14 = vweird.f32 %v1296_v3  ;;  %v639_v49 = vsel %vm636_vm12, %v638_v30, %v634_v40  ;;  %v676_v50 = vor.u32 1.1754944e-38, %v675_v41 }
 0x186   : > { %v652_v12 = vmul.f32 %v890_v61, %v651_v7  ;;  %vm674_vm2 = vcmp.eq.f32.partialorder %v673_v43, 8.507059e+37  ;;  %v701_v57 = vor.u32 1.1754944e-38, %v700_v44  ;;  %vm699_vm3 = vcmp.eq.f32.partialorder %v698_v46, 8.507059e+37 }
 0x188   : > { %v1310_v14 = vpop.eup %891  ;;  %v653_v17 = vadd.f32 %v890_v61, %v652_v12 }
 0x189   : > { %v690_v18 = vmul.f32 %v1310_v14, %v1291_v58  ;;  %v894_v19 = vpop.eup %893  ;;  %vm695_vm9 = vweird.f32 %v1310_v14 }
 0x18a   : > { %v896_v23 = vpop.eup %895  ;;  %v657_v24 = vsel %vm656_vm4, %v890_v61, %v653_v17  ;;  %v1316_v27 = vadd.f32 1.0, %v894_v19  ;;  %vm1340_vm13 = vmor %vm694_vm11, %vm695_vm9 }
 0x18b   : > { %v691_v26 = vsub.f32 1.0, %v690_v18  ;;  %v898_v28 = vpop.eup %897  ;;  %v662_v29 = vsel %vm659_vm5, %v661_v22, %v657_v24  ;;  %v665_v32 = vmul.f32 %v896_v23, %v1296_v3  ;;  %vm670_vm10 = vweird.f32 %v896_v23 }
 0x18c   : > { %v723_v33 = vmul.f32 %v898_v28, %v624_v20  ;;  %v721_v34 = vmul.f32 %v719_v21, %v662_v29  ;;  %899 = vrcp.f32 %v1316_v27  ;;  %vm671_vm15 = vmor %vm669_vm14, %vm670_vm10  ;;  %v715_v5 = vand.u32 2147483648, %v1316_v27 }
 0x18d   : > { %v692_v35 = vmul.f32 %v1310_v14, %v691_v26  ;;  %901 = vtanh.f32 %v600_v16  ;;  %v666_v38 = vsub.f32 1.0, %v665_v32  ;;  %vm709_vm5 = vweird.f32 %v1316_v27 }
 0x18e   : > { %v725_v39 = vadd.f32 %v723_v33, %v721_v34  ;;  %v713_v6 = vand.u32 2147483647, %v1316_v27  ;;  %v716_v8 = vor.u32 1.1754944e-38, %v715_v5 }
 0x18f   : > { %v693_v0 = vadd.f32 %v1310_v14, %v692_v35  ;;  %v667_v42 = vmul.f32 %v896_v23, %v666_v38 }
 0x190   : > { %903 = vtanh.f32 %v725_v39  ;;  %731 = vst.msk [vmem:[#allocation3] sm:$0xff] %vm28_vm0, %v725_v39  ;;  %vm714_vm7 = vcmp.eq.f32.partialorder %v713_v6, 8.507059e+37 }
 0x191   : > { %v668_v47 = vadd.f32 %v896_v23, %v667_v42  ;;  %v697_v53 = vsel %vm1340_vm13, %v1310_v14, %v693_v0 }
 0x192   : > { %v900_v48 = vpop.eup %899  ;;  %v702_v63 = vsel %vm699_vm3, %v701_v57, %v697_v53 }
 0x193   : > { %v902_v52 = vpop.eup %901  ;;  %v672_v54 = vsel %vm671_vm15, %v896_v23, %v668_v47  ;;  %v705_v55 = vmul.f32 %v900_v48, %v1316_v27  ;;  %vm710_vm4 = vweird.f32 %v900_v48 }
 0x194   : > { %v677_v58 = vsel %vm674_vm2, %v676_v50, %v672_v54  ;;  %v724_v59 = vmul.f32 %v902_v52, %v639_v49  ;;  %vm711_vm6 = vmor %vm709_vm5, %vm710_vm4 }
 0x195   : > { %v722_v60 = vmul.f32 %v720_v51, %v677_v58  ;;  %v706_v61 = vsub.f32 1.0, %v705_v55 }
 0x196   : > { %v904_v62 = vpop.eup %903 }
 0x197   : > { %v729_v1 = vmul.f32 %v904_v62, %v702_v63  ;;  %v726_v2 = vadd.f32 %v724_v59, %v722_v60  ;;  %v707_v3 = vmul.f32 %v900_v48, %v706_v61 }
 0x199   : > { %733 = vst.msk [vmem:[#allocation2] sm:$0xff] %vm28_vm0, %v729_v1  ;;  %905 = vtanh.f32 %v726_v2  ;;  %v708_v4 = vadd.f32 %v900_v48, %v707_v3 }
 0x19a   : > { %736 = vst.msk [vmem:[%s735_s22] sm:$0xff] %vm28_vm0, %v729_v1 }
 0x19b   : > { %732 = vst.msk [vmem:[#allocation3 + $0x8] sm:$0xff] %vm28_vm0, %v726_v2  ;;  %v712_v7 = vsel %vm711_vm6, %v900_v48, %v708_v4 }
 0x19c   : > { %v717_v9 = vsel %vm714_vm7, %v716_v8, %v712_v7 }
 0x19f   : > { %v906_v56 = vpop.eup %905  ;;  %391 = sbr.rel (!%p389_p1) target bundleno = 212 (0xd4), region = 85 }
 0x1a0   : > { %v730_v10 = vmul.f32 %v906_v56, %v717_v9 }
 0x1a2   : > { %734 = vst.msk [vmem:[#allocation2 + $0x8] sm:$0xff] %vm28_vm0, %v730_v10 }
 0x1a3   : > { %737 = vst.msk [vmem:[%s735_s22 + $0x8] sm:$0xff] %vm28_vm0, %v730_v10 }

// kernel: semantic_vector_forward.9
= control target key start
LH: loop header
LB: loop body
LE: loop exit
PB: predicated region body
PF: predicated region fallthrough
CT: control target
= control target key end

     0   :  { %s893_s15 = smov 0   ;;  %s1150_s0 = inlined_call_operand.vmem [shape: f32[2,8,4,32], index: 0, kind: input, shape index: {}]   ;;  %s1151_s1 = inlined_call_operand.vmem [shape: f32[32,32], index: 1, kind: input, shape index: {}]   ;;  %s1152_s2 = inlined_call_operand.vmem [shape: f32[1,32], index: 2, kind: input, shape index: {}]   ;;  %s1153_s3 = inlined_call_operand.vmem [shape: f32[1,32], index: 3, kind: input, shape index: {}]   ;;  %s1154_s4 = inlined_call_operand.vmem [shape: f32[2,4,32], index: 4, kind: output, shape index: {}]  }
   0x1 LB: > { %s776_s16 = sadd.s32 4294967295, %s866_s15   ;;  %p780_p0 = scmp.ge.s32.totalorder %s866_s15, 1  ;;  %s866_s15 = sphi %s893_s15, %s14_s15  }
   0x2   : > { %p162_p1 = scmp.lt.s32.totalorder %s866_s15, 3 }
   0x4   : > { %p163_p2 = pnand %p780_p0, %p162_p1 }
   0x5   : > { %p187_p3 = scmp.lt.s32.totalorder (!%p163_p2), %s776_s16, 1 }
   0x6   : > { %166 = sbr.rel (%p163_p2) target bundleno = 364 (0x16c), region = 36 }
   0xb   : > { %v200_v0 = vld [vmem:[%s1151_s1 + $0x18] sm:$0xff]  ;;  %v199_v1 = vld [vmem:[%s1151_s1 + $0x10] sm:$0xff]  ;;  %v198_v2 = vld [vmem:[%s1151_s1 + $0x8] sm:$0xff]  ;;  %s1166_s16 = smov (!%p187_p3, %s776_s16), 1  ;;  %vm205_vm0 = vcmask 261120   ;;  %vm235_vm1 = vcmask 257024  }
   0xc   : > { %221 = vmatpush.msra.mxu0 %v200_v0  ;;  %355 = vmatpush.msra.mxu2 %v200_v0  ;;  %v197_v3 = vld [vmem:[%s1151_s1] sm:$0xff]  ;;  %s801_s25 = sshll.u32 %s1166_s16, 5  ;;  %vm239_vm2 = vcmask 1043456   ;;  %s783_s7 = sshll.u32 %s1166_s16, 2 }
   0xd   : > { %291 = vmatpush.msra.mxu1 %v200_v0  ;;  %419 = vmatpush.msra.mxu3 %v200_v0  ;;  %s919_s28 = scalar_lea.vmem %s1150_s0, %s801_s25  ;;  %v810_v12 = vld [vmem:[%s1152_s2] ss:$0 sm:$0xff]  ;;  %s195_s10 = scalar_lea.vmem %s1154_s4, %s783_s7 }
   0xe   : > { %222 = vmatpush.msra.mxu0 %v199_v1  ;;  %356 = vmatpush.msra.mxu2 %v199_v1  ;;  %v922_v4 = vld [vmem:[%s919_s28] sm:$0xf]  ;;  %v925_v5 = vld [vmem:[%s919_s28 + $0x8] sm:$0xf]  ;;  %v932_v6 = vld [vmem:[%s919_s28 + $0x4] sm:$0xf] }
   0xf   : > { %292 = vmatpush.msra.mxu1 %v199_v1  ;;  %420 = vmatpush.msra.mxu3 %v199_v1  ;;  %v935_v7 = vld [vmem:[%s919_s28 + $0xc] sm:$0xf]  ;;  %v942_v8 = vld [vmem:[%s919_s28 + $0x10] sm:$0xf]  ;;  %v945_v9 = vld [vmem:[%s919_s28 + $0x18] sm:$0xf] }
  0x10   : > { %223 = vmatpush.msra.mxu0 %v198_v2  ;;  %357 = vmatpush.msra.mxu2 %v198_v2  ;;  %v952_v10 = vld [vmem:[%s919_s28 + $0x14] sm:$0xf]  ;;  %v955_v11 = vld [vmem:[%s919_s28 + $0x1c] sm:$0xf]  ;;  %v811_v18 = vld [vmem:[%s1153_s3] ss:$0 sm:$0xff] }
  0x11   : > { %293 = vmatpush.msra.mxu1 %v198_v2  ;;  %421 = vmatpush.msra.mxu3 %v198_v2 }
  0x12   : > { %224 = vmatpush.msra.mxu0 %v197_v3  ;;  %358 = vmatpush.msra.mxu2 %v197_v3 }
  0x13   : > { %784 = vmatmul.msk.f32.vlgmr.msra.gmra.mxu0 %vm205_vm0, %v922_v4  ;;  %788 = vmatmul.msk.f32.vlgmr.msra.gmra.mxu2 %vm205_vm0, %v925_v5 }
  0x14   : > { %483 = vmatpush.msrb.mxu0 %v200_v0  ;;  %611 = vmatpush.msrb.mxu2 %v200_v0 }
  0x15   : > { %294 = vmatpush.msra.mxu1 %v197_v3  ;;  %422 = vmatpush.msra.mxu3 %v197_v3 }
  0x16   : > { %484 = vmatpush.msrb.mxu0 %v199_v1  ;;  %612 = vmatpush.msrb.mxu2 %v199_v1 }
  0x17   : > { %786 = vmatmul.msk.f32.vlgmr.msra.gmra.mxu1 %vm205_vm0, %v932_v6  ;;  %790 = vmatmul.msk.f32.vlgmr.msra.gmra.mxu3 %vm205_vm0, %v935_v7 }
  0x18   : > { %485 = vmatpush.msrb.mxu0 %v198_v2  ;;  %613 = vmatpush.msrb.mxu2 %v198_v2 }
  0x19   : > { %675 = vmatpush.msrb.mxu3 %v200_v0  ;;  %547 = vmatpush.msrb.mxu1 %v200_v0 }
  0x1a   : > { %486 = vmatpush.msrb.mxu0 %v197_v3  ;;  %614 = vmatpush.msrb.mxu2 %v197_v3 }
  0x1b   : > { %792 = vmatmul.msk.f32.vlgmr.msrb.gmra.mxu0 %vm205_vm0, %v942_v8  ;;  %796 = vmatmul.msk.f32.vlgmr.msrb.gmra.mxu2 %vm205_vm0, %v945_v9 }
  0x1c   : > { %676 = vmatpush.msrb.mxu3 %v199_v1  ;;  %548 = vmatpush.msrb.mxu1 %v199_v1 }
  0x1e   : > { %677 = vmatpush.msrb.mxu3 %v198_v2  ;;  %549 = vmatpush.msrb.mxu1 %v198_v2 }
  0x20   : > { %678 = vmatpush.msrb.mxu3 %v197_v3  ;;  %550 = vmatpush.msrb.mxu1 %v197_v3 }
  0x21   : > { %794 = vmatmul.msk.f32.vlgmr.msrb.gmra.mxu1 %vm205_vm0, %v952_v10  ;;  %798 = vmatmul.msk.f32.vlgmr.msrb.gmra.mxu3 %vm205_vm0, %v955_v11 }
  0x90   : > { %v226_v13 = vpop.f32.mrf.mxu0 }
  0x91   : > { %v227_v14 = vadd.f32 %v810_v12, %v226_v13 }
  0x93   : > { %812 = vtanh.f32 %v227_v14 }
  0x94   : > { %v296_v15 = vpop.f32.mrf.mxu1 }
  0x95   : > { %v297_v16 = vadd.f32 %v810_v12, %v296_v15 }
  0x96   : > { %v360_v17 = vpop.f32.mrf.mxu2 }
  0x97   : > { %v361_v19 = vadd.f32 %v810_v12, %v360_v17  ;;  %814 = vtanh.f32 %v297_v16 }
  0x98   : > { %v488_v20 = vpop.f32.mrf.mxu0 }
  0x99   : > { %v813_v21 = vpop.eup %812  ;;  %816 = vtanh.f32 %v361_v19  ;;  %v489_v22 = vadd.f32 %v810_v12, %v488_v20 }
  0x9a   : > { %v234_v23 = vmul.f32 %v813_v21, %v811_v18  ;;  %v424_v24 = vpop.f32.mrf.mxu3 }
  0x9b   : > { %818 = vtanh.f32 %v489_v22  ;;  %v425_v25 = vadd.f32 %v810_v12, %v424_v24 }
  0x9c   : > { %v236_v26 = vsel %vm235_vm1, %v234_v23, 0.0 }
  0x9d   : > { %v815_v27 = vpop.eup %814  ;;  %237 = vadd.xlane.f32.xlu0 %v236_v26  ;;  %820 = vtanh.f32 %v425_v25 }
  0x9e   : > { %v552_v28 = vpop.f32.mrf.mxu1  ;;  %v616_v29 = vpop.f32.mrf.mxu2  ;;  %v300_v30 = vmul.f32 %v815_v27, %v811_v18 }
  0x9f   : > { %v817_v31 = vpop.eup %816  ;;  %v553_v32 = vadd.f32 %v810_v12, %v552_v28  ;;  %v617_v33 = vadd.f32 %v810_v12, %v616_v29 }
  0xa0   : > { %v364_v34 = vmul.f32 %v817_v31, %v811_v18  ;;  %v301_v38 = vsel %vm235_vm1, %v300_v30, 0.0 }
  0xa1   : > { %v819_v35 = vpop.eup %818  ;;  %822 = vtanh.f32 %v553_v32 }
  0xa2   : > { %824 = vtanh.f32 %v617_v33  ;;  %v365_v36 = vsel %vm235_vm1, %v364_v34, 0.0  ;;  %v492_v37 = vmul.f32 %v819_v35, %v811_v18 }
  0xa3   : > { %v821_v39 = vpop.eup %820  ;;  %366 = vadd.xlane.f32.xlu1 %v365_v36 }
  0xa4   : > { %v493_v40 = vsel %vm235_vm1, %v492_v37, 0.0  ;;  %v680_v41 = vpop.f32.mrf.mxu3  ;;  %v428_v42 = vmul.f32 %v821_v39, %v811_v18 }
  0xa5   : > { %494 = vadd.xlane.f32.xlu2 %v493_v40  ;;  %302 = vadd.xlane.f32.xlu0 %v301_v38  ;;  %v681_v43 = vadd.f32 %v810_v12, %v680_v41 }
  0xa6   : > { %v429_v46 = vsel %vm235_vm1, %v428_v42, 0.0 }
  0xa7   : > { %v823_v44 = vpop.eup %822  ;;  %826 = vtanh.f32 %v681_v43 }
  0xa8   : > { %v825_v45 = vpop.eup %824  ;;  %v556_v47 = vmul.f32 %v823_v44, %v811_v18 }
  0xa9   : > { %v620_v48 = vmul.f32 %v825_v45, %v811_v18 }
  0xaa   : > { %v557_v49 = vsel %vm235_vm1, %v556_v47, 0.0 }
  0xab   : > { %430 = vadd.xlane.f32.xlu1 %v429_v46  ;;  %v621_v50 = vsel %vm235_vm1, %v620_v48, 0.0 }
  0xad   : > { %v827_v51 = vpop.eup %826  ;;  %558 = vadd.xlane.f32.xlu2 %v557_v49  ;;  %622 = vadd.xlane.f32.xlu0 %v621_v50 }
  0xae   : > { %v684_v52 = vmul.f32 %v827_v51, %v811_v18 }
  0xb0   : > { %v685_v53 = vsel %vm235_vm1, %v684_v52, 0.0 }
  0xb3   : > { %686 = vadd.xlane.f32.xlu1 %v685_v53 }
 0x110   : > { %v238_v54 = vpop.xlane.xlu0 %237 }
 0x111   : > { %v240_v55 = vsel %vm239_vm2, %v238_v54, -inf }
 0x112   : > { %v241_v56 = vrot.slane %v240_v55, 4 }
 0x114   : > { %v242_v57 = vmax.f32 %v240_v55, %v241_v56 }
 0x116   : > { %v243_v58 = vrot.slane %v242_v57, 2  ;;  %v367_v59 = vpop.xlane.xlu1 %366 }
 0x117   : > { %v368_v60 = vsel %vm239_vm2, %v367_v59, -inf }
 0x118   : > { %v244_v61 = vmax.f32 %v242_v57, %v243_v58  ;;  %v369_v62 = vrot.slane %v368_v60, 4  ;;  %v495_v63 = vpop.xlane.xlu2 %494  ;;  %v303_v0 = vpop.xlane.xlu0 %302 }
 0x119   : > { %v496_v1 = vsel %vm239_vm2, %v495_v63, -inf  ;;  %v304_v2 = vsel %vm239_vm2, %v303_v0, -inf }
 0x11a   : > { %v245_v3 = vrot.slane %v244_v61, 1  ;;  %v370_v12 = vmax.f32 %v368_v60, %v369_v62  ;;  %v497_v13 = vrot.slane %v496_v1, 4  ;;  %v305_v14 = vrot.slane %v304_v2, 4 }
 0x11c   : > { %v246_v15 = vmax.f32 %v244_v61, %v245_v3  ;;  %v371_v16 = vrot.slane %v370_v12, 2  ;;  %v498_v17 = vmax.f32 %v496_v1, %v497_v13  ;;  %v306_v18 = vmax.f32 %v304_v2, %v305_v14 }
 0x11e   : > { %v247_v19 = vsub.f32 %v238_v54, %v246_v15  ;;  %v372_v20 = vmax.f32 %v370_v12, %v371_v16  ;;  %v499_v21 = vrot.slane %v498_v17, 2  ;;  %v307_v22 = vrot.slane %v306_v18, 2  ;;  %v431_v23 = vpop.xlane.xlu1 %430 }
 0x11f   : > { %v432_v24 = vsel %vm239_vm2, %v431_v23, -inf }
 0x120   : > { %v248_v25 = vmul.f32 1.442695, %v247_v19  ;;  %v373_v26 = vrot.slane %v372_v20, 1  ;;  %v500_v27 = vmax.f32 %v498_v17, %v499_v21  ;;  %v308_v28 = vmax.f32 %v306_v18, %v307_v22  ;;  %v559_v29 = vpop.xlane.xlu2 %558  ;;  %v980_v30 = vpop.xlane.xlu0 %622 }
 0x121   : > { %v433_v31 = vrot.slane %v432_v24, 4  ;;  %v560_v32 = vsel %vm239_vm2, %v559_v29, -inf  ;;  %v624_v33 = vsel %vm239_vm2, %v980_v30, -inf }
 0x122   : > { %828 = vpow2.f32 %v248_v25  ;;  %v374_v34 = vmax.f32 %v372_v20, %v373_v26  ;;  %v501_v35 = vrot.slane %v500_v27, 1  ;;  %v309_v36 = vrot.slane %v308_v28, 1 }
 0x123   : > { %v434_v37 = vmax.f32 %v432_v24, %v433_v31  ;;  %v561_v38 = vrot.slane %v560_v32, 4  ;;  %v625_v39 = vrot.slane %v624_v33, 4 }
 0x124   : > { %v375_v40 = vsub.f32 %v367_v59, %v374_v34  ;;  %v502_v41 = vmax.f32 %v500_v27, %v501_v35  ;;  %v310_v42 = vmax.f32 %v308_v28, %v309_v36 }
 0x125   : > { %v435_v43 = vrot.slane %v434_v37, 2  ;;  %v562_v44 = vmax.f32 %v560_v32, %v561_v38  ;;  %v626_v45 = vmax.f32 %v624_v33, %v625_v39 }
 0x126   : > { %v376_v46 = vmul.f32 1.442695, %v375_v40  ;;  %v503_v47 = vsub.f32 %v495_v63, %v502_v41  ;;  %v311_v48 = vsub.f32 %v303_v0, %v310_v42  ;;  %v985_v49 = vpop.xlane.xlu1 %686 }
 0x127   : > { %v436_v50 = vmax.f32 %v434_v37, %v435_v43  ;;  %v563_v51 = vrot.slane %v562_v44, 2  ;;  %v627_v52 = vrot.slane %v626_v45, 2  ;;  %v688_v53 = vsel %vm239_vm2, %v985_v49, -inf }
 0x128   : > { %v989_v54 = vpop.eup %828  ;;  %830 = vpow2.f32 %v376_v46  ;;  %v504_v55 = vmul.f32 1.442695, %v503_v47  ;;  %v312_v56 = vmul.f32 1.442695, %v311_v48  ;;  %v689_v57 = vrot.slane %v688_v53, 4 }
 0x129   : > { %v250_v58 = vsel %vm239_vm2, %v989_v54, 0.0  ;;  %v437_v59 = vrot.slane %v436_v50, 1  ;;  %v564_v60 = vmax.f32 %v562_v44, %v563_v51  ;;  %v628_v61 = vmax.f32 %v626_v45, %v627_v52 }
 0x12a   : > { %v251_v62 = vrot.slane %v250_v58, 4  ;;  %832 = vpow2.f32 %v504_v55  ;;  %v690_v63 = vmax.f32 %v688_v53, %v689_v57 }
 0x12b   : > { %834 = vpow2.f32 %v312_v56  ;;  %v438_v0 = vmax.f32 %v436_v50, %v437_v59  ;;  %v565_v1 = vrot.slane %v564_v60, 1  ;;  %v629_v2 = vrot.slane %v628_v61, 1 }
 0x12c   : > { %v252_v3 = vadd.f32 %v251_v62, %v250_v58  ;;  %v691_v12 = vrot.slane %v690_v63, 2 }
 0x12d   : > { %v439_v13 = vsub.f32 %v431_v23, %v438_v0  ;;  %v566_v14 = vmax.f32 %v564_v60, %v565_v1  ;;  %v630_v15 = vmax.f32 %v628_v61, %v629_v2 }
 0x12e   : > { %v993_v16 = vpop.eup %830  ;;  %v253_v17 = vrot.slane %v252_v3, 2  ;;  %v692_v18 = vmax.f32 %v690_v63, %v691_v12 }
 0x12f   : > { %v378_v19 = vsel %vm239_vm2, %v993_v16, 0.0  ;;  %v440_v20 = vmul.f32 1.442695, %v439_v13  ;;  %v567_v21 = vsub.f32 %v559_v29, %v566_v14  ;;  %v631_v22 = vsub.f32 %v980_v30, %v630_v15 }
 0x130   : > { %v998_v24 = vpop.eup %832  ;;  %v254_v25 = vadd.f32 %v253_v17, %v252_v3  ;;  %v379_v26 = vrot.slane %v378_v19, 4  ;;  %v693_v27 = vrot.slane %v692_v18, 1 }
 0x131   : > { %v1000_v28 = vpop.eup %834  ;;  %v506_v23 = vsel %vm239_vm2, %v998_v24, 0.0  ;;  %836 = vpow2.f32 %v440_v20  ;;  %v568_v31 = vmul.f32 1.442695, %v567_v21  ;;  %v632_v30 = vmul.f32 1.442695, %v631_v22 }
 0x132   : > { %v255_v32 = vrot.slane %v254_v25, 1  ;;  %v380_v33 = vadd.f32 %v379_v26, %v378_v19  ;;  %v507_v34 = vrot.slane %v506_v23, 4  ;;  %v314_v29 = vsel %vm239_vm2, %v1000_v28, 0.0 }
 0x133   : > { %v315_v35 = vrot.slane %v314_v29, 4  ;;  %838 = vpow2.f32 %v568_v31  ;;  %v694_v36 = vmax.f32 %v692_v18, %v693_v27 }
 0x134   : > { %v1006_v37 = vadd.f32 %v255_v32, %v254_v25  ;;  %v381_v38 = vrot.slane %v380_v33, 2  ;;  %v508_v39 = vadd.f32 %v507_v34, %v506_v23 }
 0x135   : > { %v316_v40 = vadd.f32 %v315_v35, %v314_v29  ;;  %v695_v41 = vsub.f32 %v985_v49, %v694_v36 }
 0x136   : > { %840 = vrcp.f32 %v1006_v37  ;;  %v382_v43 = vadd.f32 %v381_v38, %v380_v33  ;;  %v509_v44 = vrot.slane %v508_v39, 2  ;;  %v266_v13 = vand.u32 2147483647, %v1006_v37 }
 0x137   : > { %v1010_v42 = vpop.eup %836  ;;  %v317_v45 = vrot.slane %v316_v40, 2  ;;  %842 = vpow2.f32 %v632_v30  ;;  %v696_v55 = vmul.f32 1.442695, %v695_v41  ;;  %v268_v22 = vand.u32 2147483648, %v1006_v37 }
 0x138   : > { %v442_v46 = vsel %vm239_vm2, %v1010_v42, 0.0  ;;  %v383_v48 = vrot.slane %v382_v43, 1  ;;  %v510_v50 = vadd.f32 %v509_v44, %v508_v39  ;;  %vm262_vm3 = vweird.f32 %v1006_v37 }
 0x139   : > { %v1014_v47 = vpop.eup %838  ;;  %v318_v51 = vadd.f32 %v317_v45, %v316_v40  ;;  %v443_v52 = vrot.slane %v442_v46, 4  ;;  %vm1047_vm4 = vcmp.eq.f32.partialorder %v266_v13, 8.507059e+37  ;;  %v269_v38 = vor.u32 1.1754944e-38, %v268_v22 }
 0x13a   : > { %v570_v53 = vsel %vm239_vm2, %v1014_v47, 0.0  ;;  %v1018_v49 = vadd.f32 %v383_v48, %v382_v43  ;;  %v511_v56 = vrot.slane %v510_v50, 1 }
 0x13b   : > { %v319_v57 = vrot.slane %v318_v51, 1  ;;  %v444_v58 = vadd.f32 %v443_v52, %v442_v46  ;;  %v571_v60 = vrot.slane %v570_v53, 4 }
 0x13c   : > { %v1020_v59 = vpop.eup %840  ;;  %844 = vrcp.f32 %v1018_v49  ;;  %v1027_v63 = vadd.f32 %v511_v56, %v510_v50  ;;  %v394_v39 = vand.u32 2147483647, %v1018_v49  ;;  %vm390_vm6 = vweird.f32 %v1018_v49 }
 0x13d   : > { %v1022_v61 = vpop.eup %842  ;;  %v258_v62 = vmul.f32 %v1020_v59, %v1006_v37  ;;  %v1029_v0 = vadd.f32 %v319_v57, %v318_v51  ;;  %v445_v1 = vrot.slane %v444_v58, 2  ;;  %v572_v2 = vadd.f32 %v571_v60, %v570_v53 }
 0x13e   : > { %846 = vpow2.f32 %v696_v55  ;;  %v634_v12 = vsel %vm239_vm2, %v1022_v61, 0.0  ;;  %vm263_vm5 = vweird.f32 %v1020_v59  ;;  %v396_v41 = vand.u32 2147483648, %v1018_v49 }
 0x13f   : > { %v259_v3 = vsub.f32 1.0, %v258_v62  ;;  %848 = vrcp.f32 %v1027_v63  ;;  %v446_v14 = vadd.f32 %v445_v1, %v444_v58  ;;  %v573_v17 = vrot.slane %v572_v2, 2  ;;  %vm1069_vm7 = vmor %vm262_vm3, %vm263_vm5 }
 0x140   : > { %850 = vrcp.f32 %v1029_v0  ;;  %v635_v18 = vrot.slane %v634_v12, 4  ;;  %v332_v44 = vand.u32 2147483648, %v1029_v0  ;;  %v330_v55 = vand.u32 2147483647, %v1029_v0 }
 0x141   : > { %v260_v19 = vmul.f32 %v1020_v59, %v259_v3  ;;  %v447_v25 = vrot.slane %v446_v14, 1  ;;  %v574_v26 = vadd.f32 %v573_v17, %v572_v2  ;;  %vm1080_vm9 = vcmp.eq.f32.partialorder %v394_v39, 8.507059e+37 }
 0x142   : > { %v1036_v15 = vpop.eup %844  ;;  %v636_v34 = vadd.f32 %v635_v18, %v634_v12  ;;  %v524_v57 = vand.u32 2147483648, %v1027_v63  ;;  %vm326_vm11 = vweird.f32 %v1029_v0  ;;  %v333_v60 = vor.u32 1.1754944e-38, %v332_v44 }
 0x143   : > { %v386_v20 = vmul.f32 %v1036_v15, %v1018_v49  ;;  %v1052_v33 = vadd.f32 %v447_v25, %v446_v14  ;;  %v261_v29 = vadd.f32 %v1020_v59, %v260_v19  ;;  %v575_v30 = vrot.slane %v574_v26, 1 }
 0x144   : > { %v1041_v21 = vpop.eup %846  ;;  %v637_v50 = vrot.slane %v636_v34, 2  ;;  %vm391_vm10 = vweird.f32 %v1036_v15  ;;  %v397_v12 = vor.u32 1.1754944e-38, %v396_v41  ;;  %vm331_vm13 = vcmp.eq.f32.partialorder %v330_v55, 8.507059e+37 }
 0x145   : > { %v1044_v27 = vpop.eup %848  ;;  %v387_v32 = vsub.f32 1.0, %v386_v20  ;;  %v698_v36 = vsel %vm239_vm2, %v1041_v21, 0.0  ;;  %852 = vrcp.f32 %v1052_v33  ;;  %v1074_v48 = vadd.f32 %v575_v30, %v574_v26  ;;  %vm1100_vm15 = vmor %vm390_vm6, %vm391_vm10 }
 0x146   : > { %v851_v31 = vpop.eup %850  ;;  %v514_v40 = vmul.f32 %v1044_v27, %v1027_v63  ;;  %v699_v51 = vrot.slane %v698_v36, 4  ;;  %v265_v52 = vsel %vm1069_vm7, %v1020_v59, %v261_v29  ;;  %v638_v2 = vadd.f32 %v637_v50, %v636_v34 }
 0x147   : > { %v322_v35 = vmul.f32 %v851_v31, %v1029_v0  ;;  %v388_v46 = vmul.f32 %v1036_v15, %v387_v32  ;;  %vm327_vm8 = vweird.f32 %v851_v31  ;;  %854 = vrcp.f32 %v1074_v48 }
 0x148   : > { %v515_v56 = vsub.f32 1.0, %v514_v40  ;;  %v270_v62 = vsel %vm1047_vm4, %v269_v38, %v265_v52  ;;  %vm328_vm12 = vmor %vm326_vm11, %vm327_vm8  ;;  %v700_v3 = vadd.f32 %v699_v51, %v698_v36  ;;  %vm518_vm14 = vweird.f32 %v1027_v63 }
 0x149   : > { %v323_v43 = vsub.f32 1.0, %v322_v35  ;;  %v389_v1 = vadd.f32 %v1036_v15, %v388_v46  ;;  %v522_v0 = vand.u32 2147483647, %v1027_v63  ;;  %v271_v19 = vmul.f32 %v989_v54, %v270_v62 }
 0x14a   : > { %v516_v17 = vmul.f32 %v1044_v27, %v515_v56  ;;  %v525_v22 = vor.u32 1.1754944e-38, %v524_v57  ;;  %v639_v26 = vrot.slane %v638_v2, 1  ;;  %v460_v54 = vand.u32 2147483648, %v1052_v33 }
 0x14b   : > { %v324_v53 = vmul.f32 %v851_v31, %v323_v43  ;;  %v853_v59 = vpop.eup %852  ;;  %v701_v34 = vrot.slane %v700_v3, 2  ;;  %v458_v49 = vand.u32 2147483647, %v1052_v33  ;;  %vm519_vm2 = vweird.f32 %v1044_v27 }
 0x14c   : > { %v450_v14 = vmul.f32 %v853_v59, %v1052_v33  ;;  %vm455_vm0 = vweird.f32 %v853_v59  ;;  %v517_v30 = vadd.f32 %v1044_v27, %v516_v17  ;;  %v640_v36 = vadd.f32 %v639_v26, %v638_v2  ;;  %vm1120_vm5 = vmor %vm518_vm14, %vm519_vm2 }
 0x14d   : > { %v325_v58 = vadd.f32 %v851_v31, %v324_v53  ;;  %v855_v23 = vpop.eup %854  ;;  %v702_v38 = vadd.f32 %v701_v34, %v700_v3  ;;  %vm454_vm3 = vweird.f32 %v1052_v33  ;;  %v272_v40 = vmul.f32 %v271_v19, %v922_v4 }
 0x14e   : > { %v451_v25 = vsub.f32 1.0, %v450_v14  ;;  %v578_v35 = vmul.f32 %v855_v23, %v1074_v48  ;;  %vm456_vm4 = vmor %vm454_vm3, %vm455_vm0  ;;  %v461_v43 = vor.u32 1.1754944e-38, %v460_v54  ;;  %856 = vrcp.f32 %v640_v36 }
 0x14f   : > { %v329_v13 = vsel %vm328_vm12, %v851_v31, %v325_v58  ;;  %v393_v31 = vsel %vm1100_vm15, %v1036_v15, %v389_v1  ;;  %vm459_vm6 = vcmp.eq.f32.partialorder %v458_v49, 8.507059e+37  ;;  %v703_v50 = vrot.slane %v702_v38, 1 }
 0x150   : > { %v334_v18 = vsel %vm331_vm13, %v333_v60, %v329_v13  ;;  %v452_v29 = vmul.f32 %v853_v59, %v451_v25  ;;  %v398_v15 = vsel %vm1080_vm9, %v397_v12, %v393_v31  ;;  %v521_v4 = vsel %vm1120_vm5, %v1044_v27, %v517_v30 }
 0x151   : > { %v335_v32 = vmul.f32 %v1000_v28, %v334_v18  ;;  %v579_v28 = vsub.f32 1.0, %v578_v35  ;;  %v399_v33 = vmul.f32 %v993_v16, %v398_v15  ;;  %vm583_vm7 = vweird.f32 %v855_v23 }
 0x152   : > { %v453_v39 = vadd.f32 %v853_v59, %v452_v29  ;;  %v588_v63 = vand.u32 2147483648, %v1074_v48  ;;  %v704_v53 = vadd.f32 %v703_v50, %v702_v38  ;;  %vm523_vm8 = vcmp.eq.f32.partialorder %v522_v0, 8.507059e+37 }
 0x153   : > { %v336_v41 = vmul.f32 %v932_v6, %v335_v32  ;;  %v580_v46 = vmul.f32 %v855_v23, %v579_v28  ;;  %vm582_vm9 = vweird.f32 %v1074_v48  ;;  %v586_v37 = vand.u32 2147483647, %v1074_v48 }
 0x154   : > { %v457_v45 = vsel %vm456_vm4, %v853_v59, %v453_v39  ;;  %v526_v56 = vsel %vm523_vm8, %v525_v22, %v521_v4  ;;  %vm584_vm10 = vmor %vm582_vm9, %vm583_vm7  ;;  %858 = vrcp.f32 %v704_v53  ;;  %v857_v16 = vpop.eup %856  ;;  %v400_v27 = vmul.f32 %v925_v5, %v399_v33 }
 0x155   : > { %v462_v6 = vsel %vm459_vm6, %v461_v43, %v457_v45  ;;  %v581_v52 = vadd.f32 %v855_v23, %v580_v46  ;;  %v337_v55 = vadd.f32 %v336_v41, %v272_v40  ;;  %v642_v60 = vmul.f32 %v857_v16, %v640_v36 }
 0x156   : > { %v463_v51 = vmul.f32 %v1010_v42, %v462_v6  ;;  %v589_v42 = vor.u32 1.1754944e-38, %v588_v63  ;;  %v527_v59 = vmul.f32 %v998_v24, %v526_v56  ;;  %vm587_vm11 = vcmp.eq.f32.partialorder %v586_v37, 8.507059e+37 }
 0x157   : > { %v585_v58 = vsel %vm584_vm10, %v855_v23, %v581_v52  ;;  %v401_v62 = vadd.f32 %v400_v27, %v337_v55  ;;  %v643_v2 = vsub.f32 1.0, %v642_v60  ;;  %v652_v12 = vand.u32 2147483648, %v640_v36 }
 0x158   : > { %v464_v57 = vmul.f32 %v935_v7, %v463_v51  ;;  %v590_v1 = vsel %vm587_vm11, %v589_v42, %v585_v58  ;;  %vm647_vm12 = vweird.f32 %v857_v16  ;;  %v650_v14 = vand.u32 2147483647, %v640_v36 }
 0x159   : > { %v644_v13 = vmul.f32 %v857_v16, %v643_v2  ;;  %v528_v17 = vmul.f32 %v942_v8, %v527_v59  ;;  %v591_v5 = vmul.f32 %v1014_v47, %v590_v1  ;;  %vm646_vm13 = vweird.f32 %v640_v36 }
 0x15a   : > { %v465_v3 = vadd.f32 %v464_v57, %v401_v62  ;;  %v859_v48 = vpop.eup %858  ;;  %vm648_vm14 = vmor %vm646_vm13, %vm647_vm12  ;;  %v653_v24 = vor.u32 1.1754944e-38, %v652_v12  ;;  %vm651_vm15 = vcmp.eq.f32.partialorder %v650_v14, 8.507059e+37  ;;  %v714_v22 = vand.u32 2147483647, %v704_v53 }
 0x15b   : > { %v706_v7 = vmul.f32 %v859_v48, %v704_v53  ;;  %v645_v0 = vadd.f32 %v857_v16, %v644_v13  ;;  %v716_v25 = vand.u32 2147483648, %v704_v53  ;;  %v592_v26 = vmul.f32 %v952_v10, %v591_v5 }
 0x15c   : > { %v529_v18 = vadd.f32 %v528_v17, %v465_v3  ;;  %vm711_vm0 = vweird.f32 %v859_v48  ;;  %vm710_vm2 = vweird.f32 %v704_v53  ;;  %vm715_vm4 = vcmp.eq.f32.partialorder %v714_v22, 8.507059e+37 }
 0x15d   : > { %v707_v19 = vsub.f32 1.0, %v706_v7  ;;  %v649_v20 = vsel %vm648_vm14, %v857_v16, %v645_v0  ;;  %vm712_vm3 = vmor %vm710_vm2, %vm711_vm0  ;;  %v717_v54 = vor.u32 1.1754944e-38, %v716_v25 }
 0x15e   : > { %v654_v23 = vsel %vm651_vm15, %v653_v24, %v649_v20  ;;  %v593_v47 = vadd.f32 %v592_v26, %v529_v18 }
 0x15f   : > { %v708_v31 = vmul.f32 %v859_v48, %v707_v19  ;;  %v655_v8 = vmul.f32 %v1022_v61, %v654_v23 }
 0x161   : > { %v709_v32 = vadd.f32 %v859_v48, %v708_v31  ;;  %v656_v34 = vmul.f32 %v945_v9, %v655_v8 }
 0x163   : > { %v713_v29 = vsel %vm712_vm3, %v859_v48, %v709_v32  ;;  %v657_v35 = vadd.f32 %v656_v34, %v593_v47 }
 0x164   : > { %v718_v49 = vsel %vm715_vm4, %v717_v54, %v713_v29 }
 0x165   : > { %v719_v30 = vmul.f32 %v1041_v21, %v718_v49 }
 0x167   : > { %v720_v10 = vmul.f32 %v955_v11, %v719_v30 }
 0x169   : > { %v721_v61 = vadd.f32 %v720_v10, %v657_v35 }
 0x16b   : > { %722 = vst.msk [vmem:[%s195_s10] sm:$0xf] %vm235_vm1, %v721_v61 }
 0x16c PF: > { %s14_s15 = sadd.s32 1, %s866_s15  }
 0x16d   : > { %p11_p4 = scmp.ge.s32.totalorder %s14_s15, 4  }
 0x16f   :  { %13 = sbr.rel (!%p11_p4) target bundleno = 1 (0x1), region = 73 }

// kernel: semantic_vector_forward.11
= control target key start
LH: loop header
LB: loop body
LE: loop exit
PB: predicated region body
PF: predicated region fallthrough
CT: control target
= control target key end

     0   :  { %vm24_vm0 = vcmask 130048   ;;  %vm54_vm1 = vcmask 123904   ;;  %vm58_vm2 = vcmask 1041408   ;;  %s432_s1 = inlined_call_operand.vmem [shape: f32[16,16], index: 1, kind: input, shape index: {}]   ;;  %s433_s0 = inlined_call_operand.vmem [shape: f32[4,2,16], index: 0, kind: input, shape index: {}]   ;;  %s434_s2 = inlined_call_operand.vmem [shape: f32[1,16], index: 2, kind: input, shape index: {}]   ;;  %s435_s3 = inlined_call_operand.vmem [shape: f32[1,16], index: 3, kind: input, shape index: {}]   ;;  %s436_s4 = inlined_call_operand.vmem [shape: f32[2,16], index: 4, kind: output, shape index: {}]  }
   0x1   :  { %v19_v0 = vld [vmem:[%s432_s1 + $0x8] sm:$0xff]  ;;  %v18_v1 = vld [vmem:[%s432_s1] sm:$0xff] }
   0x2   :  { %42 = vmatpush.msra.mxu0 %v19_v0  ;;  %176 = vmatpush.msra.mxu2 %v19_v0  ;;  %v357_v2 = vld [vmem:[%s433_s0] sm:$0x3]  ;;  %v362_v3 = vld [vmem:[%s433_s0 + $0x4] sm:$0x3]  ;;  %v367_v4 = vld [vmem:[%s433_s0 + $0x2] sm:$0x3] }
   0x3   :  { %112 = vmatpush.msra.mxu1 %v19_v0  ;;  %240 = vmatpush.msra.mxu3 %v19_v0  ;;  %v372_v5 = vld [vmem:[%s433_s0 + $0x6] sm:$0x3]  ;;  %v297_v6 = vld [vmem:[%s434_s2] ss:$0 sm:$0xff] }
   0x4   :  { %43 = vmatpush.msra.mxu0 %v18_v1  ;;  %177 = vmatpush.msra.mxu2 %v18_v1  ;;  %v298_v12 = vld [vmem:[%s435_s3] ss:$0 sm:$0xff] }
   0x5   :  { %290 = vmatmul.msk.f32.vlgmr.msra.gmra.mxu0 %vm24_vm0, %v357_v2  ;;  %294 = vmatmul.msk.f32.vlgmr.msra.gmra.mxu2 %vm24_vm0, %v362_v3 }
   0x6   :  { %113 = vmatpush.msra.mxu1 %v18_v1  ;;  %241 = vmatpush.msra.mxu3 %v18_v1 }
   0x7   :  { %292 = vmatmul.msk.f32.vlgmr.msra.gmra.mxu1 %vm24_vm0, %v367_v4  ;;  %296 = vmatmul.msk.f32.vlgmr.msra.gmra.mxu3 %vm24_vm0, %v372_v5 }
  0x82   :  { %v45_v7 = vpop.f32.mrf.mxu0 }
  0x83   :  { %v46_v8 = vadd.f32 %v297_v6, %v45_v7 }
  0x84   :  { %v115_v9 = vpop.f32.mrf.mxu1 }
  0x85   :  { %299 = vtanh.f32 %v46_v8  ;;  %v116_v10 = vadd.f32 %v297_v6, %v115_v9 }
  0x87   :  { %301 = vtanh.f32 %v116_v10 }
  0x88   :  { %v179_v11 = vpop.f32.mrf.mxu2 }
  0x89   :  { %v180_v13 = vadd.f32 %v297_v6, %v179_v11 }
  0x8a   :  { %v243_v14 = vpop.f32.mrf.mxu3 }
  0x8b   :  { %v300_v15 = vpop.eup %299  ;;  %303 = vtanh.f32 %v180_v13  ;;  %v244_v16 = vadd.f32 %v297_v6, %v243_v14 }
  0x8c   :  { %v53_v17 = vmul.f32 %v300_v15, %v298_v12 }
  0x8d   :  { %v302_v18 = vpop.eup %301  ;;  %305 = vtanh.f32 %v244_v16 }
  0x8e   :  { %v55_v19 = vsel %vm54_vm1, %v53_v17, 0.0  ;;  %v119_v20 = vmul.f32 %v302_v18, %v298_v12 }
  0x8f   :  { %56 = vadd.xlane.f32.xlu0 %v55_v19 }
  0x90   :  { %v120_v25 = vsel %vm54_vm1, %v119_v20, 0.0 }
  0x91   :  { %v304_v21 = vpop.eup %303 }
  0x92   :  { %v183_v22 = vmul.f32 %v304_v21, %v298_v12 }
  0x93   :  { %v306_v23 = vpop.eup %305 }
  0x94   :  { %v184_v24 = vsel %vm54_vm1, %v183_v22, 0.0  ;;  %v247_v26 = vmul.f32 %v306_v23, %v298_v12 }
  0x95   :  { %185 = vadd.xlane.f32.xlu1 %v184_v24 }
  0x96   :  { %v248_v27 = vsel %vm54_vm1, %v247_v26, 0.0 }
  0x97   :  { %121 = vadd.xlane.f32.xlu0 %v120_v25 }
  0x9d   :  { %249 = vadd.xlane.f32.xlu1 %v248_v27 }
 0x102   :  { %v57_v28 = vpop.xlane.xlu0 %56 }
 0x103   :  { %v59_v29 = vsel %vm58_vm2, %v57_v28, -inf }
 0x104   :  { %v60_v30 = vrot.slane %v59_v29, 4 }
 0x106   :  { %v61_v31 = vmax.f32 %v59_v29, %v60_v30 }
 0x108   :  { %v62_v32 = vrot.slane %v61_v31, 2  ;;  %v186_v33 = vpop.xlane.xlu1 %185 }
 0x109   :  { %v187_v34 = vsel %vm58_vm2, %v186_v33, -inf }
 0x10a   :  { %v63_v35 = vmax.f32 %v61_v31, %v62_v32  ;;  %v188_v36 = vrot.slane %v187_v34, 4  ;;  %v122_v37 = vpop.xlane.xlu0 %121 }
 0x10b   :  { %v123_v38 = vsel %vm58_vm2, %v122_v37, -inf }
 0x10c   :  { %v64_v39 = vrot.slane %v63_v35, 1  ;;  %v189_v40 = vmax.f32 %v187_v34, %v188_v36  ;;  %v124_v41 = vrot.slane %v123_v38, 4 }
 0x10e   :  { %v65_v42 = vmax.f32 %v63_v35, %v64_v39  ;;  %v190_v43 = vrot.slane %v189_v40, 2  ;;  %v125_v44 = vmax.f32 %v123_v38, %v124_v41 }
 0x110   :  { %v66_v45 = vsub.f32 %v57_v28, %v65_v42  ;;  %v191_v46 = vmax.f32 %v189_v40, %v190_v43  ;;  %v126_v47 = vrot.slane %v125_v44, 2  ;;  %v250_v48 = vpop.xlane.xlu1 %249 }
 0x111   :  { %v251_v49 = vsel %vm58_vm2, %v250_v48, -inf }
 0x112   :  { %v67_v50 = vmul.f32 1.442695, %v66_v45  ;;  %v192_v51 = vrot.slane %v191_v46, 1  ;;  %v127_v52 = vmax.f32 %v125_v44, %v126_v47  ;;  %v252_v53 = vrot.slane %v251_v49, 4 }
 0x114   :  { %307 = vpow2.f32 %v67_v50  ;;  %v193_v54 = vmax.f32 %v191_v46, %v192_v51  ;;  %v128_v55 = vrot.slane %v127_v52, 1  ;;  %v253_v56 = vmax.f32 %v251_v49, %v252_v53 }
 0x116   :  { %v194_v57 = vsub.f32 %v186_v33, %v193_v54  ;;  %v129_v58 = vmax.f32 %v127_v52, %v128_v55  ;;  %v254_v59 = vrot.slane %v253_v56, 2 }
 0x118   :  { %v195_v60 = vmul.f32 1.442695, %v194_v57  ;;  %v130_v61 = vsub.f32 %v122_v37, %v129_v58  ;;  %v255_v62 = vmax.f32 %v253_v56, %v254_v59 }
 0x11a   :  { %v392_v63 = vpop.eup %307  ;;  %309 = vpow2.f32 %v195_v60  ;;  %v131_v0 = vmul.f32 1.442695, %v130_v61  ;;  %v256_v1 = vrot.slane %v255_v62, 1 }
 0x11b   :  { %v69_v6 = vsel %vm58_vm2, %v392_v63, 0.0 }
 0x11c   :  { %v70_v7 = vrot.slane %v69_v6, 4  ;;  %311 = vpow2.f32 %v131_v0  ;;  %v257_v8 = vmax.f32 %v255_v62, %v256_v1 }
 0x11e   :  { %v71_v9 = vadd.f32 %v70_v7, %v69_v6  ;;  %v258_v10 = vsub.f32 %v250_v48, %v257_v8 }
 0x120   :  { %v396_v11 = vpop.eup %309  ;;  %v72_v12 = vrot.slane %v71_v9, 2  ;;  %v259_v13 = vmul.f32 1.442695, %v258_v10 }
 0x121   :  { %v197_v14 = vsel %vm58_vm2, %v396_v11, 0.0 }
 0x122   :  { %v400_v15 = vpop.eup %311  ;;  %v73_v16 = vadd.f32 %v72_v12, %v71_v9  ;;  %v198_v17 = vrot.slane %v197_v14, 4  ;;  %313 = vpow2.f32 %v259_v13 }
 0x123   :  { %v133_v18 = vsel %vm58_vm2, %v400_v15, 0.0 }
 0x124   :  { %v74_v19 = vrot.slane %v73_v16, 1  ;;  %v199_v20 = vadd.f32 %v198_v17, %v197_v14  ;;  %v134_v21 = vrot.slane %v133_v18, 4 }
 0x126   :  { %v75_v22 = vadd.f32 %v74_v19, %v73_v16  ;;  %v200_v23 = vrot.slane %v199_v20, 2  ;;  %v135_v24 = vadd.f32 %v134_v21, %v133_v18 }
 0x128   :  { %v404_v25 = vpop.eup %313  ;;  %315 = vrcp.f32 %v75_v22  ;;  %v201_v26 = vadd.f32 %v200_v23, %v199_v20  ;;  %v136_v27 = vrot.slane %v135_v24, 2  ;;  %v87_v45 = vand.u32 2147483648, %v75_v22 }
 0x129   :  { %v261_v28 = vsel %vm58_vm2, %v404_v25, 0.0  ;;  %vm81_vm4 = vweird.f32 %v75_v22  ;;  %v85_v50 = vand.u32 2147483647, %v75_v22 }
 0x12a   :  { %v262_v29 = vrot.slane %v261_v28, 4  ;;  %v202_v30 = vrot.slane %v201_v26, 1  ;;  %v137_v31 = vadd.f32 %v136_v27, %v135_v24  ;;  %v88_v53 = vor.u32 1.1754944e-38, %v87_v45 }
 0x12b   :  { %vm86_vm8 = vcmp.eq.f32.partialorder %v85_v50, 8.507059e+37 }
 0x12c   :  { %v263_v32 = vadd.f32 %v262_v29, %v261_v28  ;;  %v203_v33 = vadd.f32 %v202_v30, %v201_v26  ;;  %v138_v34 = vrot.slane %v137_v31, 1 }
 0x12e   :  { %v316_v35 = vpop.eup %315  ;;  %v264_v36 = vrot.slane %v263_v32, 2  ;;  %317 = vrcp.f32 %v203_v33  ;;  %v139_v38 = vadd.f32 %v138_v34, %v137_v31  ;;  %vm209_vm7 = vweird.f32 %v203_v33 }
 0x12f   :  { %v77_v37 = vmul.f32 %v316_v35, %v75_v22  ;;  %vm82_vm3 = vweird.f32 %v316_v35  ;;  %v215_v56 = vand.u32 2147483648, %v203_v33  ;;  %v213_v59 = vand.u32 2147483647, %v203_v33 }
 0x130   :  { %v265_v39 = vadd.f32 %v264_v36, %v263_v32  ;;  %319 = vrcp.f32 %v139_v38  ;;  %vm408_vm5 = vmor %vm81_vm4, %vm82_vm3  ;;  %v149_v60 = vand.u32 2147483647, %v139_v38  ;;  %v151_v61 = vand.u32 2147483648, %v139_v38 }
 0x131   :  { %v78_v40 = vsub.f32 1.0, %v77_v37  ;;  %v216_v9 = vor.u32 1.1754944e-38, %v215_v56  ;;  %vm145_vm11 = vweird.f32 %v139_v38  ;;  %vm214_vm12 = vcmp.eq.f32.partialorder %v213_v59, 8.507059e+37 }
 0x132   :  { %v266_v42 = vrot.slane %v265_v39, 1  ;;  %vm150_vm14 = vcmp.eq.f32.partialorder %v149_v60, 8.507059e+37  ;;  %v152_v12 = vor.u32 1.1754944e-38, %v151_v61 }
 0x133   :  { %v79_v41 = vmul.f32 %v316_v35, %v78_v40 }
 0x134   :  { %v318_v43 = vpop.eup %317  ;;  %v267_v44 = vadd.f32 %v266_v42, %v265_v39 }
 0x135   :  { %v205_v46 = vmul.f32 %v318_v43, %v203_v33  ;;  %v80_v47 = vadd.f32 %v316_v35, %v79_v41  ;;  %vm210_vm6 = vweird.f32 %v318_v43 }
 0x136   :  { %321 = vrcp.f32 %v267_v44  ;;  %v320_v48 = vpop.eup %319  ;;  %vm414_vm9 = vmor %vm209_vm7, %vm210_vm6  ;;  %v279_v18 = vand.u32 2147483648, %v267_v44  ;;  %v277_v21 = vand.u32 2147483647, %v267_v44  ;;  %vm273_vm0 = vweird.f32 %v267_v44 }
 0x137   :  { %v206_v49 = vsub.f32 1.0, %v205_v46  ;;  %v141_v51 = vmul.f32 %v320_v48, %v139_v38  ;;  %v84_v55 = vsel %vm408_vm5, %v316_v35, %v80_v47  ;;  %vm146_vm10 = vweird.f32 %v320_v48 }
 0x138   :  { %v89_v6 = vsel %vm86_vm8, %v88_v53, %v84_v55  ;;  %vm147_vm13 = vmor %vm145_vm11, %vm146_vm10  ;;  %v280_v28 = vor.u32 1.1754944e-38, %v279_v18  ;;  %vm278_vm3 = vcmp.eq.f32.partialorder %v277_v21, 8.507059e+37 }
 0x139   :  { %v207_v54 = vmul.f32 %v318_v43, %v206_v49  ;;  %v142_v57 = vsub.f32 1.0, %v141_v51  ;;  %v90_v14 = vmul.f32 %v392_v63, %v89_v6 }
 0x13b   :  { %v208_v58 = vadd.f32 %v318_v43, %v207_v54  ;;  %v143_v1 = vmul.f32 %v320_v48, %v142_v57  ;;  %v91_v26 = vmul.f32 %v90_v14, %v357_v2 }
 0x13c   :  { %v322_v62 = vpop.eup %321 }
 0x13d   :  { %v212_v7 = vsel %vm414_vm9, %v318_v43, %v208_v58  ;;  %v269_v8 = vmul.f32 %v322_v62, %v267_v44  ;;  %v144_v10 = vadd.f32 %v320_v48, %v143_v1  ;;  %vm274_vm15 = vweird.f32 %v322_v62 }
 0x13e   :  { %v217_v16 = vsel %vm214_vm12, %v216_v9, %v212_v7  ;;  %vm275_vm2 = vmor %vm273_vm0, %vm274_vm15 }
 0x13f   :  { %v270_v13 = vsub.f32 1.0, %v269_v8  ;;  %v148_v17 = vsel %vm147_vm13, %v320_v48, %v144_v10  ;;  %v218_v23 = vmul.f32 %v396_v11, %v217_v16 }
 0x140   :  { %v153_v19 = vsel %vm150_vm14, %v152_v12, %v148_v17 }
 0x141   :  { %v271_v20 = vmul.f32 %v322_v62, %v270_v13  ;;  %v154_v22 = vmul.f32 %v400_v15, %v153_v19  ;;  %v219_v31 = vmul.f32 %v362_v3, %v218_v23 }
 0x143   :  { %v272_v24 = vadd.f32 %v322_v62, %v271_v20  ;;  %v155_v27 = vmul.f32 %v367_v4, %v154_v22 }
 0x145   :  { %v276_v63 = vsel %vm275_vm2, %v322_v62, %v272_v24  ;;  %v156_v29 = vadd.f32 %v155_v27, %v91_v26 }
 0x146   :  { %v281_v30 = vsel %vm278_vm3, %v280_v28, %v276_v63 }
 0x147   :  { %v282_v32 = vmul.f32 %v404_v25, %v281_v30  ;;  %v220_v33 = vadd.f32 %v219_v31, %v156_v29 }
 0x149   :  { %v283_v15 = vmul.f32 %v372_v5, %v282_v32 }
 0x14b   :  { %v284_v11 = vadd.f32 %v283_v15, %v220_v33 }
 0x14d   :  { %285 = vst.msk [vmem:[%s436_s4] sm:$0x3] %vm54_vm1, %v284_v11 }

// kernel: semantic_vector_forward.10
= control target key start
LH: loop header
LB: loop body
LE: loop exit
PB: predicated region body
PF: predicated region fallthrough
CT: control target
= control target key end

     0   :  { %vm28_vm0 = vcmask 15360   ;;  %v571_v0 = vmov 0.0   ;;  %s623_s27 = smov 0   ;;  %s756_s0 = inlined_call_operand.vmem [shape: f32[4,32,2], index: 0, kind: input, shape index: {}]   ;;  %s757_s1 = inlined_call_operand.vmem [shape: f32[32,32], index: 1, kind: input, shape index: {}]   ;;  %s758_s2 = inlined_call_operand.vmem [shape: f32[32,8], index: 2, kind: input, shape index: {}]   ;;  %s759_s3 = inlined_call_operand.vmem [shape: f32[32,1], index: 3, kind: input, shape index: {}]   ;;  %s760_s4 = inlined_call_operand.vmem [shape: f32[32,32], index: 4, kind: input, shape index: {}]   ;;  %s761_s5 = inlined_call_operand.vmem [shape: f32[32,8], index: 5, kind: input, shape index: {}]   ;;  %s762_s6 = inlined_call_operand.vmem [shape: f32[32,1], index: 6, kind: input, shape index: {}]   ;;  %s763_s7 = inlined_call_operand.vmem [shape: f32[4,8,2], index: 7, kind: output, shape index: {0}]   ;;  %s764_s8 = inlined_call_operand.vmem [shape: f32[4,8,2], index: 8, kind: output, shape index: {1}]  }
   0x1   :  { %29 = vst.msk [vmem:[#allocation2] sm:$0xff] %vm28_vm0, %v571_v0 }
   0x2   :  { %30 = vst.msk [vmem:[#allocation3] sm:$0xff] %vm28_vm0, %v571_v0 }
   0x3 LB: > { %v48_v2 = vld [vmem:[%s758_s2 + $0x8] sm:$0xff]  ;;  %vm52_vm1 = vcmask 64512   ;;  %v47_v3 = vld [vmem:[%s758_s2] sm:$0xff]  ;;  %s464_s10 = sshll.u32 %s565_s27, 5  ;;  %v572_v5 = vmov 0   ;;  %v139_v6 = vld [vmem:[%s759_s3 + $0x18] sm:$0xff]  ;;  %s565_s27 = sphi %s623_s27, %s36_s27  }
   0x4   : > { %v136_v4 = vld [vmem:[%s759_s3] sm:$0xff]  ;;  %s38_s15 = scalar_lea.vmem %s756_s0, %s464_s10  ;;  %519 = vset.pattern.permute.xlu0 %v572_v5  ;;  %520 = vset.pattern.permute.xlu1 %v572_v5  ;;  %v49_v10 = vld [vmem:[%s758_s2 + $0x10] sm:$0xff]  ;;  %vm94_vm2 = vcmask 261120   ;;  %v137_v14 = vld [vmem:[%s759_s3 + $0x8] sm:$0xff]  ;;  %s476_s13 = sshll.u32 %s565_s27, 3 }
   0x5   : > { %v42_v7 = vld [vmem:[%s38_s15 + $0x18] sm:$0xff]  ;;  %v41_v8 = vld [vmem:[%s38_s15 + $0x10] sm:$0xff]  ;;  %142 = vperm.xlu0 %519, %v136_v4   ;;  %157 = vperm.xlu1 %520, %v139_v6   ;;  %v40_v9 = vld [vmem:[%s38_s15 + $0x8] sm:$0xff]  ;;  %s231_s16 = scalar_lea.vmem %s763_s7, %s476_s13  ;;  %s36_s27 = sadd.s32 1, %s565_s27  }
   0x6   : > { %119 = vmatpush.msra.mxu1 %v42_v7  ;;  %491 = vmatpush.msra.mxu2 %v42_v7  ;;  %v39_v11 = vld [vmem:[%s38_s15] sm:$0xff]  ;;  %v45_v13 = vld [vmem:[%s757_s1 + $0x10] sm:$0xff]  ;;  %v50_v16 = vld [vmem:[%s758_s2 + $0x18] sm:$0xff]  ;;  %p33_p0 = scmp.ge.s32.totalorder %s36_s27, 4  }
   0x7   : > { %v43_v12 = vld [vmem:[%s757_s1] sm:$0xff]  ;;  %v138_v15 = vld [vmem:[%s759_s3 + $0x10] sm:$0xff]  ;;  %v44_v17 = vld [vmem:[%s757_s1 + $0x8] sm:$0xff]  ;;  %s690_s17 = smov (%p33_p0), 0  }
   0x8   : > { %v51_v1 = vld [vmem:[#allocation2] sm:$0xff]  ;;  %120 = vmatpush.msra.mxu1 %v41_v8  ;;  %492 = vmatpush.msra.mxu2 %v41_v8  ;;  %v46_v18 = vld [vmem:[%s757_s1 + $0x18] sm:$0xff] }
   0x9   : > { %490 = vmatpush.msra.mxu3 %v51_v1  ;;  %80 = vmatpush.msra.mxu0 %v51_v1 }
   0xa   : > { %466 = vmatmul.msk.f32.vlgmr.msra.gmra.mxu3 %vm52_vm1, %v48_v2  ;;  %465 = vmatmul.msk.f32.vlgmr.msra.gmra.mxu0 %vm52_vm1, %v47_v3  ;;  %v222_v3 = vld [vmem:[#allocation3] sm:$0xff] }
   0xb   : > { %121 = vmatpush.msra.mxu1 %v40_v9  ;;  %493 = vmatpush.msra.mxu2 %v40_v9 }
   0xd   : > { %122 = vmatpush.msra.mxu1 %v39_v11  ;;  %494 = vmatpush.msra.mxu2 %v39_v11 }
   0xe   : > { %469 = vmatmul.msk.f32.vlgmr.msra.gmra.mxu1 %vm94_vm2, %v43_v12  ;;  %471 = vmatmul.msk.f32.vlgmr.msra.gmra.mxu2 %vm94_vm2, %v45_v13 }
   0xf   : > { %147 = vperm.xlu0 %519, %v137_v14   ;;  %152 = vperm.xlu1 %520, %v138_v15  }
  0x12   : > { %467 = vmatmul.msk.f32.gmra.mxu3 %vm52_vm1, %v49_v10 }
  0x16   : > { %470 = vmatmul.msk.f32.gmra.mxu1 %vm94_vm2, %v44_v17  ;;  %472 = vmatmul.msk.f32.gmra.mxu2 %vm94_vm2, %v46_v18 }
  0x1a   : > { %468 = vmatmul.msk.f32.gmra.mxu3 %vm52_vm1, %v50_v16 }
  0x77   : > { %v143_v21 = vpop.permute.xlu0 %142  ;;  %v158_v38 = vpop.permute.xlu1 %157 }
  0x81   : > { %v148_v30 = vpop.permute.xlu0 %147  ;;  %v153_v48 = vpop.permute.xlu1 %152 }
  0x87   : > { %v82_v20 = vpop.f32.mrf.mxu0 }
  0x8b   : > { %v124_v22 = vpop.f32.mrf.mxu1 }
  0x8c   : > { %v125_v23 = vadd.f32 %v124_v22, %v82_v20 }
  0x8d   : > { %v85_v19 = vpop.f32.mrf.mxu3 }
  0x8e   : > { %v160_v24 = vadd.f32 %v143_v21, %v125_v23 }
  0x90   : > { %v473_v26 = vmul.f32 -1.442695, %v160_v24 }
  0x91   : > { %v130_v27 = vpop.f32.mrf.mxu2 }
  0x92   : > { %521 = vpow2.f32 %v473_v26 }
  0x93   : > { %v127_v28 = vpop.f32.mrf.mxu1 }
  0x94   : > { %v128_v29 = vadd.f32 %v127_v28, %v85_v19 }
  0x95   : > { %v88_v25 = vpop.f32.mrf.mxu3 }
  0x96   : > { %v161_v31 = vadd.f32 %v148_v30, %v128_v29  ;;  %v131_v46 = vadd.f32 %v130_v27, %v88_v25 }
  0x98   : > { %v522_v33 = vpop.eup %521  ;;  %v474_v34 = vmul.f32 -1.442695, %v161_v31  ;;  %v162_v52 = vadd.f32 %v153_v48, %v131_v46 }
  0x99   : > { %v167_v35 = vadd.f32 1.0, %v522_v33  ;;  %v133_v36 = vpop.f32.mrf.mxu2 }
  0x9a   : > { %523 = vpow2.f32 %v474_v34 }
  0x9b   : > { %525 = vrcp.f32 %v167_v35  ;;  %v179_v55 = vand.u32 2147483648, %v167_v35  ;;  %vm173_vm4 = vweird.f32 %v167_v35  ;;  %v177_v57 = vand.u32 2147483647, %v167_v35 }
  0x9d   : > { %v91_v32 = vpop.f32.mrf.mxu3  ;;  %v180_v63 = vor.u32 1.1754944e-38, %v179_v55  ;;  %vm178_vm8 = vcmp.eq.f32.partialorder %v177_v57, 8.507059e+37 }
  0x9e   : > { %v134_v37 = vadd.f32 %v133_v36, %v91_v32 }
  0xa0   : > { %v163_v39 = vadd.f32 %v158_v38, %v134_v37  ;;  %v524_v41 = vpop.eup %523 }
  0xa1   : > { %v526_v42 = vpop.eup %525  ;;  %v186_v43 = vadd.f32 1.0, %v524_v41 }
  0xa2   : > { %v475_v40 = vmul.f32 -1.442695, %v163_v39  ;;  %v169_v44 = vmul.f32 %v526_v42, %v167_v35  ;;  %vm174_vm3 = vweird.f32 %v526_v42 }
  0xa3   : > { %v198_v58 = vand.u32 2147483648, %v186_v43  ;;  %vm175_vm5 = vmor %vm173_vm4, %vm174_vm3  ;;  %v196_v61 = vand.u32 2147483647, %v186_v43  ;;  %vm192_vm7 = vweird.f32 %v186_v43 }
  0xa4   : > { %527 = vpow2.f32 %v475_v40  ;;  %v170_v45 = vsub.f32 1.0, %v169_v44 }
  0xa5   : > { %529 = vrcp.f32 %v186_v43  ;;  %v199_v5 = vor.u32 1.1754944e-38, %v198_v58  ;;  %vm197_vm10 = vcmp.eq.f32.partialorder %v196_v61, 8.507059e+37 }
  0xa6   : > { %v171_v49 = vmul.f32 %v526_v42, %v170_v45 }
  0xa8   : > { %v172_v54 = vadd.f32 %v526_v42, %v171_v49 }
  0xaa   : > { %v528_v47 = vpop.eup %527  ;;  %v176_v60 = vsel %vm175_vm5, %v526_v42, %v172_v54 }
  0xab   : > { %v206_v50 = vadd.f32 1.0, %v528_v47  ;;  %v530_v51 = vpop.eup %529  ;;  %v181_v4 = vsel %vm178_vm8, %v180_v63, %v176_v60 }
  0xac   : > { %v188_v53 = vmul.f32 %v530_v51, %v186_v43  ;;  %vm193_vm6 = vweird.f32 %v530_v51 }
  0xad   : > { %531 = vrcp.f32 %v206_v50  ;;  %vm194_vm9 = vmor %vm192_vm7, %vm193_vm6  ;;  %v218_v15 = vand.u32 2147483648, %v206_v50  ;;  %vm212_vm12 = vweird.f32 %v206_v50  ;;  %v216_v16 = vand.u32 2147483647, %v206_v50 }
  0xae   : > { %v189_v56 = vsub.f32 1.0, %v188_v53  ;;  %533 = vtanh.f32 %v162_v52 }
  0xaf   : > { %v219_v18 = vor.u32 1.1754944e-38, %v218_v15  ;;  %vm217_vm14 = vcmp.eq.f32.partialorder %v216_v16, 8.507059e+37 }
  0xb0   : > { %v190_v59 = vmul.f32 %v530_v51, %v189_v56 }
  0xb2   : > { %v191_v1 = vadd.f32 %v530_v51, %v190_v59 }
  0xb3   : > { %v532_v62 = vpop.eup %531 }
  0xb4   : > { %v208_v2 = vmul.f32 %v532_v62, %v206_v50  ;;  %v195_v6 = vsel %vm194_vm9, %v530_v51, %v191_v1  ;;  %v534_v8 = vpop.eup %533  ;;  %vm213_vm11 = vweird.f32 %v532_v62 }
  0xb5   : > { %v200_v9 = vsel %vm197_vm10, %v199_v5, %v195_v6  ;;  %v224_v11 = vmul.f32 %v534_v8, %v181_v4  ;;  %vm214_vm13 = vmor %vm212_vm12, %vm213_vm11 }
  0xb6   : > { %v209_v7 = vsub.f32 1.0, %v208_v2  ;;  %v223_v10 = vmul.f32 %v222_v3, %v200_v9 }
  0xb8   : > { %v210_v12 = vmul.f32 %v532_v62, %v209_v7  ;;  %v225_v13 = vadd.f32 %v224_v11, %v223_v10 }
  0xba   : > { %v211_v14 = vadd.f32 %v532_v62, %v210_v12  ;;  %535 = vtanh.f32 %v225_v13  ;;  %228 = vst.msk [vmem:[#allocation3] sm:$0xff] %vm28_vm0, %v225_v13 }
  0xbb   :  { %234 = vst.msk [vmem:[#allocation3] sm:$0xff] (%p33_p0), %vm28_vm0, %v571_v0 }
  0xbc   : > { %v215_v17 = vsel %vm214_vm13, %v532_v62, %v211_v14 }
  0xbd   : > { %v220_v20 = vsel %vm217_vm14, %v219_v18, %v215_v17 }
  0xc0   : > { %v536_v19 = vpop.eup %535  ;;  %35 = sbr.rel (!%p33_p0) target bundleno = 3 (0x3), region = 74 }
  0xc1   : > { %v227_v21 = vmul.f32 %v536_v19, %v220_v20 }
  0xc3   : > { %229 = vst.msk [vmem:[#allocation2] sm:$0xff] %vm28_vm0, %v227_v21 }
  0xc4   : > { %232 = vst.msk [vmem:[%s231_s16] sm:$0xff] %vm28_vm0, %v227_v21 }
  0xc5   :  { %233 = vst.msk [vmem:[#allocation2] sm:$0xff] %vm28_vm0, %v571_v0 }
  0xc6 LB: > { %v253_v23 = vld [vmem:[%s761_s5 + $0x8] sm:$0xff]  ;;  %v252_v24 = vld [vmem:[%s761_s5] sm:$0xff]  ;;  %s241_s3 = ssub.s32 3, %s569_s17  ;;  %v573_v25 = vmov 0   ;;  %v344_v26 = vld [vmem:[%s762_s6 + $0x18] sm:$0xff]  ;;  %s240_s17 = sadd.s32 1, %s569_s17   ;;  %s569_s17 = sphi %s690_s17, %s240_s17  }
  0xc7   : > { %v341_v0 = vld [vmem:[%s762_s6] sm:$0xff]  ;;  %s477_s20 = sshll.u32 %s241_s3, 5  ;;  %537 = vset.pattern.permute.xlu0 %v573_v25  ;;  %538 = vset.pattern.permute.xlu1 %v573_v25  ;;  %v254_v30 = vld [vmem:[%s761_s5 + $0x10] sm:$0xff]  ;;  %v342_v34 = vld [vmem:[%s762_s6 + $0x8] sm:$0xff]  ;;  %s489_s7 = sshll.u32 %s241_s3, 3 }
  0xc8   : > { %s243_s25 = scalar_lea.vmem %s756_s0, %s477_s20  ;;  %347 = vperm.xlu0 %537, %v341_v0   ;;  %362 = vperm.xlu1 %538, %v344_v26   ;;  %v248_v32 = vld [vmem:[%s760_s4] sm:$0xff]  ;;  %v250_v33 = vld [vmem:[%s760_s4 + $0x10] sm:$0xff]  ;;  %v255_v36 = vld [vmem:[%s761_s5 + $0x18] sm:$0xff]  ;;  %s436_s21 = scalar_lea.vmem %s764_s8, %s489_s7 }
  0xc9   : > { %v247_v27 = vld [vmem:[%s243_s25 + $0x18] sm:$0xff]  ;;  %v246_v28 = vld [vmem:[%s243_s25 + $0x10] sm:$0xff]  ;;  %v245_v29 = vld [vmem:[%s243_s25 + $0x8] sm:$0xff]  ;;  %p237_p1 = scmp.ge.s32.totalorder %s240_s17, 4  }
  0xca   : > { %324 = vmatpush.msra.mxu1 %v247_v27  ;;  %496 = vmatpush.msra.mxu2 %v247_v27  ;;  %v244_v31 = vld [vmem:[%s243_s25] sm:$0xff]  ;;  %v343_v35 = vld [vmem:[%s762_s6 + $0x10] sm:$0xff]  ;;  %v249_v37 = vld [vmem:[%s760_s4 + $0x8] sm:$0xff] }
  0xcb   : > { %v251_v38 = vld [vmem:[%s760_s4 + $0x18] sm:$0xff] }
  0xcc   : > { %v256_v22 = vld [vmem:[#allocation2] sm:$0xff]  ;;  %325 = vmatpush.msra.mxu1 %v246_v28  ;;  %497 = vmatpush.msra.mxu2 %v246_v28 }
  0xcd   : > { %495 = vmatpush.msra.mxu3 %v256_v22  ;;  %285 = vmatpush.msra.mxu0 %v256_v22 }
  0xce   : > { %479 = vmatmul.msk.f32.vlgmr.msra.gmra.mxu3 %vm52_vm1, %v253_v23  ;;  %478 = vmatmul.msk.f32.vlgmr.msra.gmra.mxu0 %vm52_vm1, %v252_v24  ;;  %v427_v23 = vld [vmem:[#allocation3] sm:$0xff] }
  0xcf   : > { %326 = vmatpush.msra.mxu1 %v245_v29  ;;  %498 = vmatpush.msra.mxu2 %v245_v29 }
  0xd0   : > { %352 = vperm.xlu0 %537, %v342_v34   ;;  %357 = vperm.xlu1 %538, %v343_v35  }
  0xd1   : > { %327 = vmatpush.msra.mxu1 %v244_v31  ;;  %499 = vmatpush.msra.mxu2 %v244_v31 }
  0xd2   : > { %482 = vmatmul.msk.f32.vlgmr.msra.gmra.mxu1 %vm94_vm2, %v248_v32  ;;  %484 = vmatmul.msk.f32.vlgmr.msra.gmra.mxu2 %vm94_vm2, %v250_v33 }
  0xd6   : > { %480 = vmatmul.msk.f32.gmra.mxu3 %vm52_vm1, %v254_v30 }
  0xda   : > { %483 = vmatmul.msk.f32.gmra.mxu1 %vm94_vm2, %v249_v37  ;;  %485 = vmatmul.msk.f32.gmra.mxu2 %vm94_vm2, %v251_v38 }
  0xde   : > { %481 = vmatmul.msk.f32.gmra.mxu3 %vm52_vm1, %v255_v36 }
 0x13a   : > { %v348_v41 = vpop.permute.xlu0 %347  ;;  %v363_v58 = vpop.permute.xlu1 %362 }
 0x142   : > { %v353_v50 = vpop.permute.xlu0 %352  ;;  %v358_v5 = vpop.permute.xlu1 %357 }
 0x14b   : > { %v287_v40 = vpop.f32.mrf.mxu0 }
 0x14f   : > { %v329_v42 = vpop.f32.mrf.mxu1 }
 0x150   : > { %v330_v43 = vadd.f32 %v329_v42, %v287_v40 }
 0x151   : > { %v290_v39 = vpop.f32.mrf.mxu3 }
 0x152   : > { %v365_v44 = vadd.f32 %v348_v41, %v330_v43 }
 0x154   : > { %v486_v46 = vmul.f32 -1.442695, %v365_v44 }
 0x155   : > { %v335_v47 = vpop.f32.mrf.mxu2 }
 0x156   : > { %539 = vpow2.f32 %v486_v46 }
 0x157   : > { %v332_v48 = vpop.f32.mrf.mxu1 }
 0x158   : > { %v333_v49 = vadd.f32 %v332_v48, %v290_v39 }
 0x159   : > { %v293_v45 = vpop.f32.mrf.mxu3 }
 0x15a   : > { %v366_v51 = vadd.f32 %v353_v50, %v333_v49  ;;  %v336_v3 = vadd.f32 %v335_v47, %v293_v45 }
 0x15c   : > { %v540_v53 = vpop.eup %539  ;;  %v487_v54 = vmul.f32 -1.442695, %v366_v51  ;;  %v367_v9 = vadd.f32 %v358_v5, %v336_v3 }
 0x15d   : > { %v372_v55 = vadd.f32 1.0, %v540_v53  ;;  %v338_v56 = vpop.f32.mrf.mxu2 }
 0x15e   : > { %541 = vpow2.f32 %v487_v54 }
 0x15f   : > { %543 = vrcp.f32 %v372_v55  ;;  %v384_v12 = vand.u32 2147483648, %v372_v55  ;;  %vm378_vm3 = vweird.f32 %v372_v55  ;;  %v382_v14 = vand.u32 2147483647, %v372_v55 }
 0x161   : > { %v296_v52 = vpop.f32.mrf.mxu3  ;;  %v385_v20 = vor.u32 1.1754944e-38, %v384_v12  ;;  %vm383_vm7 = vcmp.eq.f32.partialorder %v382_v14, 8.507059e+37 }
 0x162   : > { %v339_v57 = vadd.f32 %v338_v56, %v296_v52 }
 0x164   : > { %v368_v59 = vadd.f32 %v363_v58, %v339_v57  ;;  %v542_v61 = vpop.eup %541 }
 0x165   : > { %v544_v62 = vpop.eup %543  ;;  %v391_v63 = vadd.f32 1.0, %v542_v61 }
 0x166   : > { %v488_v60 = vmul.f32 -1.442695, %v368_v59  ;;  %v374_v1 = vmul.f32 %v544_v62, %v372_v55  ;;  %vm379_vm15 = vweird.f32 %v544_v62 }
 0x167   : > { %v403_v15 = vand.u32 2147483648, %v391_v63  ;;  %vm380_vm4 = vmor %vm378_vm3, %vm379_vm15  ;;  %v401_v18 = vand.u32 2147483647, %v391_v63  ;;  %vm397_vm6 = vweird.f32 %v391_v63 }
 0x168   : > { %545 = vpow2.f32 %v488_v60  ;;  %v375_v2 = vsub.f32 1.0, %v374_v1 }
 0x169   : > { %547 = vrcp.f32 %v391_v63  ;;  %v404_v0 = vor.u32 1.1754944e-38, %v403_v15  ;;  %vm402_vm9 = vcmp.eq.f32.partialorder %v401_v18, 8.507059e+37 }
 0x16a   : > { %v376_v6 = vmul.f32 %v544_v62, %v375_v2 }
 0x16c   : > { %v377_v11 = vadd.f32 %v544_v62, %v376_v6 }
 0x16e   : > { %v546_v4 = vpop.eup %545  ;;  %v381_v17 = vsel %vm380_vm4, %v544_v62, %v377_v11 }
 0x16f   : > { %v411_v7 = vadd.f32 1.0, %v546_v4  ;;  %v548_v8 = vpop.eup %547  ;;  %v386_v24 = vsel %vm383_vm7, %v385_v20, %v381_v17 }
 0x170   : > { %v393_v10 = vmul.f32 %v548_v8, %v391_v63  ;;  %vm398_vm5 = vweird.f32 %v548_v8 }
 0x171   : > { %549 = vrcp.f32 %v411_v7  ;;  %vm399_vm8 = vmor %vm397_vm6, %vm398_vm5  ;;  %v423_v34 = vand.u32 2147483648, %v411_v7  ;;  %vm417_vm11 = vweird.f32 %v411_v7  ;;  %v421_v35 = vand.u32 2147483647, %v411_v7 }
 0x172   : > { %v394_v13 = vsub.f32 1.0, %v393_v10  ;;  %551 = vtanh.f32 %v367_v9 }
 0x173   : > { %v424_v37 = vor.u32 1.1754944e-38, %v423_v34  ;;  %vm422_vm13 = vcmp.eq.f32.partialorder %v421_v35, 8.507059e+37 }
 0x174   : > { %v395_v16 = vmul.f32 %v548_v8, %v394_v13 }
 0x176   : > { %v396_v21 = vadd.f32 %v548_v8, %v395_v16 }
 0x177   : > { %v550_v19 = vpop.eup %549 }
 0x178   : > { %v413_v22 = vmul.f32 %v550_v19, %v411_v7  ;;  %v400_v25 = vsel %vm399_vm8, %v548_v8, %v396_v21  ;;  %v552_v27 = vpop.eup %551  ;;  %vm418_vm10 = vweird.f32 %v550_v19 }
 0x179   : > { %v405_v28 = vsel %vm402_vm9, %v404_v0, %v400_v25  ;;  %v429_v30 = vmul.f32 %v552_v27, %v386_v24  ;;  %vm419_vm12 = vmor %vm417_vm11, %vm418_vm10 }
 0x17a   : > { %v414_v26 = vsub.f32 1.0, %v413_v22  ;;  %v428_v29 = vmul.f32 %v427_v23, %v405_v28 }
 0x17c   : > { %v415_v31 = vmul.f32 %v550_v19, %v414_v26  ;;  %v430_v32 = vadd.f32 %v429_v30, %v428_v29 }
 0x17e   : > { %v416_v33 = vadd.f32 %v550_v19, %v415_v31  ;;  %553 = vtanh.f32 %v430_v32  ;;  %433 = vst.msk [vmem:[#allocation3] sm:$0xff] %vm28_vm0, %v430_v32 }
 0x180   : > { %v420_v36 = vsel %vm419_vm12, %v550_v19, %v416_v33 }
 0x181   : > { %v425_v39 = vsel %vm422_vm13, %v424_v37, %v420_v36 }
 0x184   : > { %v554_v38 = vpop.eup %553  ;;  %239 = sbr.rel (!%p237_p1) target bundleno = 198 (0xc6), region = 85 }
 0x185   : > { %v432_v40 = vmul.f32 %v554_v38, %v425_v39 }
 0x187   : > { %434 = vst.msk [vmem:[#allocation2] sm:$0xff] %vm28_vm0, %v432_v40 }
 0x188   : > { %437 = vst.msk [vmem:[%s436_s21] sm:$0xff] %vm28_vm0, %v432_v40 }

// kernel: semantic_vector_forward.7
= control target key start
LH: loop header
LB: loop body
LE: loop exit
PB: predicated region body
PF: predicated region fallthrough
CT: control target
= control target key end

     0   :  { %vm24_vm0 = vcmask 130048   ;;  %vm54_vm1 = vcmask 123904   ;;  %vm58_vm2 = vcmask 1041408   ;;  %s883_s1 = inlined_call_operand.vmem [shape: f32[16,16], index: 1, kind: input, shape index: {}]   ;;  %s884_s0 = inlined_call_operand.vmem [shape: f32[8,2,16], index: 0, kind: input, shape index: {}]   ;;  %s885_s2 = inlined_call_operand.vmem [shape: f32[1,16], index: 2, kind: input, shape index: {}]   ;;  %s886_s3 = inlined_call_operand.vmem [shape: f32[1,16], index: 3, kind: input, shape index: {}]   ;;  %s887_s4 = inlined_call_operand.vmem [shape: f32[2,16], index: 4, kind: output, shape index: {}]  }
   0x1   :  { %v19_v0 = vld [vmem:[%s883_s1 + $0x8] sm:$0xff]  ;;  %v18_v1 = vld [vmem:[%s883_s1] sm:$0xff] }
   0x2   :  { %42 = vmatpush.msra.mxu0 %v19_v0  ;;  %176 = vmatpush.msra.mxu2 %v19_v0  ;;  %v645_v2 = vld [vmem:[%s884_s0] sm:$0x3]  ;;  %v650_v3 = vld [vmem:[%s884_s0 + $0x4] sm:$0x3]  ;;  %v659_v4 = vld [vmem:[%s884_s0 + $0x2] sm:$0x3] }
   0x3   :  { %112 = vmatpush.msra.mxu1 %v19_v0  ;;  %240 = vmatpush.msra.mxu3 %v19_v0  ;;  %v664_v5 = vld [vmem:[%s884_s0 + $0x6] sm:$0x3]  ;;  %v673_v6 = vld [vmem:[%s884_s0 + $0x8] sm:$0x3]  ;;  %v678_v7 = vld [vmem:[%s884_s0 + $0xc] sm:$0x3] }
   0x4   :  { %43 = vmatpush.msra.mxu0 %v18_v1  ;;  %177 = vmatpush.msra.mxu2 %v18_v1  ;;  %v687_v8 = vld [vmem:[%s884_s0 + $0xa] sm:$0x3]  ;;  %v692_v9 = vld [vmem:[%s884_s0 + $0xe] sm:$0x3]  ;;  %v561_v10 = vld [vmem:[%s885_s2] ss:$0 sm:$0xff] }
   0x5   :  { %546 = vmatmul.msk.f32.vlgmr.msra.gmra.mxu0 %vm24_vm0, %v645_v2  ;;  %550 = vmatmul.msk.f32.vlgmr.msra.gmra.mxu2 %vm24_vm0, %v650_v3  ;;  %v562_v16 = vld [vmem:[%s886_s3] ss:$0 sm:$0xff] }
   0x6   :  { %304 = vmatpush.msrb.mxu0 %v19_v0  ;;  %432 = vmatpush.msrb.mxu2 %v19_v0 }
   0x7   :  { %113 = vmatpush.msra.mxu1 %v18_v1  ;;  %241 = vmatpush.msra.mxu3 %v18_v1 }
   0x8   :  { %305 = vmatpush.msrb.mxu0 %v18_v1  ;;  %548 = vmatmul.msk.f32.vlgmr.msra.gmra.mxu1 %vm24_vm0, %v659_v4 }
   0x9   :  { %552 = vmatmul.msk.f32.vlgmr.msra.gmra.mxu3 %vm24_vm0, %v664_v5  ;;  %433 = vmatpush.msrb.mxu2 %v18_v1 }
   0xa   :  { %496 = vmatpush.msrb.mxu3 %v19_v0  ;;  %368 = vmatpush.msrb.mxu1 %v19_v0 }
   0xc   :  { %497 = vmatpush.msrb.mxu3 %v18_v1  ;;  %369 = vmatpush.msrb.mxu1 %v18_v1 }
   0xd   :  { %554 = vmatmul.msk.f32.vlgmr.msrb.gmra.mxu0 %vm24_vm0, %v673_v6  ;;  %558 = vmatmul.msk.f32.vlgmr.msrb.gmra.mxu2 %vm24_vm0, %v678_v7 }
  0x10   :  { %556 = vmatmul.msk.f32.vlgmr.msrb.gmra.mxu1 %vm24_vm0, %v687_v8 }
  0x11   :  { %560 = vmatmul.msk.f32.vlgmr.msrb.gmra.mxu3 %vm24_vm0, %v692_v9 }
  0x82   :  { %v45_v11 = vpop.f32.mrf.mxu0 }
  0x83   :  { %v46_v12 = vadd.f32 %v561_v10, %v45_v11 }
  0x85   :  { %563 = vtanh.f32 %v46_v12  ;;  %v115_v13 = vpop.f32.mrf.mxu1 }
  0x86   :  { %v116_v14 = vadd.f32 %v561_v10, %v115_v13 }
  0x88   :  { %v179_v15 = vpop.f32.mrf.mxu2  ;;  %565 = vtanh.f32 %v116_v14 }
  0x89   :  { %v180_v17 = vadd.f32 %v561_v10, %v179_v15 }
  0x8a   :  { %v307_v18 = vpop.f32.mrf.mxu0 }
  0x8b   :  { %v564_v19 = vpop.eup %563  ;;  %567 = vtanh.f32 %v180_v17  ;;  %v308_v20 = vadd.f32 %v561_v10, %v307_v18 }
  0x8c   :  { %v53_v21 = vmul.f32 %v564_v19, %v562_v16  ;;  %v243_v22 = vpop.f32.mrf.mxu3 }
  0x8d   :  { %569 = vtanh.f32 %v308_v20  ;;  %v244_v23 = vadd.f32 %v561_v10, %v243_v22  ;;  %v371_v24 = vpop.f32.mrf.mxu1 }
  0x8e   :  { %v566_v25 = vpop.eup %565  ;;  %v55_v26 = vsel %vm54_vm1, %v53_v21, 0.0  ;;  %v372_v27 = vadd.f32 %v561_v10, %v371_v24 }
  0x8f   :  { %56 = vadd.xlane.f32.xlu0 %v55_v26  ;;  %571 = vtanh.f32 %v244_v23  ;;  %v119_v29 = vmul.f32 %v566_v25, %v562_v16 }
  0x90   :  { %573 = vtanh.f32 %v372_v27  ;;  %v435_v28 = vpop.f32.mrf.mxu2 }
  0x91   :  { %v568_v30 = vpop.eup %567  ;;  %v436_v31 = vadd.f32 %v561_v10, %v435_v28  ;;  %v120_v36 = vsel %vm54_vm1, %v119_v29, 0.0 }
  0x92   :  { %v183_v32 = vmul.f32 %v568_v30, %v562_v16 }
  0x93   :  { %v570_v33 = vpop.eup %569  ;;  %575 = vtanh.f32 %v436_v31 }
  0x94   :  { %v184_v34 = vsel %vm54_vm1, %v183_v32, 0.0  ;;  %v311_v35 = vmul.f32 %v570_v33, %v562_v16  ;;  %v499_v37 = vpop.f32.mrf.mxu3 }
  0x95   :  { %v572_v38 = vpop.eup %571  ;;  %185 = vadd.xlane.f32.xlu1 %v184_v34  ;;  %v500_v39 = vadd.f32 %v561_v10, %v499_v37 }
  0x96   :  { %v574_v40 = vpop.eup %573  ;;  %v312_v41 = vsel %vm54_vm1, %v311_v35, 0.0  ;;  %v247_v42 = vmul.f32 %v572_v38, %v562_v16 }
  0x97   :  { %313 = vadd.xlane.f32.xlu2 %v312_v41  ;;  %121 = vadd.xlane.f32.xlu0 %v120_v36  ;;  %577 = vtanh.f32 %v500_v39  ;;  %v375_v43 = vmul.f32 %v574_v40, %v562_v16 }
  0x98   :  { %v248_v45 = vsel %vm54_vm1, %v247_v42, 0.0 }
  0x99   :  { %v576_v44 = vpop.eup %575  ;;  %v376_v47 = vsel %vm54_vm1, %v375_v43, 0.0 }
  0x9a   :  { %v439_v46 = vmul.f32 %v576_v44, %v562_v16 }
  0x9c   :  { %v440_v48 = vsel %vm54_vm1, %v439_v46, 0.0 }
  0x9d   :  { %v578_v49 = vpop.eup %577  ;;  %249 = vadd.xlane.f32.xlu1 %v248_v45 }
  0x9e   :  { %v503_v50 = vmul.f32 %v578_v49, %v562_v16 }
  0x9f   :  { %377 = vadd.xlane.f32.xlu2 %v376_v47  ;;  %441 = vadd.xlane.f32.xlu0 %v440_v48 }
  0xa0   :  { %v504_v51 = vsel %vm54_vm1, %v503_v50, 0.0 }
  0xa5   :  { %505 = vadd.xlane.f32.xlu1 %v504_v51 }
 0x102   :  { %v57_v52 = vpop.xlane.xlu0 %56 }
 0x103   :  { %v59_v53 = vsel %vm58_vm2, %v57_v52, -inf }
 0x104   :  { %v60_v54 = vrot.slane %v59_v53, 4 }
 0x106   :  { %v61_v55 = vmax.f32 %v59_v53, %v60_v54 }
 0x108   :  { %v62_v56 = vrot.slane %v61_v55, 2  ;;  %v186_v57 = vpop.xlane.xlu1 %185 }
 0x109   :  { %v187_v58 = vsel %vm58_vm2, %v186_v57, -inf }
 0x10a   :  { %v63_v59 = vmax.f32 %v61_v55, %v62_v56  ;;  %v188_v60 = vrot.slane %v187_v58, 4  ;;  %v314_v61 = vpop.xlane.xlu2 %313  ;;  %v122_v62 = vpop.xlane.xlu0 %121 }
 0x10b   :  { %v315_v63 = vsel %vm58_vm2, %v314_v61, -inf  ;;  %v123_v0 = vsel %vm58_vm2, %v122_v62, -inf }
 0x10c   :  { %v64_v1 = vrot.slane %v63_v59, 1  ;;  %v189_v10 = vmax.f32 %v187_v58, %v188_v60  ;;  %v316_v11 = vrot.slane %v315_v63, 4  ;;  %v124_v12 = vrot.slane %v123_v0, 4 }
 0x10e   :  { %v65_v13 = vmax.f32 %v63_v59, %v64_v1  ;;  %v190_v14 = vrot.slane %v189_v10, 2  ;;  %v317_v15 = vmax.f32 %v315_v63, %v316_v11  ;;  %v125_v16 = vmax.f32 %v123_v0, %v124_v12 }
 0x110   :  { %v66_v17 = vsub.f32 %v57_v52, %v65_v13  ;;  %v191_v18 = vmax.f32 %v189_v10, %v190_v14  ;;  %v318_v19 = vrot.slane %v317_v15, 2  ;;  %v126_v20 = vrot.slane %v125_v16, 2  ;;  %v250_v21 = vpop.xlane.xlu1 %249 }
 0x111   :  { %v251_v22 = vsel %vm58_vm2, %v250_v21, -inf }
 0x112   :  { %v67_v23 = vmul.f32 1.442695, %v66_v17  ;;  %v192_v24 = vrot.slane %v191_v18, 1  ;;  %v319_v25 = vmax.f32 %v317_v15, %v318_v19  ;;  %v127_v26 = vmax.f32 %v125_v16, %v126_v20  ;;  %v378_v27 = vpop.xlane.xlu2 %377  ;;  %v717_v28 = vpop.xlane.xlu0 %441 }
 0x113   :  { %v252_v29 = vrot.slane %v251_v22, 4  ;;  %v379_v30 = vsel %vm58_vm2, %v378_v27, -inf  ;;  %v443_v31 = vsel %vm58_vm2, %v717_v28, -inf }
 0x114   :  { %579 = vpow2.f32 %v67_v23  ;;  %v193_v32 = vmax.f32 %v191_v18, %v192_v24  ;;  %v320_v33 = vrot.slane %v319_v25, 1  ;;  %v128_v34 = vrot.slane %v127_v26, 1 }
 0x115   :  { %v253_v35 = vmax.f32 %v251_v22, %v252_v29  ;;  %v380_v36 = vrot.slane %v379_v30, 4  ;;  %v444_v37 = vrot.slane %v443_v31, 4 }
 0x116   :  { %v194_v38 = vsub.f32 %v186_v57, %v193_v32  ;;  %v321_v39 = vmax.f32 %v319_v25, %v320_v33  ;;  %v129_v40 = vmax.f32 %v127_v26, %v128_v34 }
 0x117   :  { %v254_v41 = vrot.slane %v253_v35, 2  ;;  %v381_v42 = vmax.f32 %v379_v30, %v380_v36  ;;  %v445_v43 = vmax.f32 %v443_v31, %v444_v37 }
 0x118   :  { %v195_v44 = vmul.f32 1.442695, %v194_v38  ;;  %v322_v45 = vsub.f32 %v314_v61, %v321_v39  ;;  %v130_v46 = vsub.f32 %v122_v62, %v129_v40  ;;  %v722_v47 = vpop.xlane.xlu1 %505 }
 0x119   :  { %v255_v48 = vmax.f32 %v253_v35, %v254_v41  ;;  %v382_v49 = vrot.slane %v381_v42, 2  ;;  %v446_v50 = vrot.slane %v445_v43, 2  ;;  %v507_v51 = vsel %vm58_vm2, %v722_v47, -inf }
 0x11a   :  { %v726_v52 = vpop.eup %579  ;;  %581 = vpow2.f32 %v195_v44  ;;  %v323_v53 = vmul.f32 1.442695, %v322_v45  ;;  %v131_v54 = vmul.f32 1.442695, %v130_v46  ;;  %v508_v55 = vrot.slane %v507_v51, 4 }
 0x11b   :  { %v69_v56 = vsel %vm58_vm2, %v726_v52, 0.0  ;;  %v256_v57 = vrot.slane %v255_v48, 1  ;;  %v383_v58 = vmax.f32 %v381_v42, %v382_v49  ;;  %v447_v59 = vmax.f32 %v445_v43, %v446_v50 }
 0x11c   :  { %v70_v60 = vrot.slane %v69_v56, 4  ;;  %583 = vpow2.f32 %v323_v53  ;;  %v509_v61 = vmax.f32 %v507_v51, %v508_v55 }
 0x11d   :  { %585 = vpow2.f32 %v131_v54  ;;  %v257_v62 = vmax.f32 %v255_v48, %v256_v57  ;;  %v384_v63 = vrot.slane %v383_v58, 1  ;;  %v448_v0 = vrot.slane %v447_v59, 1 }
 0x11e   :  { %v71_v1 = vadd.f32 %v70_v60, %v69_v56  ;;  %v510_v10 = vrot.slane %v509_v61, 2 }
 0x11f   :  { %v258_v11 = vsub.f32 %v250_v21, %v257_v62  ;;  %v385_v12 = vmax.f32 %v383_v58, %v384_v63  ;;  %v449_v13 = vmax.f32 %v447_v59, %v448_v0 }
 0x120   :  { %v730_v14 = vpop.eup %581  ;;  %v72_v15 = vrot.slane %v71_v1, 2  ;;  %v511_v16 = vmax.f32 %v509_v61, %v510_v10 }
 0x121   :  { %v197_v17 = vsel %vm58_vm2, %v730_v14, 0.0  ;;  %v259_v18 = vmul.f32 1.442695, %v258_v11  ;;  %v386_v19 = vsub.f32 %v378_v27, %v385_v12  ;;  %v450_v20 = vsub.f32 %v717_v28, %v449_v13 }
 0x122   :  { %v735_v22 = vpop.eup %583  ;;  %v73_v23 = vadd.f32 %v72_v15, %v71_v1  ;;  %v198_v24 = vrot.slane %v197_v17, 4  ;;  %v512_v25 = vrot.slane %v511_v16, 1 }
 0x123   :  { %v737_v26 = vpop.eup %585  ;;  %v325_v21 = vsel %vm58_vm2, %v735_v22, 0.0  ;;  %587 = vpow2.f32 %v259_v18  ;;  %v387_v29 = vmul.f32 1.442695, %v386_v19  ;;  %v451_v28 = vmul.f32 1.442695, %v450_v20 }
 0x124   :  { %v74_v30 = vrot.slane %v73_v23, 1  ;;  %v199_v31 = vadd.f32 %v198_v24, %v197_v17  ;;  %v326_v32 = vrot.slane %v325_v21, 4  ;;  %v133_v27 = vsel %vm58_vm2, %v737_v26, 0.0 }
 0x125   :  { %v134_v33 = vrot.slane %v133_v27, 4  ;;  %589 = vpow2.f32 %v387_v29  ;;  %v513_v34 = vmax.f32 %v511_v16, %v512_v25 }
 0x126   :  { %v743_v35 = vadd.f32 %v74_v30, %v73_v23  ;;  %v200_v36 = vrot.slane %v199_v31, 2  ;;  %v327_v37 = vadd.f32 %v326_v32, %v325_v21 }
 0x127   :  { %v135_v38 = vadd.f32 %v134_v33, %v133_v27  ;;  %v514_v39 = vsub.f32 %v722_v47, %v513_v34 }
 0x128   :  { %591 = vrcp.f32 %v743_v35  ;;  %v201_v41 = vadd.f32 %v200_v36, %v199_v31  ;;  %v328_v42 = vrot.slane %v327_v37, 2  ;;  %v85_v11 = vand.u32 2147483647, %v743_v35 }
 0x129   :  { %v747_v40 = vpop.eup %587  ;;  %v136_v43 = vrot.slane %v135_v38, 2  ;;  %593 = vpow2.f32 %v451_v28  ;;  %v515_v53 = vmul.f32 1.442695, %v514_v39  ;;  %v87_v20 = vand.u32 2147483648, %v743_v35 }
 0x12a   :  { %v261_v44 = vsel %vm58_vm2, %v747_v40, 0.0  ;;  %v202_v46 = vrot.slane %v201_v41, 1  ;;  %v329_v48 = vadd.f32 %v328_v42, %v327_v37  ;;  %vm81_vm3 = vweird.f32 %v743_v35 }
 0x12b   :  { %v751_v45 = vpop.eup %589  ;;  %v137_v49 = vadd.f32 %v136_v43, %v135_v38  ;;  %v262_v50 = vrot.slane %v261_v44, 4  ;;  %vm784_vm4 = vcmp.eq.f32.partialorder %v85_v11, 8.507059e+37  ;;  %v88_v36 = vor.u32 1.1754944e-38, %v87_v20 }
 0x12c   :  { %v389_v51 = vsel %vm58_vm2, %v751_v45, 0.0  ;;  %v755_v47 = vadd.f32 %v202_v46, %v201_v41  ;;  %v330_v54 = vrot.slane %v329_v48, 1 }
 0x12d   :  { %v138_v55 = vrot.slane %v137_v49, 1  ;;  %v263_v56 = vadd.f32 %v262_v50, %v261_v44  ;;  %v390_v58 = vrot.slane %v389_v51, 4 }
 0x12e   :  { %v757_v57 = vpop.eup %591  ;;  %595 = vrcp.f32 %v755_v47  ;;  %v764_v61 = vadd.f32 %v330_v54, %v329_v48  ;;  %v213_v37 = vand.u32 2147483647, %v755_v47  ;;  %vm209_vm6 = vweird.f32 %v755_v47 }
 0x12f   :  { %v759_v59 = vpop.eup %593  ;;  %v77_v60 = vmul.f32 %v757_v57, %v743_v35  ;;  %v766_v62 = vadd.f32 %v138_v55, %v137_v49  ;;  %v264_v63 = vrot.slane %v263_v56, 2  ;;  %v391_v0 = vadd.f32 %v390_v58, %v389_v51 }
 0x130   :  { %597 = vpow2.f32 %v515_v53  ;;  %v453_v10 = vsel %vm58_vm2, %v759_v59, 0.0  ;;  %vm82_vm5 = vweird.f32 %v757_v57  ;;  %v215_v39 = vand.u32 2147483648, %v755_v47 }
 0x131   :  { %v78_v1 = vsub.f32 1.0, %v77_v60  ;;  %599 = vrcp.f32 %v764_v61  ;;  %v265_v12 = vadd.f32 %v264_v63, %v263_v56  ;;  %v392_v15 = vrot.slane %v391_v0, 2  ;;  %vm806_vm7 = vmor %vm81_vm3, %vm82_vm5 }
 0x132   :  { %601 = vrcp.f32 %v766_v62  ;;  %v454_v16 = vrot.slane %v453_v10, 4  ;;  %v151_v42 = vand.u32 2147483648, %v766_v62  ;;  %v149_v53 = vand.u32 2147483647, %v766_v62 }
 0x133   :  { %v79_v17 = vmul.f32 %v757_v57, %v78_v1  ;;  %v266_v23 = vrot.slane %v265_v12, 1  ;;  %v393_v24 = vadd.f32 %v392_v15, %v391_v0  ;;  %vm817_vm9 = vcmp.eq.f32.partialorder %v213_v37, 8.507059e+37 }
 0x134   :  { %v773_v13 = vpop.eup %595  ;;  %v455_v32 = vadd.f32 %v454_v16, %v453_v10  ;;  %v343_v55 = vand.u32 2147483648, %v764_v61  ;;  %vm145_vm11 = vweird.f32 %v766_v62  ;;  %v152_v58 = vor.u32 1.1754944e-38, %v151_v42 }
 0x135   :  { %v205_v18 = vmul.f32 %v773_v13, %v755_v47  ;;  %v789_v31 = vadd.f32 %v266_v23, %v265_v12  ;;  %v80_v27 = vadd.f32 %v757_v57, %v79_v17  ;;  %v394_v28 = vrot.slane %v393_v24, 1 }
 0x136   :  { %v778_v19 = vpop.eup %597  ;;  %v456_v48 = vrot.slane %v455_v32, 2  ;;  %vm210_vm10 = vweird.f32 %v773_v13  ;;  %v216_v10 = vor.u32 1.1754944e-38, %v215_v39  ;;  %vm150_vm13 = vcmp.eq.f32.partialorder %v149_v53, 8.507059e+37 }
 0x137   :  { %v781_v25 = vpop.eup %599  ;;  %v206_v30 = vsub.f32 1.0, %v205_v18  ;;  %v517_v34 = vsel %vm58_vm2, %v778_v19, 0.0  ;;  %603 = vrcp.f32 %v789_v31  ;;  %v811_v46 = vadd.f32 %v394_v28, %v393_v24  ;;  %vm837_vm15 = vmor %vm209_vm6, %vm210_vm10 }
 0x138   :  { %v602_v29 = vpop.eup %601  ;;  %v333_v38 = vmul.f32 %v781_v25, %v764_v61  ;;  %v518_v49 = vrot.slane %v517_v34, 4  ;;  %v84_v50 = vsel %vm806_vm7, %v757_v57, %v80_v27  ;;  %v457_v0 = vadd.f32 %v456_v48, %v455_v32 }
 0x139   :  { %v141_v33 = vmul.f32 %v602_v29, %v766_v62  ;;  %v207_v44 = vmul.f32 %v773_v13, %v206_v30  ;;  %vm146_vm8 = vweird.f32 %v602_v29  ;;  %605 = vrcp.f32 %v811_v46 }
 0x13a   :  { %v334_v54 = vsub.f32 1.0, %v333_v38  ;;  %v89_v60 = vsel %vm784_vm4, %v88_v36, %v84_v50  ;;  %vm147_vm12 = vmor %vm145_vm11, %vm146_vm8  ;;  %v519_v1 = vadd.f32 %v518_v49, %v517_v34  ;;  %vm337_vm14 = vweird.f32 %v764_v61 }
 0x13b   :  { %v142_v41 = vsub.f32 1.0, %v141_v33  ;;  %v208_v63 = vadd.f32 %v773_v13, %v207_v44  ;;  %v341_v62 = vand.u32 2147483647, %v764_v61  ;;  %v90_v17 = vmul.f32 %v726_v52, %v89_v60 }
 0x13c   :  { %v335_v15 = vmul.f32 %v781_v25, %v334_v54  ;;  %v344_v20 = vor.u32 1.1754944e-38, %v343_v55  ;;  %v458_v24 = vrot.slane %v457_v0, 1  ;;  %v279_v52 = vand.u32 2147483648, %v789_v31 }
 0x13d   :  { %v143_v51 = vmul.f32 %v602_v29, %v142_v41  ;;  %v604_v57 = vpop.eup %603  ;;  %v520_v32 = vrot.slane %v519_v1, 2  ;;  %v277_v47 = vand.u32 2147483647, %v789_v31  ;;  %vm338_vm2 = vweird.f32 %v781_v25 }
 0x13e   :  { %v269_v12 = vmul.f32 %v604_v57, %v789_v31  ;;  %vm274_vm0 = vweird.f32 %v604_v57  ;;  %v336_v28 = vadd.f32 %v781_v25, %v335_v15  ;;  %v459_v34 = vadd.f32 %v458_v24, %v457_v0  ;;  %vm857_vm5 = vmor %vm337_vm14, %vm338_vm2 }
 0x13f   :  { %v144_v56 = vadd.f32 %v602_v29, %v143_v51  ;;  %v606_v21 = vpop.eup %605  ;;  %v521_v36 = vadd.f32 %v520_v32, %v519_v1  ;;  %vm273_vm3 = vweird.f32 %v789_v31  ;;  %v91_v38 = vmul.f32 %v90_v17, %v645_v2 }
 0x140   :  { %v270_v23 = vsub.f32 1.0, %v269_v12  ;;  %v397_v33 = vmul.f32 %v606_v21, %v811_v46  ;;  %vm275_vm4 = vmor %vm273_vm3, %vm274_vm0  ;;  %v280_v41 = vor.u32 1.1754944e-38, %v279_v52  ;;  %607 = vrcp.f32 %v459_v34 }
 0x141   :  { %v148_v11 = vsel %vm147_vm12, %v602_v29, %v144_v56  ;;  %v212_v29 = vsel %vm837_vm15, %v773_v13, %v208_v63  ;;  %vm278_vm6 = vcmp.eq.f32.partialorder %v277_v47, 8.507059e+37  ;;  %v522_v48 = vrot.slane %v521_v36, 1 }
 0x142   :  { %v153_v16 = vsel %vm150_vm13, %v152_v58, %v148_v11  ;;  %v271_v27 = vmul.f32 %v604_v57, %v270_v23  ;;  %v217_v13 = vsel %vm817_vm9, %v216_v10, %v212_v29  ;;  %v340_v2 = vsel %vm857_vm5, %v781_v25, %v336_v28 }
 0x143   :  { %v154_v30 = vmul.f32 %v737_v26, %v153_v16  ;;  %v398_v26 = vsub.f32 1.0, %v397_v33  ;;  %v218_v31 = vmul.f32 %v730_v14, %v217_v13  ;;  %vm402_vm7 = vweird.f32 %v606_v21 }
 0x144   :  { %v272_v37 = vadd.f32 %v604_v57, %v271_v27  ;;  %v407_v61 = vand.u32 2147483648, %v811_v46  ;;  %v523_v51 = vadd.f32 %v522_v48, %v521_v36  ;;  %vm342_vm8 = vcmp.eq.f32.partialorder %v341_v62, 8.507059e+37 }
 0x145   :  { %v155_v39 = vmul.f32 %v659_v4, %v154_v30  ;;  %v399_v44 = vmul.f32 %v606_v21, %v398_v26  ;;  %vm401_vm9 = vweird.f32 %v811_v46  ;;  %v405_v35 = vand.u32 2147483647, %v811_v46 }
 0x146   :  { %v276_v43 = vsel %vm275_vm4, %v604_v57, %v272_v37  ;;  %v345_v54 = vsel %vm342_vm8, %v344_v20, %v340_v2  ;;  %vm403_vm10 = vmor %vm401_vm9, %vm402_vm7  ;;  %609 = vrcp.f32 %v523_v51  ;;  %v608_v14 = vpop.eup %607  ;;  %v219_v25 = vmul.f32 %v650_v3, %v218_v31 }
 0x147   :  { %v281_v4 = vsel %vm278_vm6, %v280_v41, %v276_v43  ;;  %v400_v50 = vadd.f32 %v606_v21, %v399_v44  ;;  %v156_v53 = vadd.f32 %v155_v39, %v91_v38  ;;  %v461_v58 = vmul.f32 %v608_v14, %v459_v34 }
 0x148   :  { %v282_v49 = vmul.f32 %v747_v40, %v281_v4  ;;  %v408_v40 = vor.u32 1.1754944e-38, %v407_v61  ;;  %v346_v57 = vmul.f32 %v735_v22, %v345_v54  ;;  %vm406_vm11 = vcmp.eq.f32.partialorder %v405_v35, 8.507059e+37 }
 0x149   :  { %v404_v56 = vsel %vm403_vm10, %v606_v21, %v400_v50  ;;  %v220_v60 = vadd.f32 %v219_v25, %v156_v53  ;;  %v462_v0 = vsub.f32 1.0, %v461_v58  ;;  %v471_v10 = vand.u32 2147483648, %v459_v34 }
 0x14a   :  { %v283_v55 = vmul.f32 %v664_v5, %v282_v49  ;;  %v409_v63 = vsel %vm406_vm11, %v408_v40, %v404_v56  ;;  %vm466_vm12 = vweird.f32 %v608_v14  ;;  %v469_v12 = vand.u32 2147483647, %v459_v34 }
 0x14b   :  { %v463_v11 = vmul.f32 %v608_v14, %v462_v0  ;;  %v347_v15 = vmul.f32 %v673_v6, %v346_v57  ;;  %v410_v3 = vmul.f32 %v751_v45, %v409_v63  ;;  %vm465_vm13 = vweird.f32 %v459_v34 }
 0x14c   :  { %v284_v1 = vadd.f32 %v283_v55, %v220_v60  ;;  %v610_v46 = vpop.eup %609  ;;  %vm467_vm14 = vmor %vm465_vm13, %vm466_vm12  ;;  %v472_v22 = vor.u32 1.1754944e-38, %v471_v10  ;;  %vm470_vm15 = vcmp.eq.f32.partialorder %v469_v12, 8.507059e+37  ;;  %v533_v20 = vand.u32 2147483647, %v523_v51 }
 0x14d   :  { %v525_v5 = vmul.f32 %v610_v46, %v523_v51  ;;  %v464_v62 = vadd.f32 %v608_v14, %v463_v11  ;;  %v535_v23 = vand.u32 2147483648, %v523_v51  ;;  %v411_v24 = vmul.f32 %v687_v8, %v410_v3 }
 0x14e   :  { %v348_v16 = vadd.f32 %v347_v15, %v284_v1  ;;  %vm530_vm0 = vweird.f32 %v610_v46  ;;  %vm529_vm2 = vweird.f32 %v523_v51  ;;  %vm534_vm4 = vcmp.eq.f32.partialorder %v533_v20, 8.507059e+37 }
 0x14f   :  { %v526_v17 = vsub.f32 1.0, %v525_v5  ;;  %v468_v18 = vsel %vm467_vm14, %v608_v14, %v464_v62  ;;  %vm531_vm3 = vmor %vm529_vm2, %vm530_vm0  ;;  %v536_v52 = vor.u32 1.1754944e-38, %v535_v23 }
 0x150   :  { %v473_v21 = vsel %vm470_vm15, %v472_v22, %v468_v18  ;;  %v412_v30 = vadd.f32 %v411_v24, %v348_v16 }
 0x151   :  { %v527_v29 = vmul.f32 %v610_v46, %v526_v17  ;;  %v474_v6 = vmul.f32 %v759_v59, %v473_v21 }
 0x153   :  { %v528_v45 = vadd.f32 %v610_v46, %v527_v29  ;;  %v475_v32 = vmul.f32 %v678_v7, %v474_v6 }
 0x155   :  { %v532_v27 = vsel %vm531_vm3, %v610_v46, %v528_v45  ;;  %v476_v33 = vadd.f32 %v475_v32, %v412_v30 }
 0x156   :  { %v537_v47 = vsel %vm534_vm4, %v536_v52, %v532_v27 }
 0x157   :  { %v538_v28 = vmul.f32 %v778_v19, %v537_v47 }
 0x159   :  { %v539_v8 = vmul.f32 %v692_v9, %v538_v28 }
 0x15b   :  { %v540_v34 = vadd.f32 %v539_v8, %v476_v33 }
 0x15d   :  { %541 = vst.msk [vmem:[%s887_s4] sm:$0x3] %vm54_vm1, %v540_v34 }

// kernel: semantic_vector_forward.6
= control target key start
LH: loop header
LB: loop body
LE: loop exit
PB: predicated region body
PF: predicated region fallthrough
CT: control target
= control target key end

     0   :  { %vm28_vm0 = vcmask 15360   ;;  %v563_v0 = vmov 0.0   ;;  %s615_s27 = smov 0   ;;  %s748_s0 = inlined_call_operand.vmem [shape: f32[8,16,2], index: 0, kind: input, shape index: {}]   ;;  %s749_s1 = inlined_call_operand.vmem [shape: f32[32,16], index: 1, kind: input, shape index: {}]   ;;  %s750_s2 = inlined_call_operand.vmem [shape: f32[32,8], index: 2, kind: input, shape index: {}]   ;;  %s751_s3 = inlined_call_operand.vmem [shape: f32[32,1], index: 3, kind: input, shape index: {}]   ;;  %s752_s4 = inlined_call_operand.vmem [shape: f32[32,16], index: 4, kind: input, shape index: {}]   ;;  %s753_s5 = inlined_call_operand.vmem [shape: f32[32,8], index: 5, kind: input, shape index: {}]   ;;  %s754_s6 = inlined_call_operand.vmem [shape: f32[32,1], index: 6, kind: input, shape index: {}]   ;;  %s755_s7 = inlined_call_operand.vmem [shape: f32[8,8,2], index: 7, kind: output, shape index: {0}]   ;;  %s756_s8 = inlined_call_operand.vmem [shape: f32[8,8,2], index: 8, kind: output, shape index: {1}]  }
   0x1   :  { %29 = vst.msk [vmem:[#allocation2] sm:$0xff] %vm28_vm0, %v563_v0 }
   0x2   :  { %30 = vst.msk [vmem:[#allocation3] sm:$0xff] %vm28_vm0, %v563_v0 }
   0x3 LB: > { %v46_v2 = vld [vmem:[%s750_s2 + $0x8] sm:$0xff]  ;;  %vm50_vm1 = vcmask 64512   ;;  %v45_v3 = vld [vmem:[%s750_s2] sm:$0xff]  ;;  %s460_s10 = sshll.u32 %s557_s27, 4  ;;  %v564_v5 = vmov 0   ;;  %v137_v6 = vld [vmem:[%s751_s3 + $0x18] sm:$0xff]  ;;  %s557_s27 = sphi %s615_s27, %s36_s27  }
   0x4   : > { %v134_v4 = vld [vmem:[%s751_s3] sm:$0xff]  ;;  %s38_s15 = scalar_lea.vmem %s748_s0, %s460_s10  ;;  %511 = vset.pattern.permute.xlu0 %v564_v5  ;;  %512 = vset.pattern.permute.xlu1 %v564_v5  ;;  %vm92_vm2 = vcmask 130048   ;;  %v43_v10 = vld [vmem:[%s749_s1 + $0x10] sm:$0xff]  ;;  %v135_v12 = vld [vmem:[%s751_s3 + $0x8] sm:$0xff]  ;;  %s472_s13 = sshll.u32 %s557_s27, 3 }
   0x5   : > { %v40_v7 = vld [vmem:[%s38_s15 + $0x8] sm:$0xff]  ;;  %v39_v8 = vld [vmem:[%s38_s15] sm:$0xff]  ;;  %140 = vperm.xlu0 %511, %v134_v4   ;;  %155 = vperm.xlu1 %512, %v137_v6   ;;  %v47_v11 = vld [vmem:[%s750_s2 + $0x10] sm:$0xff]  ;;  %s229_s16 = scalar_lea.vmem %s755_s7, %s472_s13  ;;  %s36_s27 = sadd.s32 1, %s557_s27  }
   0x6   : > { %119 = vmatpush.msra.mxu1 %v40_v7  ;;  %487 = vmatpush.msra.mxu2 %v40_v7  ;;  %v41_v9 = vld [vmem:[%s749_s1] sm:$0xff]  ;;  %v136_v13 = vld [vmem:[%s751_s3 + $0x10] sm:$0xff]  ;;  %v42_v14 = vld [vmem:[%s749_s1 + $0x8] sm:$0xff]  ;;  %p33_p0 = scmp.ge.s32.totalorder %s36_s27, 8  }
   0x7   : > { %v44_v15 = vld [vmem:[%s749_s1 + $0x18] sm:$0xff]  ;;  %s682_s17 = smov (%p33_p0), 0  }
   0x8   : > { %v49_v1 = vld [vmem:[#allocation2] sm:$0xff]  ;;  %120 = vmatpush.msra.mxu1 %v39_v8  ;;  %488 = vmatpush.msra.mxu2 %v39_v8  ;;  %v48_v16 = vld [vmem:[%s750_s2 + $0x18] sm:$0xff] }
   0x9   : > { %486 = vmatpush.msra.mxu3 %v49_v1  ;;  %78 = vmatpush.msra.mxu0 %v49_v1  ;;  %v220_v63 = vld [vmem:[#allocation3] sm:$0xff] }
   0xa   : > { %462 = vmatmul.msk.f32.vlgmr.msra.gmra.mxu3 %vm50_vm1, %v46_v2  ;;  %461 = vmatmul.msk.f32.vlgmr.msra.gmra.mxu0 %vm50_vm1, %v45_v3 }
   0xb   : > { %465 = vmatmul.msk.f32.vlgmr.msra.gmra.mxu1 %vm92_vm2, %v41_v9  ;;  %467 = vmatmul.msk.f32.vlgmr.msra.gmra.mxu2 %vm92_vm2, %v43_v10 }
   0xd   : > { %145 = vperm.xlu0 %511, %v135_v12   ;;  %150 = vperm.xlu1 %512, %v136_v13  }
  0x12   : > { %463 = vmatmul.msk.f32.gmra.mxu3 %vm50_vm1, %v47_v11 }
  0x13   : > { %466 = vmatmul.msk.f32.gmra.mxu1 %vm92_vm2, %v42_v14  ;;  %468 = vmatmul.msk.f32.gmra.mxu2 %vm92_vm2, %v44_v15 }
  0x1a   : > { %464 = vmatmul.msk.f32.gmra.mxu3 %vm50_vm1, %v48_v16 }
  0x77   : > { %v141_v18 = vpop.permute.xlu0 %140  ;;  %v156_v35 = vpop.permute.xlu1 %155 }
  0x7f   : > { %v146_v28 = vpop.permute.xlu0 %145  ;;  %v151_v45 = vpop.permute.xlu1 %150 }
  0x87   : > { %v80_v17 = vpop.f32.mrf.mxu0 }
  0x88   : > { %v122_v20 = vpop.f32.mrf.mxu1 }
  0x89   : > { %v123_v21 = vadd.f32 %v122_v20, %v80_v17 }
  0x8b   : > { %v158_v22 = vadd.f32 %v141_v18, %v123_v21 }
  0x8d   : > { %v83_v19 = vpop.f32.mrf.mxu3  ;;  %v469_v23 = vmul.f32 -1.442695, %v158_v22 }
  0x8e   : > { %v128_v24 = vpop.f32.mrf.mxu2 }
  0x8f   : > { %513 = vpow2.f32 %v469_v23 }
  0x90   : > { %v125_v26 = vpop.f32.mrf.mxu1 }
  0x91   : > { %v126_v27 = vadd.f32 %v125_v26, %v83_v19 }
  0x93   : > { %v159_v29 = vadd.f32 %v146_v28, %v126_v27 }
  0x95   : > { %v86_v25 = vpop.f32.mrf.mxu3  ;;  %v514_v30 = vpop.eup %513  ;;  %v470_v31 = vmul.f32 -1.442695, %v159_v29 }
  0x96   : > { %v165_v32 = vadd.f32 1.0, %v514_v30  ;;  %v131_v33 = vpop.f32.mrf.mxu2  ;;  %v129_v44 = vadd.f32 %v128_v24, %v86_v25 }
  0x97   : > { %515 = vpow2.f32 %v470_v31 }
  0x98   : > { %517 = vrcp.f32 %v165_v32  ;;  %v160_v49 = vadd.f32 %v151_v45, %v129_v44  ;;  %v177_v53 = vand.u32 2147483648, %v165_v32  ;;  %vm171_vm4 = vweird.f32 %v165_v32 }
  0x99   : > { %v175_v55 = vand.u32 2147483647, %v165_v32 }
  0x9a   : > { %v178_v60 = vor.u32 1.1754944e-38, %v177_v53 }
  0x9b   : > { %vm176_vm8 = vcmp.eq.f32.partialorder %v175_v55, 8.507059e+37 }
  0x9d   : > { %v89_v34 = vpop.f32.mrf.mxu3  ;;  %v516_v38 = vpop.eup %515 }
  0x9e   : > { %v132_v36 = vadd.f32 %v131_v33, %v89_v34  ;;  %v518_v40 = vpop.eup %517  ;;  %v184_v41 = vadd.f32 1.0, %v516_v38 }
  0x9f   : > { %v167_v42 = vmul.f32 %v518_v40, %v165_v32  ;;  %vm172_vm3 = vweird.f32 %v518_v40 }
  0xa0   : > { %v161_v37 = vadd.f32 %v156_v35, %v132_v36  ;;  %v196_v56 = vand.u32 2147483648, %v184_v41  ;;  %vm173_vm5 = vmor %vm171_vm4, %vm172_vm3  ;;  %v194_v59 = vand.u32 2147483647, %v184_v41  ;;  %vm190_vm7 = vweird.f32 %v184_v41 }
  0xa1   : > { %v168_v43 = vsub.f32 1.0, %v167_v42 }
  0xa2   : > { %v471_v39 = vmul.f32 -1.442695, %v161_v37  ;;  %v197_v2 = vor.u32 1.1754944e-38, %v196_v56  ;;  %vm195_vm10 = vcmp.eq.f32.partialorder %v194_v59, 8.507059e+37 }
  0xa3   : > { %v169_v46 = vmul.f32 %v518_v40, %v168_v43 }
  0xa4   : > { %519 = vpow2.f32 %v471_v39 }
  0xa5   : > { %521 = vrcp.f32 %v184_v41  ;;  %v170_v52 = vadd.f32 %v518_v40, %v169_v46 }
  0xa7   : > { %v174_v58 = vsel %vm173_vm5, %v518_v40, %v170_v52 }
  0xa8   : > { %v179_v1 = vsel %vm176_vm8, %v178_v60, %v174_v58 }
  0xaa   : > { %v520_v47 = vpop.eup %519 }
  0xab   : > { %v522_v48 = vpop.eup %521  ;;  %v204_v50 = vadd.f32 1.0, %v520_v47 }
  0xac   : > { %v186_v51 = vmul.f32 %v522_v48, %v184_v41  ;;  %vm191_vm6 = vweird.f32 %v522_v48 }
  0xad   : > { %523 = vrcp.f32 %v204_v50  ;;  %vm192_vm9 = vmor %vm190_vm7, %vm191_vm6  ;;  %v216_v13 = vand.u32 2147483648, %v204_v50  ;;  %vm210_vm12 = vweird.f32 %v204_v50  ;;  %v214_v14 = vand.u32 2147483647, %v204_v50 }
  0xae   : > { %v187_v54 = vsub.f32 1.0, %v186_v51  ;;  %525 = vtanh.f32 %v160_v49 }
  0xaf   : > { %v217_v16 = vor.u32 1.1754944e-38, %v216_v13  ;;  %vm215_vm14 = vcmp.eq.f32.partialorder %v214_v14, 8.507059e+37 }
  0xb0   : > { %v188_v57 = vmul.f32 %v522_v48, %v187_v54 }
  0xb2   : > { %v189_v61 = vadd.f32 %v522_v48, %v188_v57 }
  0xb3   : > { %v524_v62 = vpop.eup %523 }
  0xb4   : > { %v193_v3 = vsel %vm192_vm9, %v522_v48, %v189_v61  ;;  %v206_v4 = vmul.f32 %v524_v62, %v204_v50  ;;  %v526_v5 = vpop.eup %525  ;;  %vm211_vm11 = vweird.f32 %v524_v62 }
  0xb5   : > { %v198_v6 = vsel %vm195_vm10, %v197_v2, %v193_v3  ;;  %v222_v8 = vmul.f32 %v526_v5, %v179_v1  ;;  %vm212_vm13 = vmor %vm210_vm12, %vm211_vm11 }
  0xb6   : > { %v221_v7 = vmul.f32 %v220_v63, %v198_v6  ;;  %v207_v9 = vsub.f32 1.0, %v206_v4 }
  0xb8   : > { %v223_v10 = vadd.f32 %v222_v8, %v221_v7  ;;  %v208_v11 = vmul.f32 %v524_v62, %v207_v9 }
  0xba   : > { %527 = vtanh.f32 %v223_v10  ;;  %226 = vst.msk [vmem:[#allocation3] sm:$0xff] %vm28_vm0, %v223_v10  ;;  %v209_v12 = vadd.f32 %v524_v62, %v208_v11 }
  0xbb   :  { %232 = vst.msk [vmem:[#allocation3] sm:$0xff] (%p33_p0), %vm28_vm0, %v563_v0 }
  0xbc   : > { %v213_v15 = vsel %vm212_vm13, %v524_v62, %v209_v12 }
  0xbd   : > { %v218_v18 = vsel %vm215_vm14, %v217_v16, %v213_v15 }
  0xc0   : > { %v528_v17 = vpop.eup %527  ;;  %35 = sbr.rel (!%p33_p0) target bundleno = 3 (0x3), region = 74 }
  0xc1   : > { %v225_v19 = vmul.f32 %v528_v17, %v218_v18 }
  0xc3   : > { %227 = vst.msk [vmem:[#allocation2] sm:$0xff] %vm28_vm0, %v225_v19 }
  0xc4   : > { %230 = vst.msk [vmem:[%s229_s16] sm:$0xff] %vm28_vm0, %v225_v19 }
  0xc5   :  { %231 = vst.msk [vmem:[#allocation2] sm:$0xff] %vm28_vm0, %v563_v0 }
  0xc6 LB: > { %v249_v21 = vld [vmem:[%s753_s5 + $0x8] sm:$0xff]  ;;  %v248_v22 = vld [vmem:[%s753_s5] sm:$0xff]  ;;  %s239_s3 = ssub.s32 7, %s561_s17  ;;  %v565_v23 = vmov 0   ;;  %v340_v24 = vld [vmem:[%s754_s6 + $0x18] sm:$0xff]  ;;  %s238_s17 = sadd.s32 1, %s561_s17   ;;  %s561_s17 = sphi %s682_s17, %s238_s17  }
  0xc7   : > { %v337_v0 = vld [vmem:[%s754_s6] sm:$0xff]  ;;  %s473_s20 = sshll.u32 %s239_s3, 4  ;;  %529 = vset.pattern.permute.xlu0 %v565_v23  ;;  %530 = vset.pattern.permute.xlu1 %v565_v23  ;;  %v246_v28 = vld [vmem:[%s752_s4 + $0x10] sm:$0xff]  ;;  %v338_v30 = vld [vmem:[%s754_s6 + $0x8] sm:$0xff]  ;;  %s485_s7 = sshll.u32 %s239_s3, 3 }
  0xc8   : > { %s241_s25 = scalar_lea.vmem %s748_s0, %s473_s20  ;;  %343 = vperm.xlu0 %529, %v337_v0   ;;  %358 = vperm.xlu1 %530, %v340_v24   ;;  %v244_v27 = vld [vmem:[%s752_s4] sm:$0xff]  ;;  %v250_v29 = vld [vmem:[%s753_s5 + $0x10] sm:$0xff]  ;;  %v245_v32 = vld [vmem:[%s752_s4 + $0x8] sm:$0xff]  ;;  %s432_s21 = scalar_lea.vmem %s756_s8, %s485_s7 }
  0xc9   : > { %v243_v25 = vld [vmem:[%s241_s25 + $0x8] sm:$0xff]  ;;  %v242_v26 = vld [vmem:[%s241_s25] sm:$0xff]  ;;  %v339_v31 = vld [vmem:[%s754_s6 + $0x10] sm:$0xff]  ;;  %p235_p1 = scmp.ge.s32.totalorder %s238_s17, 8  }
  0xca   : > { %322 = vmatpush.msra.mxu1 %v243_v25  ;;  %490 = vmatpush.msra.mxu2 %v243_v25  ;;  %v247_v33 = vld [vmem:[%s752_s4 + $0x18] sm:$0xff]  ;;  %v423_v18 = vld [vmem:[#allocation3] sm:$0xff] }
  0xcb   : > { %v251_v34 = vld [vmem:[%s753_s5 + $0x18] sm:$0xff] }
  0xcc   : > { %v252_v20 = vld [vmem:[#allocation2] sm:$0xff]  ;;  %323 = vmatpush.msra.mxu1 %v242_v26  ;;  %491 = vmatpush.msra.mxu2 %v242_v26 }
  0xcd   : > { %489 = vmatpush.msra.mxu3 %v252_v20  ;;  %281 = vmatpush.msra.mxu0 %v252_v20 }
  0xce   : > { %475 = vmatmul.msk.f32.vlgmr.msra.gmra.mxu3 %vm50_vm1, %v249_v21  ;;  %474 = vmatmul.msk.f32.vlgmr.msra.gmra.mxu0 %vm50_vm1, %v248_v22 }
  0xcf   : > { %478 = vmatmul.msk.f32.vlgmr.msra.gmra.mxu1 %vm92_vm2, %v244_v27  ;;  %480 = vmatmul.msk.f32.vlgmr.msra.gmra.mxu2 %vm92_vm2, %v246_v28 }
  0xd0   : > { %348 = vperm.xlu0 %529, %v338_v30   ;;  %353 = vperm.xlu1 %530, %v339_v31  }
  0xd6   : > { %476 = vmatmul.msk.f32.gmra.mxu3 %vm50_vm1, %v250_v29 }
  0xd7   : > { %479 = vmatmul.msk.f32.gmra.mxu1 %vm92_vm2, %v245_v32  ;;  %481 = vmatmul.msk.f32.gmra.mxu2 %vm92_vm2, %v247_v33 }
  0xde   : > { %477 = vmatmul.msk.f32.gmra.mxu3 %vm50_vm1, %v251_v34 }
 0x13a   : > { %v344_v37 = vpop.permute.xlu0 %343  ;;  %v359_v53 = vpop.permute.xlu1 %358 }
 0x142   : > { %v349_v46 = vpop.permute.xlu0 %348  ;;  %v354_v63 = vpop.permute.xlu1 %353 }
 0x14b   : > { %v283_v35 = vpop.f32.mrf.mxu0 }
 0x14c   : > { %v325_v38 = vpop.f32.mrf.mxu1 }
 0x14d   : > { %v326_v39 = vadd.f32 %v325_v38, %v283_v35 }
 0x14f   : > { %v361_v40 = vadd.f32 %v344_v37, %v326_v39 }
 0x151   : > { %v286_v36 = vpop.f32.mrf.mxu3  ;;  %v482_v41 = vmul.f32 -1.442695, %v361_v40 }
 0x152   : > { %v331_v42 = vpop.f32.mrf.mxu2 }
 0x153   : > { %531 = vpow2.f32 %v482_v41 }
 0x154   : > { %v328_v44 = vpop.f32.mrf.mxu1 }
 0x155   : > { %v329_v45 = vadd.f32 %v328_v44, %v286_v36 }
 0x157   : > { %v362_v47 = vadd.f32 %v349_v46, %v329_v45 }
 0x159   : > { %v289_v43 = vpop.f32.mrf.mxu3  ;;  %v532_v48 = vpop.eup %531  ;;  %v483_v49 = vmul.f32 -1.442695, %v362_v47 }
 0x15a   : > { %v368_v50 = vadd.f32 1.0, %v532_v48  ;;  %v334_v51 = vpop.f32.mrf.mxu2  ;;  %v332_v62 = vadd.f32 %v331_v42, %v289_v43 }
 0x15b   : > { %533 = vpow2.f32 %v483_v49 }
 0x15c   : > { %535 = vrcp.f32 %v368_v50  ;;  %v363_v4 = vadd.f32 %v354_v63, %v332_v62  ;;  %v380_v8 = vand.u32 2147483648, %v368_v50  ;;  %vm374_vm3 = vweird.f32 %v368_v50 }
 0x15d   : > { %v378_v10 = vand.u32 2147483647, %v368_v50 }
 0x15e   : > { %v381_v15 = vor.u32 1.1754944e-38, %v380_v8 }
 0x15f   : > { %vm379_vm7 = vcmp.eq.f32.partialorder %v378_v10, 8.507059e+37 }
 0x161   : > { %v292_v52 = vpop.f32.mrf.mxu3  ;;  %v534_v56 = vpop.eup %533 }
 0x162   : > { %v335_v54 = vadd.f32 %v334_v51, %v292_v52  ;;  %v536_v58 = vpop.eup %535  ;;  %v387_v59 = vadd.f32 1.0, %v534_v56 }
 0x163   : > { %v370_v60 = vmul.f32 %v536_v58, %v368_v50  ;;  %vm375_vm15 = vweird.f32 %v536_v58 }
 0x164   : > { %v364_v55 = vadd.f32 %v359_v53, %v335_v54  ;;  %v399_v11 = vand.u32 2147483648, %v387_v59  ;;  %vm376_vm4 = vmor %vm374_vm3, %vm375_vm15  ;;  %v397_v14 = vand.u32 2147483647, %v387_v59  ;;  %vm393_vm6 = vweird.f32 %v387_v59 }
 0x165   : > { %v371_v61 = vsub.f32 1.0, %v370_v60 }
 0x166   : > { %v484_v57 = vmul.f32 -1.442695, %v364_v55  ;;  %v400_v20 = vor.u32 1.1754944e-38, %v399_v11  ;;  %vm398_vm9 = vcmp.eq.f32.partialorder %v397_v14, 8.507059e+37 }
 0x167   : > { %v372_v1 = vmul.f32 %v536_v58, %v371_v61 }
 0x168   : > { %537 = vpow2.f32 %v484_v57 }
 0x169   : > { %539 = vrcp.f32 %v387_v59  ;;  %v373_v7 = vadd.f32 %v536_v58, %v372_v1 }
 0x16b   : > { %v377_v13 = vsel %vm376_vm4, %v536_v58, %v373_v7 }
 0x16c   : > { %v382_v19 = vsel %vm379_vm7, %v381_v15, %v377_v13 }
 0x16e   : > { %v538_v2 = vpop.eup %537 }
 0x16f   : > { %v540_v3 = vpop.eup %539  ;;  %v407_v5 = vadd.f32 1.0, %v538_v2 }
 0x170   : > { %v389_v6 = vmul.f32 %v540_v3, %v387_v59  ;;  %vm394_vm5 = vweird.f32 %v540_v3 }
 0x171   : > { %541 = vrcp.f32 %v407_v5  ;;  %vm395_vm8 = vmor %vm393_vm6, %vm394_vm5  ;;  %v419_v30 = vand.u32 2147483648, %v407_v5  ;;  %vm413_vm11 = vweird.f32 %v407_v5  ;;  %v417_v31 = vand.u32 2147483647, %v407_v5 }
 0x172   : > { %v390_v9 = vsub.f32 1.0, %v389_v6  ;;  %543 = vtanh.f32 %v363_v4 }
 0x173   : > { %v420_v33 = vor.u32 1.1754944e-38, %v419_v30  ;;  %vm418_vm13 = vcmp.eq.f32.partialorder %v417_v31, 8.507059e+37 }
 0x174   : > { %v391_v12 = vmul.f32 %v540_v3, %v390_v9 }
 0x176   : > { %v392_v16 = vadd.f32 %v540_v3, %v391_v12 }
 0x177   : > { %v542_v17 = vpop.eup %541 }
 0x178   : > { %v396_v21 = vsel %vm395_vm8, %v540_v3, %v392_v16  ;;  %v409_v22 = vmul.f32 %v542_v17, %v407_v5  ;;  %v544_v0 = vpop.eup %543  ;;  %vm414_vm10 = vweird.f32 %v542_v17 }
 0x179   : > { %v401_v23 = vsel %vm398_vm9, %v400_v20, %v396_v21  ;;  %v425_v25 = vmul.f32 %v544_v0, %v382_v19  ;;  %vm415_vm12 = vmor %vm413_vm11, %vm414_vm10 }
 0x17a   : > { %v424_v24 = vmul.f32 %v423_v18, %v401_v23  ;;  %v410_v26 = vsub.f32 1.0, %v409_v22 }
 0x17c   : > { %v426_v27 = vadd.f32 %v425_v25, %v424_v24  ;;  %v411_v28 = vmul.f32 %v542_v17, %v410_v26 }
 0x17e   : > { %545 = vtanh.f32 %v426_v27  ;;  %429 = vst.msk [vmem:[#allocation3] sm:$0xff] %vm28_vm0, %v426_v27  ;;  %v412_v29 = vadd.f32 %v542_v17, %v411_v28 }
 0x180   : > { %v416_v32 = vsel %vm415_vm12, %v542_v17, %v412_v29 }
 0x181   : > { %v421_v35 = vsel %vm418_vm13, %v420_v33, %v416_v32 }
 0x184   : > { %v546_v34 = vpop.eup %545  ;;  %237 = sbr.rel (!%p235_p1) target bundleno = 198 (0xc6), region = 85 }
 0x185   : > { %v428_v36 = vmul.f32 %v546_v34, %v421_v35 }
 0x187   : > { %430 = vst.msk [vmem:[#allocation2] sm:$0xff] %vm28_vm0, %v428_v36 }
 0x188   : > { %433 = vst.msk [vmem:[%s432_s21] sm:$0xff] %vm28_vm0, %v428_v36 }

</bundles_post_ra>
